<compile_context>
chip_gen: v5e
topology: v5e:2x2
jax: 0.10.0
libtpu: 0.0.40
codegen_flags: <defaults>
</compile_context>

<pallas_src>
import jax
import jax.numpy as jnp
from jax.experimental import pallas as pl
from jax.experimental.pallas import tpu as pltpu


MATMUL_DTYPE = jnp.bfloat16   # MXU operands only; epilogues / biases stay f32.


# ----------------------------- in-kernel helpers -----------------------------
def _row_phase(plane, ho, ki):
    """plane: (B, 2*ho+2, Wp, C) padded-row plane.  Returns padded rows
    ki, ki+2, ..., ki+2*(ho-1) as (B*ho, Wp, C), row m = b*ho + oh.
    Leading-dim slice + regroup only (free)."""
    b, _, wp, c = plane.shape
    v = plane[:, ki:ki + 2 * ho, :, :]
    v = v.reshape(b * ho, 2, wp, c)             # leading-dim regrouping only
    return v[:, 0, :, :]                        # (B*ho, Wp, C)


def _padded_col_planes(y):
    """y: (B, H, W, C), H and W even.  Even / odd column planes of the
    circularly padded (pad=1) activation, each (B, H+2, W//2 + 1, C)."""
    b, h, w, c = y.shape
    yr = jnp.concatenate([y[:, h - 1:h], y, y[:, 0:1]], axis=1)   # row wrap (leading dim)
    yp = yr.reshape(b, h + 2, w // 2, 2, c)                       # last dim preserved
    ev = yp[:, :, :, 0, :]          # original even cols 0, 2, ..., W-2
    od = yp[:, :, :, 1, :]          # original odd  cols 1, 3, ..., W-1
    # padded column p corresponds to original column (p-1) mod W
    e = jnp.concatenate([yr[:, :, w - 1:w, :], od], axis=2)       # padded cols 0,2,...,W
    o = jnp.concatenate([ev, yr[:, :, 0:1, :]], axis=2)           # padded cols 1,3,...,W+1
    return e, o


def _conv_stage(e, o, w, bias, ho, wo):
    """3x3 / stride-2 / circular conv + bias + ReLU as ONE im2col MXU matmul.

    e, o : (B, 2*ho+2, wo+1, cin) even / odd column planes of the padded input.
    w    : (9*cin, cout), rows ordered (ki, kj, cin)   (bf16)
    bias : (1, cout)                                    (f32)
    Returns (B, ho, wo, cout) in f32.
    """
    b, _, _, cin = e.shape
    taps = []
    for ki in range(3):
        er = _row_phase(e, ho, ki)              # (B*ho, wo+1, cin)
        og = _row_phase(o, ho, ki)
        taps.append(er[:, 0:wo, :])             # kj = 0 -> padded col 2*ow
        taps.append(og[:, 0:wo, :])             # kj = 1 -> padded col 2*ow + 1
        taps.append(er[:, 1:wo + 1, :])         # kj = 2 -> padded col 2*ow + 2
    patches = jnp.concatenate(taps, axis=2)     # (B*ho, wo, 9*cin)
    patches = patches.reshape(b * ho * wo, 9 * cin)        # single 2D matmul operand
    y = jnp.dot(patches.astype(w.dtype), w,
                preferred_element_type=jnp.float32)         # (B*ho*wo, cout) f32
    y = jnp.maximum(y + bias, 0.0)
    return y.reshape(b, ho, wo, -1)


# ------------------------------ parameter prep -------------------------------
def prepare_params(raw, matmul_dtype=MATMUL_DTYPE):
    """One-time weight preparation into the layouts / dtypes the kernel consumes."""
    def conv_w(w):                               # (cout, cin, 3, 3) -> (9*cin, cout)
        cout, cin = w.shape[0], w.shape[1]
        return jnp.transpose(w, (2, 3, 1, 0)).reshape(9 * cin, cout).astype(matmul_dtype)

    wlin = raw["linear_w"]                       # (16, 128*s3*s3), torch layout
    nf, flat = wlin.shape
    s2 = flat // 128                             # number of conv3 spatial positions
    # torch Flatten is NCHW (channel-major): fold that order into wl so the
    # in-kernel flatten can be (oh, ow, c)-ordered (one lane concat, no transpose).
    wl = jnp.transpose(wlin.reshape(nf, 128, s2), (2, 1, 0)).reshape(s2 * 128, nf)
    # fused mean | log_var head
    wh = jnp.concatenate([raw["mean_w"].T, raw["lvar_w"].T], axis=1)      # (16, 2L)
    bh = jnp.concatenate([raw["mean_b"], raw["lvar_b"]]).reshape(1, -1)   # (1, 2L)
    return {
        "w1": conv_w(raw["conv1_w"]), "b1": raw["conv1_b"].reshape(1, -1),
        "w2": conv_w(raw["conv2_w"]), "b2": raw["conv2_b"].reshape(1, -1),
        "w3": conv_w(raw["conv3_w"]), "b3": raw["conv3_b"].reshape(1, -1),
        "wl": wl.astype(matmul_dtype), "bl": raw["linear_b"].reshape(1, -1),
        "wh": wh.astype(jnp.float32), "bh": bh.astype(jnp.float32),
    }


# ------------------------------ fused forward --------------------------------
def variational_encoder_ising_forward(params, x_nchw, noise):
    """Pallas forward of VariationalEncoderIsing -> (z_mean, z_log_var, z, None)."""
    bsz, cin, dist, _ = x_nchw.shape
    assert dist % 8 == 0, "this Pallas port assumes distance divisible by 8"
    h1, h2, h3 = dist // 2, dist // 4, dist // 8
    latent = params["bh"].shape[1] // 2

    # Tiny one-time NCHW -> NHWC outside (4 KiB); everything else is in-kernel.
    x_nhwc = jnp.transpose(x_nchw, (0, 2, 3, 1)).astype(jnp.float32)

    def kernel(x_ref, w1_ref, b1_ref, w2_ref, b2_ref, w3_ref, b3_ref,
               wl_ref, bl_ref, wh_ref, bh_ref, noise_ref, out_ref):
        x = x_ref[...]                                           # (B, d, d, cin)
        # conv1 + relu : (B, d, d, cin)  -> (B, h1, h1, 32)
        e1, o1 = _padded_col_planes(x)
        y1 = _conv_stage(e1, o1, w1_ref[...], b1_ref[...], h1, h1)
        # conv2 + relu : -> (B, h2, h2, 64)
        e2, o2 = _padded_col_planes(y1)
        y2 = _conv_stage(e2, o2, w2_ref[...], b2_ref[...], h2, h2)
        # conv3 + relu : -> (B, h3, h3, 128)
        e3, o3 = _padded_col_planes(y2)
        y3 = _conv_stage(e3, o3, w3_ref[...], b3_ref[...], h3, h3)

        # flatten (NCHW order folded into wl) + linear + relu : ONE matmul.
        slabs = [y3[:, oh, ow, :] for oh in range(h3) for ow in range(h3)]
        flat = jnp.concatenate(slabs, axis=1)                    # (B, h3*h3*128)
        wl = wl_ref[...]
        h = jnp.dot(flat.astype(wl.dtype), wl,
                    preferred_element_type=jnp.float32)
        h = jnp.maximum(h + bl_ref[...], 0.0)                    # (B, 16)

        # fused fc_mean | fc_log_var head + reparameterization trick.
        zz = jnp.dot(h, wh_ref[...],
                     preferred_element_type=jnp.float32) + bh_ref[...]   # (B, 2L)
        zm = zz[:, 0:latent]
        zl = zz[:, latent:2 * latent]
        z = zm + jnp.exp(0.5 * zl) * noise_ref[...]
        # one lane-dense output store: [ z_mean | z_log_var | z ]
        out_ref[...] = jnp.concatenate([zm, zl, z], axis=1)

    vmem = pl.BlockSpec(memory_space=pltpu.MemorySpace.VMEM)
    out = pl.pallas_call(
        kernel,
        out_shape=jax.ShapeDtypeStruct((bsz, 3 * latent), jnp.float32),
        in_specs=[vmem] * 12,
        out_specs=vmem,
    )(x_nhwc,
      params["w1"], params["b1"], params["w2"], params["b2"],
      params["w3"], params["b3"], params["wl"], params["bl"],
      params["wh"], params["bh"], noise)

    z_mean = out[:, 0:latent]
    z_log_var = out[:, latent:2 * latent]
    z = out[:, 2 * latent:3 * latent]
    return z_mean, z_log_var, z, None


# ------------------------- pure-JAX reference (check) -------------------------
def reference_forward(raw, x_nchw, noise):
    def conv(x, w, b):
        xpad = jnp.pad(x, ((0, 0), (1, 1), (1, 1), (0, 0)), mode="wrap")
        y = jax.lax.conv_general_dilated(
            xpad, jnp.transpose(w, (2, 3, 1, 0)), window_strides=(2, 2),
            padding="VALID", dimension_numbers=("NHWC", "HWIO", "NHWC"))
        return jax.nn.relu(y + b.reshape(1, 1, 1, -1))

    x = jnp.transpose(x_nchw, (0, 2, 3, 1)).astype(jnp.float32)
    x = conv(x, raw["conv1_w"], raw["conv1_b"])
    x = conv(x, raw["conv2_w"], raw["conv2_b"])
    x = conv(x, raw["conv3_w"], raw["conv3_b"])
    x = jnp.transpose(x, (0, 3, 1, 2)).reshape(x.shape[0], -1)   # torch Flatten (NCHW)
    h = jax.nn.relu(x @ raw["linear_w"].T + raw["linear_b"])
    zm = h @ raw["mean_w"].T + raw["mean_b"]
    zl = h @ raw["lvar_w"].T + raw["lvar_b"]
    return zm, zl, zm + jnp.exp(0.5 * zl) * noise


# ----------------------------------- main -------------------------------------
if __name__ == "__main__":
    distance, channels, latent_dims, batch = 16, 4, 8, 2

    key = jax.random.PRNGKey(0)
    ks = jax.random.split(key, 16)

    def init(k, shape, scale=0.1):
        return scale * jax.random.normal(k, shape, dtype=jnp.float32)

    flat = 128 * int((distance - 1) / 8 + 1) ** 2        # 512 for distance 16
    raw = {
        "conv1_w": init(ks[0], (32, channels, 3, 3)), "conv1_b": init(ks[1], (32,)),
        "conv2_w": init(ks[2], (64, 32, 3, 3)),       "conv2_b": init(ks[3], (64,)),
        "conv3_w": init(ks[4], (128, 64, 3, 3)),      "conv3_b": init(ks[5], (128,)),
        "linear_w": init(ks[6], (16, flat)),          "linear_b": init(ks[7], (16,)),
        "mean_w": init(ks[8], (latent_dims, 16)),     "mean_b": init(ks[9], (latent_dims,)),
        "lvar_w": init(ks[10], (latent_dims, 16)),    "lvar_b": init(ks[11], (latent_dims,)),
    }
    params = prepare_params(raw)                         # one-time weight prep

    x = jax.random.normal(ks[12], (batch, channels, distance, distance),
                          dtype=jnp.float32)
    # N(0,1) noise for the reparameterization trick (torch.distributions.Normal).
    noise = jax.random.normal(ks[13], (batch, latent_dims), dtype=jnp.float32)

    fwd = jax.jit(variational_encoder_ising_forward)
    z_mean, z_log_var, z, _ = fwd(params, x, noise)
    jax.block_until_ready((z_mean, z_log_var, z))

    assert z_mean.shape == (batch, latent_dims)
    assert z_log_var.shape == (batch, latent_dims)
    assert z.shape == (batch, latent_dims)

    rm, rl, rz = reference_forward(raw, x, noise)
    assert jnp.allclose(z_mean, rm, atol=5e-2, rtol=5e-2), "z_mean mismatch"
    assert jnp.allclose(z_log_var, rl, atol=5e-2, rtol=5e-2), "z_log_var mismatch"
    assert jnp.allclose(z, rz, atol=5e-2, rtol=5e-2), "z mismatch"

    print("KERNEL_OK")
</pallas_src>

<mosaic_0001>
module attributes {stable_mosaic.version = 11 : i64} {
  func.func @kernel(%arg0: memref<2x16x16x4xf32, #tpu.memory_space<vmem>>, %arg1: memref<36x32xbf16, #tpu.memory_space<vmem>>, %arg2: memref<1x32xf32, #tpu.memory_space<vmem>>, %arg3: memref<288x64xbf16, #tpu.memory_space<vmem>>, %arg4: memref<1x64xf32, #tpu.memory_space<vmem>>, %arg5: memref<576x128xbf16, #tpu.memory_space<vmem>>, %arg6: memref<1x128xf32, #tpu.memory_space<vmem>>, %arg7: memref<512x16xbf16, #tpu.memory_space<vmem>>, %arg8: memref<1x16xf32, #tpu.memory_space<vmem>>, %arg9: memref<16x16xf32, #tpu.memory_space<vmem>>, %arg10: memref<1x16xf32, #tpu.memory_space<vmem>>, %arg11: memref<2x8xf32, #tpu.memory_space<vmem>>, %arg12: memref<2x24xf32, #tpu.memory_space<vmem>>) attributes {dimension_semantics = [], scalar_prefetch = 0 : i64, scratch_operands = 0 : i64, tpu.core_type = #tpu.core_type<tc>} {
    %c0 = arith.constant 0 : index
    %c0_0 = arith.constant 0 : index
    %c0_1 = arith.constant 0 : index
    %c0_2 = arith.constant 0 : index
    %0 = vector.load %arg0[%c0, %c0_0, %c0_1, %c0_2] : memref<2x16x16x4xf32, #tpu.memory_space<vmem>>, vector<2x16x16x4xf32>
    %1 = vector.extract_strided_slice %0 {offsets = [0, 15, 0, 0], sizes = [2, 1, 16, 4], strides = [1, 1, 1, 1]} : vector<2x16x16x4xf32> to vector<2x1x16x4xf32>
    %2 = vector.extract_strided_slice %0 {offsets = [0, 0, 0, 0], sizes = [2, 1, 16, 4], strides = [1, 1, 1, 1]} : vector<2x16x16x4xf32> to vector<2x1x16x4xf32>
    %3 = tpu.concatenate %1, %0, %2 in 1 : vector<2x1x16x4xf32>, vector<2x16x16x4xf32>, vector<2x1x16x4xf32> -> vector<2x18x16x4xf32>
    %4 = vector.shape_cast %3 : vector<2x18x16x4xf32> to vector<2x18x8x2x4xf32>
    %5 = vector.extract_strided_slice %4 {offsets = [0, 0, 0, 0, 0], sizes = [2, 18, 8, 1, 4], strides = [1, 1, 1, 1, 1]} : vector<2x18x8x2x4xf32> to vector<2x18x8x1x4xf32>
    %6 = vector.shape_cast %5 : vector<2x18x8x1x4xf32> to vector<2x18x8x4xf32>
    %7 = vector.extract_strided_slice %4 {offsets = [0, 0, 0, 1, 0], sizes = [2, 18, 8, 1, 4], strides = [1, 1, 1, 1, 1]} : vector<2x18x8x2x4xf32> to vector<2x18x8x1x4xf32>
    %8 = vector.shape_cast %7 : vector<2x18x8x1x4xf32> to vector<2x18x8x4xf32>
    %9 = vector.extract_strided_slice %3 {offsets = [0, 0, 15, 0], sizes = [2, 18, 1, 4], strides = [1, 1, 1, 1]} : vector<2x18x16x4xf32> to vector<2x18x1x4xf32>
    %10 = tpu.concatenate %9, %8 in 2 : vector<2x18x1x4xf32>, vector<2x18x8x4xf32> -> vector<2x18x9x4xf32>
    %11 = vector.extract_strided_slice %3 {offsets = [0, 0, 0, 0], sizes = [2, 18, 1, 4], strides = [1, 1, 1, 1]} : vector<2x18x16x4xf32> to vector<2x18x1x4xf32>
    %12 = tpu.concatenate %6, %11 in 2 : vector<2x18x8x4xf32>, vector<2x18x1x4xf32> -> vector<2x18x9x4xf32>
    %c0_3 = arith.constant 0 : index
    %c0_4 = arith.constant 0 : index
    %13 = vector.load %arg1[%c0_3, %c0_4] : memref<36x32xbf16, #tpu.memory_space<vmem>>, vector<36x32xbf16>
    %c0_5 = arith.constant 0 : index
    %c0_6 = arith.constant 0 : index
    %14 = vector.load %arg2[%c0_5, %c0_6] : memref<1x32xf32, #tpu.memory_space<vmem>>, vector<1x32xf32>
    %15 = vector.extract_strided_slice %10 {offsets = [0, 0, 0, 0], sizes = [2, 16, 9, 4], strides = [1, 1, 1, 1]} : vector<2x18x9x4xf32> to vector<2x16x9x4xf32>
    %16 = vector.shape_cast %15 : vector<2x16x9x4xf32> to vector<16x2x9x4xf32>
    %17 = vector.extract_strided_slice %16 {offsets = [0, 0, 0, 0], sizes = [16, 1, 9, 4], strides = [1, 1, 1, 1]} : vector<16x2x9x4xf32> to vector<16x1x9x4xf32>
    %18 = vector.shape_cast %17 : vector<16x1x9x4xf32> to vector<16x9x4xf32>
    %19 = vector.extract_strided_slice %12 {offsets = [0, 0, 0, 0], sizes = [2, 16, 9, 4], strides = [1, 1, 1, 1]} : vector<2x18x9x4xf32> to vector<2x16x9x4xf32>
    %20 = vector.shape_cast %19 : vector<2x16x9x4xf32> to vector<16x2x9x4xf32>
    %21 = vector.extract_strided_slice %20 {offsets = [0, 0, 0, 0], sizes = [16, 1, 9, 4], strides = [1, 1, 1, 1]} : vector<16x2x9x4xf32> to vector<16x1x9x4xf32>
    %22 = vector.shape_cast %21 : vector<16x1x9x4xf32> to vector<16x9x4xf32>
    %23 = vector.extract_strided_slice %18 {offsets = [0, 0, 0], sizes = [16, 8, 4], strides = [1, 1, 1]} : vector<16x9x4xf32> to vector<16x8x4xf32>
    %24 = vector.extract_strided_slice %22 {offsets = [0, 0, 0], sizes = [16, 8, 4], strides = [1, 1, 1]} : vector<16x9x4xf32> to vector<16x8x4xf32>
    %25 = vector.extract_strided_slice %18 {offsets = [0, 1, 0], sizes = [16, 8, 4], strides = [1, 1, 1]} : vector<16x9x4xf32> to vector<16x8x4xf32>
    %26 = vector.extract_strided_slice %10 {offsets = [0, 1, 0, 0], sizes = [2, 16, 9, 4], strides = [1, 1, 1, 1]} : vector<2x18x9x4xf32> to vector<2x16x9x4xf32>
    %27 = vector.shape_cast %26 : vector<2x16x9x4xf32> to vector<16x2x9x4xf32>
    %28 = vector.extract_strided_slice %27 {offsets = [0, 0, 0, 0], sizes = [16, 1, 9, 4], strides = [1, 1, 1, 1]} : vector<16x2x9x4xf32> to vector<16x1x9x4xf32>
    %29 = vector.shape_cast %28 : vector<16x1x9x4xf32> to vector<16x9x4xf32>
    %30 = vector.extract_strided_slice %12 {offsets = [0, 1, 0, 0], sizes = [2, 16, 9, 4], strides = [1, 1, 1, 1]} : vector<2x18x9x4xf32> to vector<2x16x9x4xf32>
    %31 = vector.shape_cast %30 : vector<2x16x9x4xf32> to vector<16x2x9x4xf32>
    %32 = vector.extract_strided_slice %31 {offsets = [0, 0, 0, 0], sizes = [16, 1, 9, 4], strides = [1, 1, 1, 1]} : vector<16x2x9x4xf32> to vector<16x1x9x4xf32>
    %33 = vector.shape_cast %32 : vector<16x1x9x4xf32> to vector<16x9x4xf32>
    %34 = vector.extract_strided_slice %29 {offsets = [0, 0, 0], sizes = [16, 8, 4], strides = [1, 1, 1]} : vector<16x9x4xf32> to vector<16x8x4xf32>
    %35 = vector.extract_strided_slice %33 {offsets = [0, 0, 0], sizes = [16, 8, 4], strides = [1, 1, 1]} : vector<16x9x4xf32> to vector<16x8x4xf32>
    %36 = vector.extract_strided_slice %29 {offsets = [0, 1, 0], sizes = [16, 8, 4], strides = [1, 1, 1]} : vector<16x9x4xf32> to vector<16x8x4xf32>
    %37 = vector.extract_strided_slice %10 {offsets = [0, 2, 0, 0], sizes = [2, 16, 9, 4], strides = [1, 1, 1, 1]} : vector<2x18x9x4xf32> to vector<2x16x9x4xf32>
    %38 = vector.shape_cast %37 : vector<2x16x9x4xf32> to vector<16x2x9x4xf32>
    %39 = vector.extract_strided_slice %38 {offsets = [0, 0, 0, 0], sizes = [16, 1, 9, 4], strides = [1, 1, 1, 1]} : vector<16x2x9x4xf32> to vector<16x1x9x4xf32>
    %40 = vector.shape_cast %39 : vector<16x1x9x4xf32> to vector<16x9x4xf32>
    %41 = vector.extract_strided_slice %12 {offsets = [0, 2, 0, 0], sizes = [2, 16, 9, 4], strides = [1, 1, 1, 1]} : vector<2x18x9x4xf32> to vector<2x16x9x4xf32>
    %42 = vector.shape_cast %41 : vector<2x16x9x4xf32> to vector<16x2x9x4xf32>
    %43 = vector.extract_strided_slice %42 {offsets = [0, 0, 0, 0], sizes = [16, 1, 9, 4], strides = [1, 1, 1, 1]} : vector<16x2x9x4xf32> to vector<16x1x9x4xf32>
    %44 = vector.shape_cast %43 : vector<16x1x9x4xf32> to vector<16x9x4xf32>
    %45 = vector.extract_strided_slice %40 {offsets = [0, 0, 0], sizes = [16, 8, 4], strides = [1, 1, 1]} : vector<16x9x4xf32> to vector<16x8x4xf32>
    %46 = vector.extract_strided_slice %44 {offsets = [0, 0, 0], sizes = [16, 8, 4], strides = [1, 1, 1]} : vector<16x9x4xf32> to vector<16x8x4xf32>
    %47 = vector.extract_strided_slice %40 {offsets = [0, 1, 0], sizes = [16, 8, 4], strides = [1, 1, 1]} : vector<16x9x4xf32> to vector<16x8x4xf32>
    %48 = tpu.concatenate %23, %24, %25, %34, %35, %36, %45, %46, %47 in 2 : vector<16x8x4xf32>, vector<16x8x4xf32>, vector<16x8x4xf32>, vector<16x8x4xf32>, vector<16x8x4xf32>, vector<16x8x4xf32>, vector<16x8x4xf32>, vector<16x8x4xf32>, vector<16x8x4xf32> -> vector<16x8x36xf32>
    %49 = vector.shape_cast %48 : vector<16x8x36xf32> to vector<128x36xf32>
    %50 = arith.truncf %49 : vector<128x36xf32> to vector<128x36xbf16>
    %cst = arith.constant dense<0.000000e+00> : vector<128x32xf32>
    %51 = tpu.matmul %50, %13, %cst {dimension_numbers = #tpu.dot_dimension_numbers<[1], [0], [0], [1], [0, 0, 1, 1], [], []>} : vector<128x36xbf16>, vector<36x32xbf16>, vector<128x32xf32> -> vector<128x32xf32>
    %52 = vector.broadcast %14 : vector<1x32xf32> to vector<128x32xf32>
    %53 = arith.addf %51, %52 : vector<128x32xf32>
    %cst_7 = arith.constant 0.000000e+00 : f32
    %54 = vector.broadcast %cst_7 : f32 to vector<128x32xf32>
    %55 = arith.maximumf %53, %54 : vector<128x32xf32>
    %56 = vector.shape_cast %55 : vector<128x32xf32> to vector<2x8x8x32xf32>
    %57 = vector.extract_strided_slice %56 {offsets = [0, 7, 0, 0], sizes = [2, 1, 8, 32], strides = [1, 1, 1, 1]} : vector<2x8x8x32xf32> to vector<2x1x8x32xf32>
    %58 = vector.extract_strided_slice %56 {offsets = [0, 0, 0, 0], sizes = [2, 1, 8, 32], strides = [1, 1, 1, 1]} : vector<2x8x8x32xf32> to vector<2x1x8x32xf32>
    %59 = tpu.concatenate %57, %56, %58 in 1 : vector<2x1x8x32xf32>, vector<2x8x8x32xf32>, vector<2x1x8x32xf32> -> vector<2x10x8x32xf32>
    %60 = vector.shape_cast %59 : vector<2x10x8x32xf32> to vector<2x10x4x2x32xf32>
    %61 = vector.extract_strided_slice %60 {offsets = [0, 0, 0, 0, 0], sizes = [2, 10, 4, 1, 32], strides = [1, 1, 1, 1, 1]} : vector<2x10x4x2x32xf32> to vector<2x10x4x1x32xf32>
    %62 = vector.shape_cast %61 : vector<2x10x4x1x32xf32> to vector<2x10x4x32xf32>
    %63 = vector.extract_strided_slice %60 {offsets = [0, 0, 0, 1, 0], sizes = [2, 10, 4, 1, 32], strides = [1, 1, 1, 1, 1]} : vector<2x10x4x2x32xf32> to vector<2x10x4x1x32xf32>
    %64 = vector.shape_cast %63 : vector<2x10x4x1x32xf32> to vector<2x10x4x32xf32>
    %65 = vector.extract_strided_slice %59 {offsets = [0, 0, 7, 0], sizes = [2, 10, 1, 32], strides = [1, 1, 1, 1]} : vector<2x10x8x32xf32> to vector<2x10x1x32xf32>
    %66 = tpu.concatenate %65, %64 in 2 : vector<2x10x1x32xf32>, vector<2x10x4x32xf32> -> vector<2x10x5x32xf32>
    %67 = vector.extract_strided_slice %59 {offsets = [0, 0, 0, 0], sizes = [2, 10, 1, 32], strides = [1, 1, 1, 1]} : vector<2x10x8x32xf32> to vector<2x10x1x32xf32>
    %68 = tpu.concatenate %62, %67 in 2 : vector<2x10x4x32xf32>, vector<2x10x1x32xf32> -> vector<2x10x5x32xf32>
    %c0_8 = arith.constant 0 : index
    %c0_9 = arith.constant 0 : index
    %69 = vector.load %arg3[%c0_8, %c0_9] : memref<288x64xbf16, #tpu.memory_space<vmem>>, vector<288x64xbf16>
    %c0_10 = arith.constant 0 : index
    %c0_11 = arith.constant 0 : index
    %70 = vector.load %arg4[%c0_10, %c0_11] : memref<1x64xf32, #tpu.memory_space<vmem>>, vector<1x64xf32>
    %71 = vector.extract_strided_slice %66 {offsets = [0, 0, 0, 0], sizes = [2, 8, 5, 32], strides = [1, 1, 1, 1]} : vector<2x10x5x32xf32> to vector<2x8x5x32xf32>
    %72 = vector.shape_cast %71 : vector<2x8x5x32xf32> to vector<8x2x5x32xf32>
    %73 = vector.extract_strided_slice %72 {offsets = [0, 0, 0, 0], sizes = [8, 1, 5, 32], strides = [1, 1, 1, 1]} : vector<8x2x5x32xf32> to vector<8x1x5x32xf32>
    %74 = vector.shape_cast %73 : vector<8x1x5x32xf32> to vector<8x5x32xf32>
    %75 = vector.extract_strided_slice %68 {offsets = [0, 0, 0, 0], sizes = [2, 8, 5, 32], strides = [1, 1, 1, 1]} : vector<2x10x5x32xf32> to vector<2x8x5x32xf32>
    %76 = vector.shape_cast %75 : vector<2x8x5x32xf32> to vector<8x2x5x32xf32>
    %77 = vector.extract_strided_slice %76 {offsets = [0, 0, 0, 0], sizes = [8, 1, 5, 32], strides = [1, 1, 1, 1]} : vector<8x2x5x32xf32> to vector<8x1x5x32xf32>
    %78 = vector.shape_cast %77 : vector<8x1x5x32xf32> to vector<8x5x32xf32>
    %79 = vector.extract_strided_slice %74 {offsets = [0, 0, 0], sizes = [8, 4, 32], strides = [1, 1, 1]} : vector<8x5x32xf32> to vector<8x4x32xf32>
    %80 = vector.extract_strided_slice %78 {offsets = [0, 0, 0], sizes = [8, 4, 32], strides = [1, 1, 1]} : vector<8x5x32xf32> to vector<8x4x32xf32>
    %81 = vector.extract_strided_slice %74 {offsets = [0, 1, 0], sizes = [8, 4, 32], strides = [1, 1, 1]} : vector<8x5x32xf32> to vector<8x4x32xf32>
    %82 = vector.extract_strided_slice %66 {offsets = [0, 1, 0, 0], sizes = [2, 8, 5, 32], strides = [1, 1, 1, 1]} : vector<2x10x5x32xf32> to vector<2x8x5x32xf32>
    %83 = vector.shape_cast %82 : vector<2x8x5x32xf32> to vector<8x2x5x32xf32>
    %84 = vector.extract_strided_slice %83 {offsets = [0, 0, 0, 0], sizes = [8, 1, 5, 32], strides = [1, 1, 1, 1]} : vector<8x2x5x32xf32> to vector<8x1x5x32xf32>
    %85 = vector.shape_cast %84 : vector<8x1x5x32xf32> to vector<8x5x32xf32>
    %86 = vector.extract_strided_slice %68 {offsets = [0, 1, 0, 0], sizes = [2, 8, 5, 32], strides = [1, 1, 1, 1]} : vector<2x10x5x32xf32> to vector<2x8x5x32xf32>
    %87 = vector.shape_cast %86 : vector<2x8x5x32xf32> to vector<8x2x5x32xf32>
    %88 = vector.extract_strided_slice %87 {offsets = [0, 0, 0, 0], sizes = [8, 1, 5, 32], strides = [1, 1, 1, 1]} : vector<8x2x5x32xf32> to vector<8x1x5x32xf32>
    %89 = vector.shape_cast %88 : vector<8x1x5x32xf32> to vector<8x5x32xf32>
    %90 = vector.extract_strided_slice %85 {offsets = [0, 0, 0], sizes = [8, 4, 32], strides = [1, 1, 1]} : vector<8x5x32xf32> to vector<8x4x32xf32>
    %91 = vector.extract_strided_slice %89 {offsets = [0, 0, 0], sizes = [8, 4, 32], strides = [1, 1, 1]} : vector<8x5x32xf32> to vector<8x4x32xf32>
    %92 = vector.extract_strided_slice %85 {offsets = [0, 1, 0], sizes = [8, 4, 32], strides = [1, 1, 1]} : vector<8x5x32xf32> to vector<8x4x32xf32>
    %93 = vector.extract_strided_slice %66 {offsets = [0, 2, 0, 0], sizes = [2, 8, 5, 32], strides = [1, 1, 1, 1]} : vector<2x10x5x32xf32> to vector<2x8x5x32xf32>
    %94 = vector.shape_cast %93 : vector<2x8x5x32xf32> to vector<8x2x5x32xf32>
    %95 = vector.extract_strided_slice %94 {offsets = [0, 0, 0, 0], sizes = [8, 1, 5, 32], strides = [1, 1, 1, 1]} : vector<8x2x5x32xf32> to vector<8x1x5x32xf32>
    %96 = vector.shape_cast %95 : vector<8x1x5x32xf32> to vector<8x5x32xf32>
    %97 = vector.extract_strided_slice %68 {offsets = [0, 2, 0, 0], sizes = [2, 8, 5, 32], strides = [1, 1, 1, 1]} : vector<2x10x5x32xf32> to vector<2x8x5x32xf32>
    %98 = vector.shape_cast %97 : vector<2x8x5x32xf32> to vector<8x2x5x32xf32>
    %99 = vector.extract_strided_slice %98 {offsets = [0, 0, 0, 0], sizes = [8, 1, 5, 32], strides = [1, 1, 1, 1]} : vector<8x2x5x32xf32> to vector<8x1x5x32xf32>
    %100 = vector.shape_cast %99 : vector<8x1x5x32xf32> to vector<8x5x32xf32>
    %101 = vector.extract_strided_slice %96 {offsets = [0, 0, 0], sizes = [8, 4, 32], strides = [1, 1, 1]} : vector<8x5x32xf32> to vector<8x4x32xf32>
    %102 = vector.extract_strided_slice %100 {offsets = [0, 0, 0], sizes = [8, 4, 32], strides = [1, 1, 1]} : vector<8x5x32xf32> to vector<8x4x32xf32>
    %103 = vector.extract_strided_slice %96 {offsets = [0, 1, 0], sizes = [8, 4, 32], strides = [1, 1, 1]} : vector<8x5x32xf32> to vector<8x4x32xf32>
    %104 = tpu.concatenate %79, %80, %81, %90, %91, %92, %101, %102, %103 in 2 : vector<8x4x32xf32>, vector<8x4x32xf32>, vector<8x4x32xf32>, vector<8x4x32xf32>, vector<8x4x32xf32>, vector<8x4x32xf32>, vector<8x4x32xf32>, vector<8x4x32xf32>, vector<8x4x32xf32> -> vector<8x4x288xf32>
    %105 = vector.shape_cast %104 : vector<8x4x288xf32> to vector<32x288xf32>
    %106 = arith.truncf %105 : vector<32x288xf32> to vector<32x288xbf16>
    %cst_12 = arith.constant dense<0.000000e+00> : vector<32x64xf32>
    %107 = tpu.matmul %106, %69, %cst_12 {dimension_numbers = #tpu.dot_dimension_numbers<[1], [0], [0], [1], [0, 0, 1, 1], [], []>} : vector<32x288xbf16>, vector<288x64xbf16>, vector<32x64xf32> -> vector<32x64xf32>
    %108 = vector.broadcast %70 : vector<1x64xf32> to vector<32x64xf32>
    %109 = arith.addf %107, %108 : vector<32x64xf32>
    %cst_13 = arith.constant 0.000000e+00 : f32
    %110 = vector.broadcast %cst_13 : f32 to vector<32x64xf32>
    %111 = arith.maximumf %109, %110 : vector<32x64xf32>
    %112 = vector.shape_cast %111 : vector<32x64xf32> to vector<2x4x4x64xf32>
    %113 = vector.extract_strided_slice %112 {offsets = [0, 3, 0, 0], sizes = [2, 1, 4, 64], strides = [1, 1, 1, 1]} : vector<2x4x4x64xf32> to vector<2x1x4x64xf32>
    %114 = vector.extract_strided_slice %112 {offsets = [0, 0, 0, 0], sizes = [2, 1, 4, 64], strides = [1, 1, 1, 1]} : vector<2x4x4x64xf32> to vector<2x1x4x64xf32>
    %115 = tpu.concatenate %113, %112, %114 in 1 : vector<2x1x4x64xf32>, vector<2x4x4x64xf32>, vector<2x1x4x64xf32> -> vector<2x6x4x64xf32>
    %116 = vector.shape_cast %115 : vector<2x6x4x64xf32> to vector<2x6x2x2x64xf32>
    %117 = vector.extract_strided_slice %116 {offsets = [0, 0, 0, 0, 0], sizes = [2, 6, 2, 1, 64], strides = [1, 1, 1, 1, 1]} : vector<2x6x2x2x64xf32> to vector<2x6x2x1x64xf32>
    %118 = vector.shape_cast %117 : vector<2x6x2x1x64xf32> to vector<2x6x2x64xf32>
    %119 = vector.extract_strided_slice %116 {offsets = [0, 0, 0, 1, 0], sizes = [2, 6, 2, 1, 64], strides = [1, 1, 1, 1, 1]} : vector<2x6x2x2x64xf32> to vector<2x6x2x1x64xf32>
    %120 = vector.shape_cast %119 : vector<2x6x2x1x64xf32> to vector<2x6x2x64xf32>
    %121 = vector.extract_strided_slice %115 {offsets = [0, 0, 3, 0], sizes = [2, 6, 1, 64], strides = [1, 1, 1, 1]} : vector<2x6x4x64xf32> to vector<2x6x1x64xf32>
    %122 = tpu.concatenate %121, %120 in 2 : vector<2x6x1x64xf32>, vector<2x6x2x64xf32> -> vector<2x6x3x64xf32>
    %123 = vector.extract_strided_slice %115 {offsets = [0, 0, 0, 0], sizes = [2, 6, 1, 64], strides = [1, 1, 1, 1]} : vector<2x6x4x64xf32> to vector<2x6x1x64xf32>
    %124 = tpu.concatenate %118, %123 in 2 : vector<2x6x2x64xf32>, vector<2x6x1x64xf32> -> vector<2x6x3x64xf32>
    %c0_14 = arith.constant 0 : index
    %c0_15 = arith.constant 0 : index
    %125 = vector.load %arg5[%c0_14, %c0_15] : memref<576x128xbf16, #tpu.memory_space<vmem>>, vector<576x128xbf16>
    %c0_16 = arith.constant 0 : index
    %c0_17 = arith.constant 0 : index
    %126 = vector.load %arg6[%c0_16, %c0_17] : memref<1x128xf32, #tpu.memory_space<vmem>>, vector<1x128xf32>
    %127 = vector.extract_strided_slice %122 {offsets = [0, 0, 0, 0], sizes = [2, 4, 3, 64], strides = [1, 1, 1, 1]} : vector<2x6x3x64xf32> to vector<2x4x3x64xf32>
    %128 = vector.shape_cast %127 : vector<2x4x3x64xf32> to vector<4x2x3x64xf32>
    %129 = vector.extract_strided_slice %128 {offsets = [0, 0, 0, 0], sizes = [4, 1, 3, 64], strides = [1, 1, 1, 1]} : vector<4x2x3x64xf32> to vector<4x1x3x64xf32>
    %130 = vector.shape_cast %129 : vector<4x1x3x64xf32> to vector<4x3x64xf32>
    %131 = vector.extract_strided_slice %124 {offsets = [0, 0, 0, 0], sizes = [2, 4, 3, 64], strides = [1, 1, 1, 1]} : vector<2x6x3x64xf32> to vector<2x4x3x64xf32>
    %132 = vector.shape_cast %131 : vector<2x4x3x64xf32> to vector<4x2x3x64xf32>
    %133 = vector.extract_strided_slice %132 {offsets = [0, 0, 0, 0], sizes = [4, 1, 3, 64], strides = [1, 1, 1, 1]} : vector<4x2x3x64xf32> to vector<4x1x3x64xf32>
    %134 = vector.shape_cast %133 : vector<4x1x3x64xf32> to vector<4x3x64xf32>
    %135 = vector.extract_strided_slice %130 {offsets = [0, 0, 0], sizes = [4, 2, 64], strides = [1, 1, 1]} : vector<4x3x64xf32> to vector<4x2x64xf32>
    %136 = vector.extract_strided_slice %134 {offsets = [0, 0, 0], sizes = [4, 2, 64], strides = [1, 1, 1]} : vector<4x3x64xf32> to vector<4x2x64xf32>
    %137 = vector.extract_strided_slice %130 {offsets = [0, 1, 0], sizes = [4, 2, 64], strides = [1, 1, 1]} : vector<4x3x64xf32> to vector<4x2x64xf32>
    %138 = vector.extract_strided_slice %122 {offsets = [0, 1, 0, 0], sizes = [2, 4, 3, 64], strides = [1, 1, 1, 1]} : vector<2x6x3x64xf32> to vector<2x4x3x64xf32>
    %139 = vector.shape_cast %138 : vector<2x4x3x64xf32> to vector<4x2x3x64xf32>
    %140 = vector.extract_strided_slice %139 {offsets = [0, 0, 0, 0], sizes = [4, 1, 3, 64], strides = [1, 1, 1, 1]} : vector<4x2x3x64xf32> to vector<4x1x3x64xf32>
    %141 = vector.shape_cast %140 : vector<4x1x3x64xf32> to vector<4x3x64xf32>
    %142 = vector.extract_strided_slice %124 {offsets = [0, 1, 0, 0], sizes = [2, 4, 3, 64], strides = [1, 1, 1, 1]} : vector<2x6x3x64xf32> to vector<2x4x3x64xf32>
    %143 = vector.shape_cast %142 : vector<2x4x3x64xf32> to vector<4x2x3x64xf32>
    %144 = vector.extract_strided_slice %143 {offsets = [0, 0, 0, 0], sizes = [4, 1, 3, 64], strides = [1, 1, 1, 1]} : vector<4x2x3x64xf32> to vector<4x1x3x64xf32>
    %145 = vector.shape_cast %144 : vector<4x1x3x64xf32> to vector<4x3x64xf32>
    %146 = vector.extract_strided_slice %141 {offsets = [0, 0, 0], sizes = [4, 2, 64], strides = [1, 1, 1]} : vector<4x3x64xf32> to vector<4x2x64xf32>
    %147 = vector.extract_strided_slice %145 {offsets = [0, 0, 0], sizes = [4, 2, 64], strides = [1, 1, 1]} : vector<4x3x64xf32> to vector<4x2x64xf32>
    %148 = vector.extract_strided_slice %141 {offsets = [0, 1, 0], sizes = [4, 2, 64], strides = [1, 1, 1]} : vector<4x3x64xf32> to vector<4x2x64xf32>
    %149 = vector.extract_strided_slice %122 {offsets = [0, 2, 0, 0], sizes = [2, 4, 3, 64], strides = [1, 1, 1, 1]} : vector<2x6x3x64xf32> to vector<2x4x3x64xf32>
    %150 = vector.shape_cast %149 : vector<2x4x3x64xf32> to vector<4x2x3x64xf32>
    %151 = vector.extract_strided_slice %150 {offsets = [0, 0, 0, 0], sizes = [4, 1, 3, 64], strides = [1, 1, 1, 1]} : vector<4x2x3x64xf32> to vector<4x1x3x64xf32>
    %152 = vector.shape_cast %151 : vector<4x1x3x64xf32> to vector<4x3x64xf32>
    %153 = vector.extract_strided_slice %124 {offsets = [0, 2, 0, 0], sizes = [2, 4, 3, 64], strides = [1, 1, 1, 1]} : vector<2x6x3x64xf32> to vector<2x4x3x64xf32>
    %154 = vector.shape_cast %153 : vector<2x4x3x64xf32> to vector<4x2x3x64xf32>
    %155 = vector.extract_strided_slice %154 {offsets = [0, 0, 0, 0], sizes = [4, 1, 3, 64], strides = [1, 1, 1, 1]} : vector<4x2x3x64xf32> to vector<4x1x3x64xf32>
    %156 = vector.shape_cast %155 : vector<4x1x3x64xf32> to vector<4x3x64xf32>
    %157 = vector.extract_strided_slice %152 {offsets = [0, 0, 0], sizes = [4, 2, 64], strides = [1, 1, 1]} : vector<4x3x64xf32> to vector<4x2x64xf32>
    %158 = vector.extract_strided_slice %156 {offsets = [0, 0, 0], sizes = [4, 2, 64], strides = [1, 1, 1]} : vector<4x3x64xf32> to vector<4x2x64xf32>
    %159 = vector.extract_strided_slice %152 {offsets = [0, 1, 0], sizes = [4, 2, 64], strides = [1, 1, 1]} : vector<4x3x64xf32> to vector<4x2x64xf32>
    %160 = tpu.concatenate %135, %136, %137, %146, %147, %148, %157, %158, %159 in 2 : vector<4x2x64xf32>, vector<4x2x64xf32>, vector<4x2x64xf32>, vector<4x2x64xf32>, vector<4x2x64xf32>, vector<4x2x64xf32>, vector<4x2x64xf32>, vector<4x2x64xf32>, vector<4x2x64xf32> -> vector<4x2x576xf32>
    %161 = vector.shape_cast %160 : vector<4x2x576xf32> to vector<8x576xf32>
    %162 = arith.truncf %161 : vector<8x576xf32> to vector<8x576xbf16>
    %cst_18 = arith.constant dense<0.000000e+00> : vector<8x128xf32>
    %163 = tpu.matmul %162, %125, %cst_18 {dimension_numbers = #tpu.dot_dimension_numbers<[1], [0], [0], [1], [0, 0, 1, 1], [], []>} : vector<8x576xbf16>, vector<576x128xbf16>, vector<8x128xf32> -> vector<8x128xf32>
    %164 = vector.broadcast %126 : vector<1x128xf32> to vector<8x128xf32>
    %165 = arith.addf %163, %164 : vector<8x128xf32>
    %cst_19 = arith.constant 0.000000e+00 : f32
    %166 = vector.broadcast %cst_19 : f32 to vector<8x128xf32>
    %167 = arith.maximumf %165, %166 : vector<8x128xf32>
    %168 = vector.shape_cast %167 : vector<8x128xf32> to vector<2x2x2x128xf32>
    %169 = vector.extract_strided_slice %168 {offsets = [0, 0, 0, 0], sizes = [2, 1, 1, 128], strides = [1, 1, 1, 1]} : vector<2x2x2x128xf32> to vector<2x1x1x128xf32>
    %170 = vector.shape_cast %169 : vector<2x1x1x128xf32> to vector<2x128xf32>
    %171 = vector.extract_strided_slice %168 {offsets = [0, 0, 1, 0], sizes = [2, 1, 1, 128], strides = [1, 1, 1, 1]} : vector<2x2x2x128xf32> to vector<2x1x1x128xf32>
    %172 = vector.shape_cast %171 : vector<2x1x1x128xf32> to vector<2x128xf32>
    %173 = vector.extract_strided_slice %168 {offsets = [0, 1, 0, 0], sizes = [2, 1, 1, 128], strides = [1, 1, 1, 1]} : vector<2x2x2x128xf32> to vector<2x1x1x128xf32>
    %174 = vector.shape_cast %173 : vector<2x1x1x128xf32> to vector<2x128xf32>
    %175 = vector.extract_strided_slice %168 {offsets = [0, 1, 1, 0], sizes = [2, 1, 1, 128], strides = [1, 1, 1, 1]} : vector<2x2x2x128xf32> to vector<2x1x1x128xf32>
    %176 = vector.shape_cast %175 : vector<2x1x1x128xf32> to vector<2x128xf32>
    %177 = tpu.concatenate %170, %172, %174, %176 in 1 : vector<2x128xf32>, vector<2x128xf32>, vector<2x128xf32>, vector<2x128xf32> -> vector<2x512xf32>
    %c0_20 = arith.constant 0 : index
    %c0_21 = arith.constant 0 : index
    %178 = vector.load %arg7[%c0_20, %c0_21] : memref<512x16xbf16, #tpu.memory_space<vmem>>, vector<512x16xbf16>
    %179 = arith.truncf %177 : vector<2x512xf32> to vector<2x512xbf16>
    %cst_22 = arith.constant dense<0.000000e+00> : vector<2x16xf32>
    %180 = tpu.matmul %179, %178, %cst_22 {dimension_numbers = #tpu.dot_dimension_numbers<[1], [0], [0], [1], [0, 0, 1, 1], [], []>} : vector<2x512xbf16>, vector<512x16xbf16>, vector<2x16xf32> -> vector<2x16xf32>
    %c0_23 = arith.constant 0 : index
    %c0_24 = arith.constant 0 : index
    %181 = vector.load %arg8[%c0_23, %c0_24] : memref<1x16xf32, #tpu.memory_space<vmem>>, vector<1x16xf32>
    %182 = vector.broadcast %181 : vector<1x16xf32> to vector<2x16xf32>
    %183 = arith.addf %180, %182 : vector<2x16xf32>
    %cst_25 = arith.constant 0.000000e+00 : f32
    %184 = vector.broadcast %cst_25 : f32 to vector<2x16xf32>
    %185 = arith.maximumf %183, %184 : vector<2x16xf32>
    %c0_26 = arith.constant 0 : index
    %c0_27 = arith.constant 0 : index
    %186 = vector.load %arg9[%c0_26, %c0_27] : memref<16x16xf32, #tpu.memory_space<vmem>>, vector<16x16xf32>
    %cst_28 = arith.constant dense<0.000000e+00> : vector<2x16xf32>
    %187 = tpu.matmul %185, %186, %cst_28 {dimension_numbers = #tpu.dot_dimension_numbers<[1], [0], [0], [1], [0, 0, 1, 1], [], []>} : vector<2x16xf32>, vector<16x16xf32>, vector<2x16xf32> -> vector<2x16xf32>
    %c0_29 = arith.constant 0 : index
    %c0_30 = arith.constant 0 : index
    %188 = vector.load %arg10[%c0_29, %c0_30] : memref<1x16xf32, #tpu.memory_space<vmem>>, vector<1x16xf32>
    %189 = vector.broadcast %188 : vector<1x16xf32> to vector<2x16xf32>
    %190 = arith.addf %187, %189 : vector<2x16xf32>
    %191 = vector.extract_strided_slice %190 {offsets = [0, 0], sizes = [2, 8], strides = [1, 1]} : vector<2x16xf32> to vector<2x8xf32>
    %192 = vector.extract_strided_slice %190 {offsets = [0, 8], sizes = [2, 8], strides = [1, 1]} : vector<2x16xf32> to vector<2x8xf32>
    %cst_31 = arith.constant 5.000000e-01 : f32
    %193 = vector.broadcast %cst_31 : f32 to vector<2x8xf32>
    %194 = arith.mulf %193, %192 : vector<2x8xf32>
    %195 = math.exp %194 : vector<2x8xf32>
    %c0_32 = arith.constant 0 : index
    %c0_33 = arith.constant 0 : index
    %196 = vector.load %arg11[%c0_32, %c0_33] : memref<2x8xf32, #tpu.memory_space<vmem>>, vector<2x8xf32>
    %197 = arith.mulf %195, %196 : vector<2x8xf32>
    %198 = arith.addf %191, %197 : vector<2x8xf32>
    %199 = tpu.concatenate %191, %192, %198 in 1 : vector<2x8xf32>, vector<2x8xf32>, vector<2x8xf32> -> vector<2x24xf32>
    %c0_34 = arith.constant 0 : index
    %c0_35 = arith.constant 0 : index
    %200 = vector.load %arg12[%c0_34, %c0_35] : memref<2x24xf32, #tpu.memory_space<vmem>>, vector<2x24xf32>
    tpu.vector_store %arg12[%c0_34, %c0_35], %199 {strides = array<i32>} : memref<2x24xf32, #tpu.memory_space<vmem>>, vector<2x24xf32>,
    return
  }
}

</mosaic_0001>

<bundles_post_ra>
// kernel: variational_encoder_ising_forward.1
= control target key start
LH: loop header
LB: loop body
LE: loop exit
PB: predicated region body
PF: predicated region fallthrough
CT: control target
= control target key end

     0   :  { %vm682_vm0 = vcmask 1042434   ;;  %vm1201_vm1 = vcmask 1041409   ;;  %vm684_vm2 = vcmask 1043459   ;;  %vm8089_vm3 = vcmask 1044484   ;;  %s4972_s27 = smov 4   ;;  %s4973_s28 = smov 28   ;;  %s8014_s0 = inlined_call_operand.vmem [shape: f32[2,16,16,4], index: 0, kind: input, shape index: {}]   ;;  %s8015_s1 = inlined_call_operand.vmem [shape: bf16[36,32], index: 1, kind: input, shape index: {}]   ;;  %s8016_s2 = inlined_call_operand.vmem [shape: f32[1,32], index: 2, kind: input, shape index: {}]   ;;  %s8017_s3 = inlined_call_operand.vmem [shape: bf16[288,64], index: 3, kind: input, shape index: {}]   ;;  %s8018_s4 = inlined_call_operand.vmem [shape: f32[1,64], index: 4, kind: input, shape index: {}]   ;;  %s8019_s5 = inlined_call_operand.vmem [shape: bf16[576,128], index: 5, kind: input, shape index: {}]   ;;  %s8020_s7 = inlined_call_operand.vmem [shape: bf16[512,16], index: 7, kind: input, shape index: {}]   ;;  %s8021_s6 = inlined_call_operand.vmem [shape: f32[1,128], index: 6, kind: input, shape index: {}]   ;;  %s8022_s8 = inlined_call_operand.vmem [shape: f32[1,16], index: 8, kind: input, shape index: {}]   ;;  %s8023_s10 = inlined_call_operand.vmem [shape: f32[1,16], index: 10, kind: input, shape index: {}]   ;;  %s8024_s9 = inlined_call_operand.vmem [shape: f32[16,16], index: 9, kind: input, shape index: {}]   ;;  %s8025_s11 = inlined_call_operand.vmem [shape: f32[2,8], index: 11, kind: input, shape index: {}]   ;;  %s8026_s12 = inlined_call_operand.vmem [shape: f32[2,24], index: 12, kind: output, shape index: {}]  }
   0x1   :  { %v5051_v0 = vld [vmem:[%s8014_s0 + $0xd0] sm:$0xff]  ;;  %v5056_v1 = vld [vmem:[%s8014_s0 + $0xd8] sm:$0xff]  ;;  %vm688_vm4 = vcmask 1045509   ;;  %vm690_vm5 = vcmask 1046534   ;;  %vm8088_vm6 = vcmask 1047559   ;;  %vm8085_vm7 = vcmask 1040384  }
   0x2   :  { %v5061_v2 = vld [vmem:[%s8014_s0 + $0xf0] sm:$0xff]  ;;  %v5066_v3 = vld [vmem:[%s8014_s0 + $0xf8] sm:$0xff]  ;;  %v254_v7 = vrot.slane %v5051_v0, 2  ;;  %v255_v11 = vrot.slane %v5051_v0, 4  ;;  %v256_v12 = vrot.slane %v5051_v0, 6  ;;  %v257_v13 = vrot.slane %v5056_v1, 2 }
   0x3   :  { %v170_v4 = vrot.slane %v5061_v2, 2  ;;  %v171_v5 = vrot.slane %v5061_v2, 4  ;;  %v172_v6 = vrot.slane %v5061_v2, 6  ;;  %v173_v8 = vrot.slane %v5066_v3, 2  ;;  %v5103_v32 = vld [vmem:[%s8014_s0 + $0x10] sm:$0xff]  ;;  %v5114_v41 = vld [vmem:[%s8014_s0 + $0x18] sm:$0xff] }
   0x4   :  { %v174_v9 = vrot.slane %v5066_v3, 4  ;;  %v8030_v10 = vrot.slane %v5066_v3, 6  ;;  %v258_v14 = vrot.slane %v5056_v1, 4  ;;  %v8027_v15 = vrot.slane %v5056_v1, 6  ;;  %v5123_v45 = vld [vmem:[%s8014_s0 + $0x30] sm:$0xff]  ;;  %v5135_v53 = vld [vmem:[%s8014_s0 + $0x38] sm:$0xff] }
   0x5   :  { %v5080_v16 = vperm.slane %v170_v4, 1  ;;  %v5082_v17 = vperm.slane %v171_v5, 1  ;;  %v5084_v18 = vperm.slane %v172_v6, 1  ;;  %v5086_v19 = vperm.slane %v173_v8, 1  ;;  %s4974_s29 = smov 12   ;;  %s4975_s14 = smov 16  }
   0x6   :  { %v5088_v20 = vperm.slane %v174_v9, 1  ;;  %v5090_v21 = vperm.slane %v255_v11, 1  ;;  %v5092_v22 = vperm.slane %v256_v12, 1  ;;  %v5094_v23 = vperm.slane %v257_v13, 1  ;;  %s4976_s21 = smov 8   ;;  %s4977_s26 = smov 32  }
   0x7   :  { %v5096_v24 = vperm.slane %v258_v14, 1  ;;  %v945_v25 = vperm.slane %v5061_v2, 0  ;;  %v946_v26 = vperm.slane %v170_v4, 0  ;;  %v947_v27 = vperm.slane %v171_v5, 0  ;;  %s4978_s17 = smov 24   ;;  %s4979_s20 = smov 20  }
   0x8   :  { %8090 = vst [vmem:[#allocation2_spill] sm:$0xff] %v5090_v21  ;;  %v948_v28 = vperm.slane %v172_v6, 0  ;;  %v949_v29 = vperm.slane %v5066_v3, 0  ;;  %v950_v30 = vperm.slane %v173_v8, 0  ;;  %v951_v31 = vperm.slane %v174_v9, 0 }
   0x9   :  { %8091 = vst [vmem:[#allocation3_spill] sm:$0xff] %v5092_v22  ;;  %v952_v33 = vperm.slane %v8030_v10, 0  ;;  %v1057_v34 = vperm.slane %v5051_v0, 0  ;;  %v1058_v35 = vperm.slane %v254_v7, 0  ;;  %v1059_v36 = vperm.slane %v255_v11, 0  ;;  %v5190_v0 = vld [vmem:[%s8014_s0] sm:$0xff] }
   0xa   :  { %8092 = vst [vmem:[#allocation4_spill] sm:$0xff] %v5094_v23  ;;  %v1060_v37 = vperm.slane %v256_v12, 0  ;;  %v1061_v38 = vperm.slane %v5056_v1, 0  ;;  %v1062_v39 = vperm.slane %v257_v13, 0  ;;  %v1063_v40 = vperm.slane %v258_v14, 0 }
   0xb   :  { %8093 = vst [vmem:[#allocation5_spill] sm:$0xff] %v5096_v24  ;;  %v1064_v42 = vperm.slane %v8027_v15, 0  ;;  %v1202_v43 = vsel %vm1201_vm1, %v946_v26, %v945_v25  ;;  %v1300_v44 = vsel %vm1201_vm1, %v1058_v35, %v1057_v34  ;;  %v182_v46 = vrot.slane %v5103_v32, 2 }
   0xc   :  { %v1203_v47 = vsel %vm682_vm0, %v947_v27, %v1202_v43  ;;  %v1301_v48 = vsel %vm682_vm0, %v1059_v36, %v1300_v44  ;;  %v183_v49 = vrot.slane %v5103_v32, 4  ;;  %v184_v50 = vrot.slane %v5103_v32, 6 }
   0xd   :  { %v1204_v51 = vsel %vm684_vm2, %v948_v28, %v1203_v47  ;;  %v1302_v52 = vsel %vm684_vm2, %v1060_v37, %v1301_v48  ;;  %v185_v54 = vrot.slane %v5114_v41, 2  ;;  %v186_v55 = vrot.slane %v5114_v41, 4 }
   0xe   :  { %v1205_v56 = vsel %vm8089_vm3, %v949_v29, %v1204_v51  ;;  %v1303_v57 = vsel %vm8089_vm3, %v1061_v38, %v1302_v52  ;;  %v8029_v58 = vrot.slane %v5114_v41, 6  ;;  %v194_v59 = vrot.slane %v5123_v45, 2 }
   0xf   :  { %v1206_v60 = vsel %vm688_vm4, %v950_v30, %v1205_v56  ;;  %v1304_v61 = vsel %vm688_vm4, %v1062_v39, %v1303_v57  ;;  %v195_v62 = vrot.slane %v5123_v45, 4  ;;  %v196_v63 = vrot.slane %v5123_v45, 6  ;;  %v5200_v56 = vld [vmem:[%s8014_s0 + $0x8] sm:$0xff] }
  0x10   :  { %v1207_v4 = vsel %vm690_vm5, %v951_v31, %v1206_v60  ;;  %v1305_v5 = vsel %vm690_vm5, %v1063_v40, %v1304_v61  ;;  %v197_v6 = vrot.slane %v5135_v53, 2  ;;  %v198_v8 = vrot.slane %v5135_v53, 4  ;;  %v5209_v61 = vld [vmem:[%s8014_s0 + $0x20] sm:$0xff] }
  0x11   :  { %v5152_v9 = vsel %vm8088_vm6, %v952_v33, %v1207_v4  ;;  %v5155_v11 = vsel %vm8088_vm6, %v1064_v42, %v1305_v5  ;;  %v8028_v12 = vrot.slane %v5135_v53, 6  ;;  %v5158_v13 = vperm.slane %v183_v49, 1  ;;  %v5217_v5 = vld [vmem:[%s8014_s0 + $0x28] sm:$0xff] }
  0x12   :  { %8094 = vst [vmem:[#allocation6_spill] sm:$0xff] %v5152_v9  ;;  %v5162_v25 = vperm.slane %v184_v50, 1  ;;  %v5164_v26 = vperm.slane %v185_v54, 1  ;;  %v5166_v27 = vperm.slane %v186_v55, 1  ;;  %v5168_v28 = vperm.slane %v194_v59, 1 }
  0x13   :  { %8095 = vst [vmem:[#allocation7_spill] sm:$0xff] %v5155_v11  ;;  %v5170_v29 = vperm.slane %v195_v62, 1  ;;  %v5172_v30 = vperm.slane %v196_v63, 1  ;;  %v5174_v31 = vperm.slane %v197_v6, 1  ;;  %v5176_v33 = vperm.slane %v198_v8, 1 }
  0x14   :  { %v5180_v34 = vperm.slane %v254_v7, 1  ;;  %v961_v35 = vperm.slane %v5103_v32, 0  ;;  %v962_v36 = vperm.slane %v182_v46, 0  ;;  %v963_v37 = vperm.slane %v183_v49, 0 }
  0x15   :  { %v964_v38 = vperm.slane %v184_v50, 0  ;;  %v965_v39 = vperm.slane %v5114_v41, 0  ;;  %v966_v40 = vperm.slane %v185_v54, 0  ;;  %v967_v42 = vperm.slane %v186_v55, 0 }
  0x16   :  { %8096 = vst [vmem:[#allocation8_spill] sm:$0xff] %v5180_v34  ;;  %v968_v43 = vperm.slane %v8029_v58, 0  ;;  %v977_v44 = vperm.slane %v5123_v45, 0  ;;  %v978_v47 = vperm.slane %v194_v59, 0  ;;  %v979_v7 = vperm.slane %v195_v62, 0 }
  0x17   :  { %v980_v48 = vperm.slane %v196_v63, 0  ;;  %v981_v49 = vperm.slane %v5135_v53, 0  ;;  %v982_v50 = vperm.slane %v197_v6, 0  ;;  %v983_v51 = vperm.slane %v198_v8, 0 }
  0x18   :  { %v984_v52 = vperm.slane %v8028_v12, 0  ;;  %v1216_v54 = vsel %vm1201_vm1, %v962_v36, %v961_v35  ;;  %v1230_v55 = vsel %vm1201_vm1, %v978_v47, %v977_v44  ;;  %v5204_v60 = vperm.slane %v182_v46, 1 }
  0x19   :  { %v1217_v57 = vsel %vm682_vm0, %v963_v37, %v1216_v54  ;;  %v1231_v59 = vsel %vm682_vm0, %v979_v7, %v1230_v55  ;;  %v176_v62 = vrot.slane %v5190_v0, 2  ;;  %v177_v6 = vrot.slane %v5190_v0, 4 }
  0x1a   :  { %v1218_v63 = vsel %vm684_vm2, %v964_v38, %v1217_v57  ;;  %v1232_v4 = vsel %vm684_vm2, %v980_v48, %v1231_v59  ;;  %v178_v46 = vrot.slane %v5190_v0, 6  ;;  %v179_v36 = vrot.slane %v5200_v56, 2 }
  0x1b   :  { %v1219_v8 = vsel %vm8089_vm3, %v965_v39, %v1218_v63  ;;  %v1233_v35 = vsel %vm8089_vm3, %v981_v49, %v1232_v4  ;;  %v180_v37 = vrot.slane %v5200_v56, 4  ;;  %v188_v47 = vrot.slane %v5209_v61, 2 }
  0x1c   :  { %v1220_v38 = vsel %vm688_vm4, %v966_v40, %v1219_v8  ;;  %v1234_v44 = vsel %vm688_vm4, %v982_v50, %v1233_v35  ;;  %v189_v7 = vrot.slane %v5209_v61, 4  ;;  %v190_v39 = vrot.slane %v5209_v61, 6 }
  0x1d   :  { %v1221_v48 = vsel %vm690_vm5, %v967_v42, %v1220_v38  ;;  %v1235_v54 = vsel %vm690_vm5, %v983_v51, %v1234_v44  ;;  %v191_v49 = vrot.slane %v5217_v5, 2  ;;  %v192_v40 = vrot.slane %v5217_v5, 4 }
  0x1e   :  { %v1222_v55 = vsel %vm8088_vm6, %v968_v43, %v1221_v48  ;;  %v5235_v57 = vsel %vm8088_vm6, %v984_v52, %v1235_v54  ;;  %v363_v50 = vrot.slane %v5200_v56, 7  ;;  %v365_v42 = vrot.slane %v5217_v5, 7 }
  0x1f   :  { %v4663_v59 = vpack.i.bf16 %v5235_v57, %v1222_v55  ;;  %v4643_v63 = vpack.i.bf16 %v1222_v55, %v5152_v9  ;;  %v434_v51 = vperm.slane %v5190_v0, 1  ;;  %v435_v4 = vperm.slane %v176_v62, 1 }
  0x20   :  { %v436_v8 = vperm.slane %v177_v6, 1  ;;  %v437_v35 = vperm.slane %v178_v46, 1  ;;  %v438_v43 = vperm.slane %v5200_v56, 1  ;;  %v439_v52 = vperm.slane %v179_v36, 1 }
  0x21   :  { %4644 = vrot.lane.b32.xlu0 %v4643_v63, %s4972_s27  ;;  %v440_v38 = vperm.slane %v180_v37, 1  ;;  %v450_v44 = vperm.slane %v5209_v61, 1  ;;  %v451_v48 = vperm.slane %v188_v47, 1  ;;  %v452_v54 = vperm.slane %v189_v7, 1 }
  0x22   :  { %v453_v14 = vperm.slane %v190_v39, 1  ;;  %v454_v55 = vperm.slane %v5217_v5, 1  ;;  %v455_v15 = vperm.slane %v191_v49, 1  ;;  %v456_v12 = vperm.slane %v192_v40, 1 }
  0x23   :  { %v694_v58 = vsel %vm682_vm0, %v435_v4, %v434_v51  ;;  %v706_v10 = vsel %vm682_vm0, %v451_v48, %v450_v44  ;;  %v181_v24 = vrot.slane %v5200_v56, 6  ;;  %v193_v23 = vrot.slane %v5217_v5, 6 }
  0x24   :  { %v695_v9 = vsel %vm684_vm2, %v436_v8, %v694_v58  ;;  %v707_v63 = vsel %vm684_vm2, %v452_v54, %v706_v10  ;;  %v953_v11 = vperm.slane %v5190_v0, 0  ;;  %v954_v34 = vperm.slane %v176_v62, 0 }
  0x25   :  { %v696_v22 = vsel %vm8089_vm3, %v437_v35, %v695_v9  ;;  %v708_v21 = vsel %vm8089_vm3, %v453_v14, %v707_v63  ;;  %v955_v44 = vperm.slane %v177_v6, 0  ;;  %v956_v48 = vperm.slane %v178_v46, 0 }
  0x26   :  { %v697_v51 = vsel %vm688_vm4, %v438_v43, %v696_v22  ;;  %v709_v4 = vsel %vm688_vm4, %v454_v55, %v708_v21  ;;  %v957_v8 = vperm.slane %v5200_v56, 0  ;;  %v958_v54 = vperm.slane %v179_v36, 0 }
  0x27   :  { %v698_v58 = vsel %vm690_vm5, %v439_v52, %v697_v51  ;;  %v710_v10 = vsel %vm690_vm5, %v455_v15, %v709_v4  ;;  %v959_v35 = vperm.slane %v180_v37, 0  ;;  %v960_v0 = vperm.slane %v181_v24, 0 }
  0x28   :  { %v699_v9 = vsel %vm8088_vm6, %v440_v38, %v698_v58  ;;  %v711_v14 = vsel %vm8088_vm6, %v456_v12, %v710_v10  ;;  %v969_v15 = vperm.slane %v5209_v61, 0  ;;  %v970_v62 = vperm.slane %v188_v47, 0 }
  0x29   :  { %v5266_v22 = vsel %vm8085_vm7, %v363_v50, %v699_v9  ;;  %v5269_v21 = vsel %vm8085_vm7, %v365_v42, %v711_v14  ;;  %4664 = vrot.lane.b32.xlu0 %v4663_v59, %s4973_s28  ;;  %v971_v36 = vperm.slane %v189_v7, 0  ;;  %v972_v37 = vperm.slane %v190_v39, 0 }
  0x2a   :  { %v1708_v6 = vrot.slane %v5269_v21, 1  ;;  %v4648_v12 = vpack.i.bf16 %v5269_v21, %v5266_v22  ;;  %v1705_v46 = vrot.slane %v5266_v22, 1  ;;  %v973_v50 = vperm.slane %v5217_v5, 0 }
  0x2b   :  { %v974_v43 = vperm.slane %v191_v49, 0  ;;  %v975_v42 = vperm.slane %v192_v40, 0  ;;  %v976_v61 = vperm.slane %v193_v23, 0  ;;  %v1209_v47 = vsel %vm1201_vm1, %v954_v34, %v953_v11 }
  0x2c   :  { %4649 = vrot.lane.b32.xlu1 %v4648_v12, %s4974_s29  ;;  %v1223_v59 = vsel %vm1201_vm1, %v970_v62, %v969_v15  ;;  %v362_v52 = vrot.slane %v5066_v3, 7  ;;  %v1210_v38 = vsel %vm682_vm0, %v955_v44, %v1209_v47  ;;  %v364_v39 = vrot.slane %v5114_v41, 7 }
  0x2d   :  { %v1224_v7 = vsel %vm682_vm0, %v971_v36, %v1223_v59  ;;  %v426_v49 = vperm.slane %v5061_v2, 1  ;;  %v1211_v40 = vsel %vm684_vm2, %v956_v48, %v1210_v38  ;;  %v430_v63 = vperm.slane %v5066_v3, 1 }
  0x2e   :  { %v1225_v55 = vsel %vm684_vm2, %v972_v37, %v1224_v7  ;;  %v8097_v11 = vrot.slane %v5066_v3, 6  ;;  %v1212_v51 = vsel %vm8089_vm3, %v957_v8, %v1211_v40  ;;  %v442_v44 = vperm.slane %v5103_v32, 1 }
  0x2f   :  { %v1226_v4 = vsel %vm8089_vm3, %v973_v50, %v1225_v55  ;;  %v446_v58 = vperm.slane %v5114_v41, 1  ;;  %v1213_v10 = vsel %vm688_vm4, %v958_v54, %v1212_v51  ;;  %v8098_v48 = vrot.slane %v5114_v41, 6 }
  0x30   :  { %v433_v34 = vperm.slane %v8097_v11, 1  ;;  %v1227_v2 = vsel %vm688_vm4, %v974_v43, %v1226_v4  ;;  %v683_v14 = vsel %vm682_vm0, %v5080_v16, %v426_v49  ;;  %v1214_v3 = vsel %vm690_vm5, %v959_v35, %v1213_v10 }
  0x31   :  { %v449_v9 = vperm.slane %v8098_v48, 1  ;;  %v1228_v8 = vsel %vm690_vm5, %v975_v42, %v1227_v2  ;;  %v685_v15 = vsel %vm684_vm2, %v5082_v17, %v683_v14  ;;  %v700_v32 = vsel %vm682_vm0, %v5204_v60, %v442_v44 }
  0x32   :  { %v1215_v54 = vsel %vm8088_vm6, %v960_v0, %v1214_v3  ;;  %v1229_v62 = vsel %vm8088_vm6, %v976_v61, %v1228_v8  ;;  %v687_v41 = vsel %vm8089_vm3, %v5084_v18, %v685_v15  ;;  %v701_v16 = vsel %vm684_vm2, %v5158_v13, %v700_v32  ;;  %v5324_v18 = vld [vmem:[%s8014_s0 + $0x50] sm:$0xff] }
  0x33   :  { %v4653_v12 = vpack.i.bf16 %v1229_v62, %v1215_v54  ;;  %v689_v35 = vsel %vm688_vm4, %v430_v63, %v687_v41  ;;  %v702_v36 = vsel %vm8089_vm3, %v5162_v25, %v701_v16  ;;  %vm1496_vm8 = vcmask 1046528   ;;  %v5407_v62 = vld [vmem:[%s8014_s0 + $0x60] sm:$0xff] }
  0x34   :  { %v691_v17 = vsel %vm690_vm5, %v5086_v19, %v689_v35  ;;  %v703_v60 = vsel %vm688_vm4, %v446_v58, %v702_v36  ;;  %v1498_v0 = vrot.slane %v433_v34, 1  ;;  %v1501_v37 = vrot.slane %v449_v9, 1  ;;  %v5376_v58 = vld [vmem:[%s8014_s0 + $0x40] sm:$0xff]  ;;  %v5389_v9 = vld [vmem:[%s8014_s0 + $0x48] sm:$0xff] }
  0x35   :  { %4654 = vrot.lane.b32.xlu1 %v4653_v12, %s4975_s14  ;;  %v693_v13 = vsel %vm8088_vm6, %v5088_v20, %v691_v17  ;;  %v704_v25 = vsel %vm690_vm5, %v5164_v26, %v703_v60  ;;  %v366_v19 = vrot.slane %v5135_v53, 7  ;;  %v458_v50 = vperm.slane %v5123_v45, 1  ;;  %v5344_v20 = vld [vmem:[%s8014_s0 + $0x58] sm:$0xff]  ;;  %v5414_v12 = vld [vmem:[%s8014_s0 + $0x68] sm:$0xff] }
  0x36   :  { %v705_v43 = vsel %vm8088_vm6, %v5166_v27, %v704_v25  ;;  %v5336_v42 = vsel %vm8085_vm7, %v362_v52, %v693_v13  ;;  %v462_v61 = vperm.slane %v5135_v53, 1  ;;  %v8099_v47 = vrot.slane %v5135_v53, 6 }
  0x37   :  { %v5347_v26 = vsel %vm8085_vm7, %v364_v39, %v705_v43  ;;  %v1497_v45 = vrot.slane %v5336_v42, 1  ;;  %v712_v27 = vsel %vm682_vm0, %v5168_v28, %v458_v50  ;;  %v206_v52 = vrot.slane %v5324_v18, 2 }
  0x38   :  { %v465_v59 = vperm.slane %v8099_v47, 1  ;;  %v1500_v38 = vrot.slane %v5347_v26, 1  ;;  %v713_v53 = vsel %vm684_vm2, %v5170_v29, %v712_v27  ;;  %v207_v49 = vrot.slane %v5324_v18, 4 }
  0x39   :  { %v5358_v40 = vsel %vm1496_vm8, %v1497_v45, %v1498_v0  ;;  %v714_v39 = vsel %vm8089_vm3, %v5172_v30, %v713_v53  ;;  %v208_v55 = vrot.slane %v5324_v18, 6  ;;  %v209_v28 = vrot.slane %v5344_v20, 2 }
  0x3a   :  { %v1504_v7 = vrot.slane %v465_v59, 1  ;;  %v1502_v63 = vsel %vm1496_vm8, %v1500_v38, %v1501_v37  ;;  %v715_v11 = vsel %vm688_vm4, %v462_v61, %v714_v39  ;;  %v210_v34 = vrot.slane %v5344_v20, 4 }
  0x3b   :  { %v211_v29 = vrot.slane %v5344_v20, 6  ;;  %v4673_v51 = vpack.i.bf16 %v1502_v63, %v5358_v40  ;;  %v716_v4 = vsel %vm690_vm5, %v5174_v31, %v715_v11  ;;  %v368_v44 = vrot.slane %v5344_v20, 7 }
  0x3c   :  { %v474_v30 = vperm.slane %v5324_v18, 1  ;;  %v717_v10 = vsel %vm8088_vm6, %v5176_v33, %v716_v4  ;;  %v475_v2 = vperm.slane %v206_v52, 1  ;;  %v476_v48 = vperm.slane %v207_v49, 1 }
  0x3d   :  { %v477_v31 = vperm.slane %v208_v55, 1  ;;  %4674 = vrot.lane.b32.xlu0 %v4673_v51, %s4976_s21  ;;  %v5393_v14 = vsel %vm8085_vm7, %v366_v19, %v717_v10  ;;  %v478_v33 = vperm.slane %v5344_v20, 1  ;;  %v479_v3 = vperm.slane %v209_v28, 1 }
  0x3e   :  { %v480_v8 = vperm.slane %v210_v34, 1  ;;  %v1503_v15 = vrot.slane %v5393_v14, 1  ;;  %v481_v32 = vperm.slane %v211_v29, 1  ;;  %v724_v54 = vsel %vm682_vm0, %v475_v2, %v474_v30 }
  0x3f   :  { %v200_v41 = vrot.slane %v5376_v58, 2  ;;  %v725_v16 = vsel %vm684_vm2, %v476_v48, %v724_v54  ;;  %v201_v35 = vrot.slane %v5376_v58, 4  ;;  %v202_v36 = vrot.slane %v5376_v58, 6  ;;  %v5467_v54 = vld [vmem:[%s8014_s0 + $0x70] sm:$0xff] }
  0x40   :  { %v203_v17 = vrot.slane %v5389_v9, 2  ;;  %v1505_v60 = vsel %vm1496_vm8, %v1503_v15, %v1504_v7  ;;  %v726_v0 = vsel %vm8089_vm3, %v477_v31, %v725_v16  ;;  %v1507_v37 = vrot.slane %v481_v32, 1 }
  0x41   :  { %v204_v13 = vrot.slane %v5389_v9, 4  ;;  %v4683_v25 = vpack.i.bf16 %v1505_v60, %v1502_v63  ;;  %v727_v19 = vsel %vm688_vm4, %v478_v33, %v726_v0  ;;  %v8045_v50 = vrot.slane %v5407_v62, 2 }
  0x42   :  { %v8044_v43 = vrot.slane %v5407_v62, 4  ;;  %v728_v61 = vsel %vm690_vm5, %v479_v3, %v727_v19  ;;  %v8043_v47 = vrot.slane %v5407_v62, 6  ;;  %v8042_v59 = vrot.slane %v5414_v12, 2 }
  0x43   :  { %v8034_v45 = vrot.slane %v5414_v12, 4  ;;  %4684 = vrot.lane.b32.xlu1 %v4683_v25, %s4977_s26  ;;  %v729_v27 = vsel %vm8088_vm6, %v480_v8, %v728_v61  ;;  %v367_v38 = vrot.slane %v5389_v9, 7  ;;  %v369_v53 = vrot.slane %v5414_v12, 7 }
  0x44   :  { %v466_v7 = vperm.slane %v5376_v58, 1  ;;  %v5435_v39 = vsel %vm8085_vm7, %v368_v44, %v729_v27  ;;  %v467_v63 = vperm.slane %v200_v41, 1  ;;  %v468_v11 = vperm.slane %v201_v35, 1 }
  0x45   :  { %v469_v51 = vperm.slane %v202_v36, 1  ;;  %v1506_v4 = vrot.slane %v5435_v39, 1  ;;  %v470_v30 = vperm.slane %v5389_v9, 1  ;;  %v471_v10 = vperm.slane %v203_v17, 1 }
  0x46   :  { %v472_v44 = vperm.slane %v204_v13, 1  ;;  %v482_v2 = vperm.slane %v5407_v62, 1  ;;  %v483_v48 = vperm.slane %v8045_v50, 1  ;;  %v484_v31 = vperm.slane %v8044_v43, 1 }
  0x47   :  { %v485_v33 = vperm.slane %v8043_v47, 1  ;;  %v5457_v3 = vsel %vm1496_vm8, %v1506_v4, %v1507_v37  ;;  %v486_v8 = vperm.slane %v5414_v12, 1  ;;  %v487_v15 = vperm.slane %v8042_v59, 1 }
  0x48   :  { %v488_v32 = vperm.slane %v8034_v45, 1  ;;  %v4688_v16 = vpack.i.bf16 %v5457_v3, %v1505_v60  ;;  %v718_v0 = vsel %vm682_vm0, %v467_v63, %v466_v7  ;;  %v730_v37 = vsel %vm682_vm0, %v483_v48, %v482_v2  ;;  %v5481_v45 = vld [vmem:[%s8014_s0 + $0x78] sm:$0xff] }
  0x49   :  { %v4658_v25 = vpack.i.bf16 %v5393_v14, %v5347_v26  ;;  %v719_v19 = vsel %vm684_vm2, %v468_v11, %v718_v0  ;;  %v731_v61 = vsel %vm684_vm2, %v484_v31, %v730_v37  ;;  %v205_v27 = vrot.slane %v5389_v9, 6 }
  0x4a   :  { %v8035_v4 = vrot.slane %v5414_v12, 6  ;;  %4689 = vrot.lane.b32.xlu0 %v4688_v16, %s4976_s21  ;;  %v720_v60 = vsel %vm8089_vm3, %v469_v51, %v719_v19  ;;  %v732_v7 = vsel %vm8089_vm3, %v485_v33, %v731_v61  ;;  %v218_v63 = vrot.slane %v5467_v54, 2 }
  0x4b   :  { %4659 = vrot.lane.b32.xlu2 %v4658_v25, %s4978_s17  ;;  %v219_v11 = vrot.slane %v5467_v54, 4  ;;  %v721_v2 = vsel %vm688_vm4, %v470_v30, %v720_v60  ;;  %v733_v48 = vsel %vm688_vm4, %v486_v8, %v732_v7  ;;  %v473_v31 = vperm.slane %v205_v27, 1 }
  0x4c   :  { %v489_v16 = vperm.slane %v8035_v4, 1  ;;  %v722_v51 = vsel %vm690_vm5, %v471_v10, %v721_v2  ;;  %v734_v33 = vsel %vm690_vm5, %v487_v15, %v733_v48  ;;  %v220_v0 = vrot.slane %v5467_v54, 6 }
  0x4d   :  { %v221_v37 = vrot.slane %v5481_v45, 2  ;;  %v723_v25 = vsel %vm8088_vm6, %v472_v44, %v722_v51  ;;  %v735_v30 = vsel %vm8088_vm6, %v488_v32, %v734_v33  ;;  %v1712_v19 = vrot.slane %v473_v31, 1 }
  0x4e   :  { %v1715_v8 = vrot.slane %v489_v16, 1  ;;  %v918_v61 = vsel %vm8085_vm7, %v367_v38, %v723_v25  ;;  %v920_v60 = vsel %vm8085_vm7, %v369_v53, %v735_v30  ;;  %v222_v7 = vrot.slane %v5481_v45, 4 }
  0x4f   :  { %v370_v10 = vrot.slane %v5481_v45, 7  ;;  %v1714_v2 = vrot.slane %v920_v60, 1  ;;  %v4693_v15 = vpack.i.bf16 %v920_v60, %v918_v61  ;;  %v1711_v48 = vrot.slane %v918_v61, 1 }
  0x50   :  { %v490_v4 = vperm.slane %v5467_v54, 1  ;;  %v491_v44 = vperm.slane %v218_v63, 1  ;;  %v492_v32 = vperm.slane %v219_v11, 1  ;;  %v493_v38 = vperm.slane %v220_v0, 1 }
  0x51   :  { %v494_v53 = vperm.slane %v5481_v45, 1  ;;  %4694 = vrot.lane.b32.xlu1 %v4693_v15, %s4974_s29  ;;  %v1713_v31 = vsel %vm1496_vm8, %v1711_v48, %v1712_v19  ;;  %v1716_v16 = vsel %vm1496_vm8, %v1714_v2, %v1715_v8  ;;  %v495_v51 = vperm.slane %v221_v37, 1  ;;  %v5525_v15 = vld [vmem:[%s8014_s0 + $0x90] sm:$0xff] }
  0x52   :  { %v496_v33 = vperm.slane %v222_v7, 1  ;;  %v4703_v25 = vpack.i.bf16 %v1716_v16, %v1713_v31  ;;  %v736_v30 = vsel %vm682_vm0, %v491_v44, %v490_v4  ;;  %v993_v61 = vperm.slane %v5324_v18, 0  ;;  %v5544_v18 = vld [vmem:[%s8014_s0 + $0x98] sm:$0xff] }
  0x53   :  { %v994_v60 = vperm.slane %v206_v52, 0  ;;  %v737_v19 = vsel %vm684_vm2, %v492_v32, %v736_v30  ;;  %v995_v8 = vperm.slane %v207_v49, 0  ;;  %v996_v2 = vperm.slane %v208_v55, 0 }
  0x54   :  { %v997_v4 = vperm.slane %v5344_v20, 0  ;;  %4704 = vrot.lane.b32.xlu0 %v4703_v25, %s4979_s20  ;;  %v738_v52 = vsel %vm8089_vm3, %v493_v38, %v737_v19  ;;  %v998_v48 = vperm.slane %v209_v28, 0  ;;  %v999_v44 = vperm.slane %v210_v34, 0 }
  0x55   :  { %v1000_v32 = vperm.slane %v211_v29, 0  ;;  %v739_v49 = vsel %vm688_vm4, %v494_v53, %v738_v52  ;;  %v1244_v55 = vsel %vm1201_vm1, %v994_v60, %v993_v61  ;;  %v223_v38 = vrot.slane %v5481_v45, 6 }
  0x56   :  { %v8041_v31 = vrot.slane %v5525_v15, 2  ;;  %v740_v28 = vsel %vm690_vm5, %v495_v51, %v739_v49  ;;  %v1245_v34 = vsel %vm682_vm0, %v995_v8, %v1244_v55  ;;  %v8040_v20 = vrot.slane %v5525_v15, 4 }
  0x57   :  { %v8039_v29 = vrot.slane %v5525_v15, 6  ;;  %v741_v16 = vsel %vm8088_vm6, %v496_v33, %v740_v28  ;;  %v1246_v25 = vsel %vm684_vm2, %v996_v2, %v1245_v34  ;;  %v497_v30 = vperm.slane %v223_v38, 1 }
  0x58   :  { %v8038_v53 = vrot.slane %v5544_v18, 2  ;;  %v5558_v61 = vsel %vm8085_vm7, %v370_v10, %v741_v16  ;;  %v1247_v60 = vsel %vm8089_vm3, %v997_v4, %v1246_v25  ;;  %v8037_v51 = vrot.slane %v5544_v18, 4 }
  0x59   :  { %v8036_v19 = vrot.slane %v5544_v18, 6  ;;  %v1509_v8 = vrot.slane %v5558_v61, 1  ;;  %v4708_v52 = vpack.i.bf16 %v5558_v61, %v5435_v39  ;;  %v1248_v33 = vsel %vm688_vm4, %v998_v48, %v1247_v60 }
  0x5a   :  { %v1510_v2 = vrot.slane %v497_v30, 1  ;;  %v1249_v49 = vsel %vm690_vm5, %v999_v44, %v1248_v33  ;;  %v1009_v55 = vperm.slane %v5467_v54, 0  ;;  %v1010_v10 = vperm.slane %v218_v63, 0 }
  0x5b   :  { %v1011_v4 = vperm.slane %v219_v11, 0  ;;  %4709 = vrot.lane.b32.xlu1 %v4708_v52, %s4978_s17  ;;  %v5575_v28 = vsel %vm8088_vm6, %v1000_v32, %v1249_v49  ;;  %v1012_v48 = vperm.slane %v220_v0, 0  ;;  %v1013_v44 = vperm.slane %v5481_v45, 0 }
  0x5c   :  { %v5578_v34 = vsel %vm1496_vm8, %v1509_v8, %v1510_v2  ;;  %v4668_v16 = vpack.i.bf16 %v5575_v28, %v5235_v57  ;;  %v1014_v11 = vperm.slane %v221_v37, 0  ;;  %v1015_v25 = vperm.slane %v222_v7, 0  ;;  %v5597_v57 = vld [vmem:[%s8014_s0 + $0x80] sm:$0xff] }
  0x5d   :  { %v4718_v63 = vpack.i.bf16 %v5578_v34, %v5457_v3  ;;  %v1016_v32 = vperm.slane %v223_v38, 0  ;;  %v1025_v30 = vperm.slane %v5525_v15, 0  ;;  %v1026_v60 = vperm.slane %v8041_v31, 0 }
  0x5e   :  { %v1027_v54 = vperm.slane %v8040_v20, 0  ;;  %4669 = vrot.lane.b32.xlu2 %v4668_v16, %s4972_s27  ;;  %v1028_v45 = vperm.slane %v8039_v29, 0  ;;  %v1029_v3 = vperm.slane %v5544_v18, 0  ;;  %v1030_v0 = vperm.slane %v8038_v53, 0  ;;  %v5621_v16 = vld [vmem:[%s8014_s0 + $0x88] sm:$0xff] }
  0x5f   :  { %4719 = vrot.lane.b32.xlu0 %v4718_v63, %s4977_s26  ;;  %v1031_v37 = vperm.slane %v8037_v51, 0  ;;  %v1032_v7 = vperm.slane %v8036_v19, 0  ;;  %v1258_v38 = vsel %vm1201_vm1, %v1010_v10, %v1009_v55  ;;  %v1272_v8 = vsel %vm1201_vm1, %v1026_v60, %v1025_v30 }
  0x60   :  { %v441_v52 = vperm.slane %v181_v24, 1  ;;  %v1259_v33 = vsel %vm682_vm0, %v1011_v4, %v1258_v38  ;;  %v1273_v2 = vsel %vm682_vm0, %v1027_v54, %v1272_v8  ;;  %v457_v49 = vperm.slane %v193_v23, 1  ;;  %v5632_v23 = vld [vmem:[%s8014_s0 + $0xa0] sm:$0xff] }
  0x61   :  { %v224_v63 = vrot.slane %v5597_v57, 2  ;;  %v1260_v55 = vsel %vm684_vm2, %v1012_v48, %v1259_v33  ;;  %v1274_v10 = vsel %vm684_vm2, %v1028_v45, %v1273_v2  ;;  %v225_v24 = vrot.slane %v5597_v57, 4 }
  0x62   :  { %v1706_v56 = vrot.slane %v441_v52, 1  ;;  %v1261_v4 = vsel %vm8089_vm3, %v1013_v44, %v1260_v55  ;;  %v1275_v30 = vsel %vm8089_vm3, %v1029_v3, %v1274_v10  ;;  %v1709_v5 = vrot.slane %v457_v49, 1  ;;  %v5643_v44 = vld [vmem:[%s8014_s0 + $0xa8] sm:$0xff] }
  0x63   :  { %v226_v60 = vrot.slane %v5597_v57, 6  ;;  %v1262_v54 = vsel %vm688_vm4, %v1014_v11, %v1261_v4  ;;  %v1276_v48 = vsel %vm688_vm4, %v1030_v0, %v1275_v30  ;;  %v227_v3 = vrot.slane %v5621_v16, 2 }
  0x64   :  { %v1707_v45 = vsel %vm1496_vm8, %v1705_v46, %v1706_v56  ;;  %v1263_v38 = vsel %vm690_vm5, %v1015_v25, %v1262_v54  ;;  %v1277_v8 = vsel %vm690_vm5, %v1031_v37, %v1276_v48  ;;  %v1710_v11 = vsel %vm1496_vm8, %v1708_v6, %v1709_v5 }
  0x65   :  { %v228_v0 = vrot.slane %v5621_v16, 4  ;;  %v5653_v22 = vsel %vm8088_vm6, %v1016_v32, %v1263_v38  ;;  %v5656_v46 = vsel %vm8088_vm6, %v1032_v7, %v1277_v8  ;;  %v4678_v52 = vpack.i.bf16 %v1710_v11, %v1707_v45 }
  0x66   :  { %v236_v33 = vrot.slane %v5632_v23, 2  ;;  %v4723_v25 = vpack.i.bf16 %v5656_v46, %v5653_v22  ;;  %v237_v37 = vrot.slane %v5632_v23, 4  ;;  %v238_v21 = vrot.slane %v5632_v23, 6 }
  0x67   :  { %v239_v6 = vrot.slane %v5643_v44, 2  ;;  %4679 = vrot.lane.b32.xlu2 %v4678_v52, %s4979_s20  ;;  %v240_v32 = vrot.slane %v5643_v44, 4  ;;  %v371_v2 = vrot.slane %v5621_v16, 7  ;;  %v373_v7 = vrot.slane %v5643_v44, 7 }
  0x68   :  { %v498_v49 = vperm.slane %v5597_v57, 1  ;;  %4724 = vrot.lane.b32.xlu1 %v4723_v25, %s4972_s27  ;;  %v499_v55 = vperm.slane %v224_v63, 1  ;;  %v500_v10 = vperm.slane %v225_v24, 1  ;;  %v501_v56 = vperm.slane %v226_v60, 1 }
  0x69   :  { %v502_v4 = vperm.slane %v5621_v16, 1  ;;  %v503_v30 = vperm.slane %v227_v3, 1  ;;  %v504_v5 = vperm.slane %v228_v0, 1  ;;  %v514_v54 = vperm.slane %v5632_v23, 1 }
  0x6a   :  { %v515_v48 = vperm.slane %v236_v33, 1  ;;  %v516_v45 = vperm.slane %v237_v37, 1  ;;  %v517_v38 = vperm.slane %v238_v21, 1  ;;  %v518_v8 = vperm.slane %v5643_v44, 1 }
  0x6b   :  { %v519_v11 = vperm.slane %v239_v6, 1  ;;  %v520_v52 = vperm.slane %v240_v32, 1  ;;  %v742_v19 = vsel %vm682_vm0, %v499_v55, %v498_v49  ;;  %v229_v51 = vrot.slane %v5621_v16, 6 }
  0x6c   :  { %v754_v25 = vsel %vm682_vm0, %v515_v48, %v514_v54  ;;  %v743_v53 = vsel %vm684_vm2, %v500_v10, %v742_v19  ;;  %v241_v20 = vrot.slane %v5643_v44, 6  ;;  %v1017_v31 = vperm.slane %v5597_v57, 0 }
  0x6d   :  { %v755_v29 = vsel %vm684_vm2, %v516_v45, %v754_v25  ;;  %v744_v59 = vsel %vm8089_vm3, %v501_v56, %v743_v53  ;;  %v1018_v43 = vperm.slane %v224_v63, 0  ;;  %v1019_v50 = vperm.slane %v225_v24, 0 }
  0x6e   :  { %v756_v47 = vsel %vm8089_vm3, %v517_v38, %v755_v29  ;;  %v745_v49 = vsel %vm688_vm4, %v502_v4, %v744_v59  ;;  %v1020_v54 = vperm.slane %v226_v60, 0  ;;  %v1021_v48 = vperm.slane %v5621_v16, 0 }
  0x6f   :  { %v757_v55 = vsel %vm688_vm4, %v518_v8, %v756_v47  ;;  %v746_v19 = vsel %vm690_vm5, %v503_v30, %v745_v49  ;;  %v1022_v45 = vperm.slane %v227_v3, 0  ;;  %v1023_v25 = vperm.slane %v228_v0, 0 }
  0x70   :  { %v758_v10 = vsel %vm690_vm5, %v519_v11, %v757_v55  ;;  %v747_v57 = vsel %vm8088_vm6, %v504_v5, %v746_v19  ;;  %v1024_v29 = vperm.slane %v229_v51, 0  ;;  %v1033_v59 = vperm.slane %v5632_v23, 0 }
  0x71   :  { %v759_v53 = vsel %vm8088_vm6, %v520_v52, %v758_v10  ;;  %v5693_v47 = vsel %vm8085_vm7, %v371_v2, %v747_v57  ;;  %v1034_v24 = vperm.slane %v236_v33, 0  ;;  %v1035_v60 = vperm.slane %v237_v37, 0 }
  0x72   :  { %v5696_v63 = vsel %vm8085_vm7, %v373_v7, %v759_v53  ;;  %v1717_v56 = vrot.slane %v5693_v47, 1  ;;  %v1036_v4 = vperm.slane %v238_v21, 0  ;;  %v1037_v30 = vperm.slane %v5643_v44, 0 }
  0x73   :  { %v1720_v3 = vrot.slane %v5696_v63, 1  ;;  %v4733_v0 = vpack.i.bf16 %v5696_v63, %v5693_v47  ;;  %v1038_v5 = vperm.slane %v239_v6, 0  ;;  %v1039_v23 = vperm.slane %v240_v32, 0 }
  0x74   :  { %v1040_v2 = vperm.slane %v241_v20, 0  ;;  %v1265_v33 = vsel %vm1201_vm1, %v1018_v43, %v1017_v31  ;;  %v1279_v37 = vsel %vm1201_vm1, %v1034_v24, %v1033_v59  ;;  %v985_v7 = vperm.slane %v5376_v58, 0 }
  0x75   :  { %4734 = vrot.lane.b32.xlu0 %v4733_v0, %s4974_s29  ;;  %v986_v38 = vperm.slane %v200_v41, 0  ;;  %v1266_v21 = vsel %vm682_vm0, %v1019_v50, %v1265_v33  ;;  %v1280_v8 = vsel %vm682_vm0, %v1035_v60, %v1279_v37  ;;  %v987_v6 = vperm.slane %v201_v35, 0  ;;  %v5752_v60 = vld [vmem:[%s8014_s0 + $0xb8] sm:$0xff] }
  0x76   :  { %v988_v32 = vperm.slane %v202_v36, 0  ;;  %v1267_v11 = vsel %vm684_vm2, %v1020_v54, %v1266_v21  ;;  %v1281_v43 = vsel %vm684_vm2, %v1036_v4, %v1280_v8  ;;  %v989_v31 = vperm.slane %v5389_v9, 0 }
  0x77   :  { %v990_v52 = vperm.slane %v203_v17, 0  ;;  %v1268_v41 = vsel %vm8089_vm3, %v1021_v48, %v1267_v11  ;;  %v1282_v50 = vsel %vm8089_vm3, %v1037_v30, %v1281_v43  ;;  %v991_v49 = vperm.slane %v204_v13, 0 }
  0x78   :  { %v992_v58 = vperm.slane %v205_v27, 0  ;;  %v1269_v35 = vsel %vm688_vm4, %v1022_v45, %v1268_v41  ;;  %v1283_v36 = vsel %vm688_vm4, %v1038_v5, %v1282_v50  ;;  %v1001_v55 = vperm.slane %v5407_v62, 0  ;;  %v5742_v27 = vld [vmem:[%s8014_s0 + $0xb0] sm:$0xff] }
  0x79   :  { %v8100_v54 = vrot.slane %v5407_v62, 2  ;;  %v1270_v17 = vsel %vm690_vm5, %v1023_v25, %v1269_v35  ;;  %v1284_v48 = vsel %vm690_vm5, %v1039_v23, %v1283_v36  ;;  %v8101_v10 = vrot.slane %v5407_v62, 4 }
  0x7a   :  { %v8102_v13 = vrot.slane %v5407_v62, 6  ;;  %v1271_v45 = vsel %vm8088_vm6, %v1024_v29, %v1270_v17  ;;  %v1285_v53 = vsel %vm8088_vm6, %v1040_v2, %v1284_v48  ;;  %v1005_v59 = vperm.slane %v5414_v12, 0 }
  0x7b   :  { %v1002_v19 = vperm.slane %v8100_v54, 0  ;;  %v1003_v57 = vperm.slane %v8101_v10, 0  ;;  %v8103_v25 = vrot.slane %v5414_v12, 2  ;;  %v4738_v62 = vpack.i.bf16 %v1285_v53, %v1271_v45 }
  0x7c   :  { %v1004_v9 = vperm.slane %v8102_v13, 0  ;;  %v8104_v0 = vrot.slane %v5414_v12, 4  ;;  %v8105_v30 = vrot.slane %v5414_v12, 6  ;;  %v1237_v29 = vsel %vm1201_vm1, %v986_v38, %v985_v7 }
  0x7d   :  { %v1006_v24 = vperm.slane %v8103_v25, 0  ;;  %v1238_v23 = vsel %vm682_vm0, %v987_v6, %v1237_v29  ;;  %v1251_v2 = vsel %vm1201_vm1, %v1002_v19, %v1001_v55  ;;  %v242_v33 = vrot.slane %v5742_v27, 2  ;;  %4739 = vrot.lane.b32.xlu1 %v4738_v62, %s4975_s14 }
  0x7e   :  { %v1007_v4 = vperm.slane %v8104_v0, 0  ;;  %v1008_v5 = vperm.slane %v8105_v30, 0  ;;  %v243_v37 = vrot.slane %v5742_v27, 4  ;;  %v1239_v21 = vsel %vm684_vm2, %v988_v32, %v1238_v23 }
  0x7f   :  { %v1252_v8 = vsel %vm682_vm0, %v1003_v57, %v1251_v2  ;;  %v244_v11 = vrot.slane %v5742_v27, 6  ;;  %v245_v12 = vrot.slane %v5752_v60, 2  ;;  %v1240_v7 = vsel %vm8089_vm3, %v989_v31, %v1239_v21 }
  0x80   :  { %v1253_v38 = vsel %vm684_vm2, %v1004_v9, %v1252_v8  ;;  %v246_v6 = vrot.slane %v5752_v60, 4  ;;  %v372_v43 = vrot.slane %v5544_v18, 7  ;;  %v1241_v41 = vsel %vm688_vm4, %v990_v52, %v1240_v7 }
  0x81   :  { %v1254_v50 = vsel %vm8089_vm3, %v1005_v59, %v1253_v38  ;;  %v374_v32 = vrot.slane %v5752_v60, 7  ;;  %v506_v35 = vperm.slane %v5525_v15, 1  ;;  %v1242_v36 = vsel %vm690_vm5, %v991_v49, %v1241_v41 }
  0x82   :  { %v1255_v55 = vsel %vm688_vm4, %v1006_v24, %v1254_v50  ;;  %v8106_v31 = vrot.slane %v5525_v15, 2  ;;  %v8107_v19 = vrot.slane %v5525_v15, 4  ;;  %v1243_v48 = vsel %vm8088_vm6, %v992_v58, %v1242_v36 }
  0x83   :  { %v1256_v52 = vsel %vm690_vm5, %v1007_v4, %v1255_v55  ;;  %v8108_v10 = vrot.slane %v5525_v15, 6  ;;  %v510_v13 = vperm.slane %v5544_v18, 1  ;;  %v8109_v49 = vrot.slane %v5544_v18, 2 }
  0x84   :  { %v507_v54 = vperm.slane %v8106_v31, 1  ;;  %v508_v17 = vperm.slane %v8107_v19, 1  ;;  %v1257_v9 = vsel %vm8088_vm6, %v1008_v5, %v1256_v52  ;;  %v8110_v53 = vrot.slane %v5544_v18, 4 }
  0x85   :  { %v509_v57 = vperm.slane %v8108_v10, 1  ;;  %v511_v45 = vperm.slane %v8109_v49, 1  ;;  %v522_v25 = vperm.slane %v5742_v27, 1  ;;  %v4698_v24 = vpack.i.bf16 %v1257_v9, %v1243_v48 }
  0x86   :  { %v512_v59 = vperm.slane %v8110_v53, 1  ;;  %v523_v62 = vperm.slane %v242_v33, 1  ;;  %v524_v58 = vperm.slane %v243_v37, 1  ;;  %v525_v0 = vperm.slane %v244_v11, 1  ;;  %v4971_v53 = vld [vmem:[%s8014_s0 + $0xd0] sm:$0xff] }
  0x87   :  { %v526_v4 = vperm.slane %v5752_v60, 1  ;;  %v527_v15 = vperm.slane %v245_v12, 1  ;;  %v528_v30 = vperm.slane %v246_v6, 1  ;;  %v748_v29 = vsel %vm682_vm0, %v507_v54, %v506_v35  ;;  %4699 = vrot.lane.b32.xlu2 %v4698_v24, %s4975_s14 }
  0x88   :  { %v749_v5 = vsel %vm684_vm2, %v508_v17, %v748_v29  ;;  %v760_v23 = vsel %vm682_vm0, %v523_v62, %v522_v25  ;;  %v247_v2 = vrot.slane %v5752_v60, 6  ;;  %v1041_v21 = vperm.slane %v5742_v27, 0 }
  0x89   :  { %v750_v8 = vsel %vm8089_vm3, %v509_v57, %v749_v5  ;;  %v761_v7 = vsel %vm684_vm2, %v524_v58, %v760_v23  ;;  %v1042_v38 = vperm.slane %v242_v33, 0  ;;  %v1043_v41 = vperm.slane %v243_v37, 0  ;;  %v8114_v23 = vld [vmem:[#allocation8_spill] sm:$0xff] }
  0x8a   :  { %v751_v50 = vsel %vm688_vm4, %v510_v13, %v750_v8  ;;  %v762_v35 = vsel %vm8089_vm3, %v525_v0, %v761_v7  ;;  %v1044_v36 = vperm.slane %v244_v11, 0  ;;  %v1045_v55 = vperm.slane %v5752_v60, 0  ;;  %v4970_v13 = vld [vmem:[%s8014_s0 + $0xd8] sm:$0xff]  ;;  %v8115_v7 = vld [vmem:[#allocation7_spill] sm:$0xff] }
  0x8b   :  { %v752_v31 = vsel %vm690_vm5, %v511_v45, %v751_v50  ;;  %v763_v54 = vsel %vm688_vm4, %v526_v4, %v762_v35  ;;  %v1046_v19 = vperm.slane %v245_v12, 0  ;;  %v1047_v17 = vperm.slane %v246_v6, 0 }
  0x8c   :  { %v753_v27 = vsel %vm8088_vm6, %v512_v59, %v752_v31  ;;  %v764_v48 = vsel %vm690_vm5, %v527_v15, %v763_v54  ;;  %v1048_v52 = vperm.slane %v247_v2, 0  ;;  %v1286_v33 = vsel %vm1201_vm1, %v1042_v38, %v1041_v21  ;;  %v5857_v21 = vld [vmem:[%s8014_s0 + $0xe0] sm:$0xff]  ;;  %v5872_v54 = vld [vmem:[%s8014_s0 + $0xe8] sm:$0xff] }
  0x8d   :  { %v765_v37 = vsel %vm8088_vm6, %v528_v30, %v764_v48  ;;  %v5812_v10 = vsel %vm8085_vm7, %v372_v43, %v753_v27  ;;  %v1287_v60 = vsel %vm682_vm0, %v1043_v41, %v1286_v33  ;;  %v4713_v11 = vpack.i.bf16 %v5653_v22, %v5575_v28  ;;  %v5828_v43 = vld [vmem:[%s8014_s0 + $0xc0] sm:$0xff]  ;;  %v5848_v30 = vld [vmem:[%s8014_s0 + $0xc8] sm:$0xff]  ;;  %v8118_v33 = vld [vmem:[#allocation4_spill] sm:$0xff] }
  0x8e   :  { %v5818_v12 = vsel %vm8085_vm7, %v374_v32, %v765_v37  ;;  %v1512_v6 = vrot.slane %v5812_v10, 1  ;;  %v1288_v57 = vsel %vm684_vm2, %v1044_v36, %v1287_v60  ;;  %v376_v9 = vrot.slane %v4970_v13, 7  ;;  %v8116_v41 = vld [vmem:[#allocation2_spill] sm:$0xff]  ;;  %v8117_v36 = vld [vmem:[#allocation3_spill] sm:$0xff] }
  0x8f   :  { %8111 = vst [vmem:[#allocation9_spill] sm:$0xff] %v5818_v12  ;;  %v1515_v49 = vrot.slane %v5818_v12, 1  ;;  %v4748_v28 = vpack.i.bf16 %v5818_v12, %v5812_v10  ;;  %v1289_v22 = vsel %vm8089_vm3, %v1045_v55, %v1288_v57  ;;  %v529_v32 = vperm.slane %v247_v2, 1  ;;  %4714 = vrot.lane.b32.xlu2 %v4713_v11, %s4973_s28 }
  0x90   :  { %v1290_v45 = vsel %vm688_vm4, %v1046_v19, %v1289_v22  ;;  %v538_v59 = vperm.slane %v4971_v53, 1  ;;  %v542_v25 = vperm.slane %v4970_v13, 1  ;;  %v8112_v24 = vrot.slane %v5056_v1, 6  ;;  %v8119_v13 = vld [vmem:[#allocation5_spill] sm:$0xff] }
  0x91   :  { %4749 = vrot.lane.b32.xlu0 %v4748_v28, %s4978_s17  ;;  %v1291_v58 = vsel %vm690_vm5, %v1047_v17, %v1290_v45  ;;  %v1516_v0 = vrot.slane %v529_v32, 1  ;;  %v8113_v4 = vrot.slane %v5544_v18, 6  ;;  %v248_v29 = vrot.slane %v5828_v43, 2 }
  0x92   :  { %v545_v62 = vperm.slane %v8112_v24, 1  ;;  %v1292_v5 = vsel %vm8088_vm6, %v1048_v52, %v1291_v58  ;;  %v772_v1 = vsel %vm682_vm0, %v8114_v23, %v538_v59  ;;  %v249_v18 = vrot.slane %v5828_v43, 4 }
  0x93   :  { %v513_v15 = vperm.slane %v8113_v4, 1  ;;  %v4753_v8 = vpack.i.bf16 %v1292_v5, %v5656_v46  ;;  %v4763_v38 = vpack.i.bf16 %v8115_v7, %v1292_v5  ;;  %v773_v50 = vsel %vm684_vm2, %v8116_v41, %v772_v1 }
  0x94   :  { %v1519_v2 = vrot.slane %v545_v62, 1  ;;  %v5865_v35 = vsel %vm1496_vm8, %v1515_v49, %v1516_v0  ;;  %v774_v55 = vsel %vm8089_vm3, %v8117_v36, %v773_v50  ;;  %v250_v19 = vrot.slane %v5828_v43, 6 }
  0x95   :  { %v1513_v31 = vrot.slane %v513_v15, 1  ;;  %v251_v46 = vrot.slane %v5848_v30, 2  ;;  %4754 = vrot.lane.b32.xlu1 %v4753_v8, %s4973_s28  ;;  %v775_v17 = vsel %vm688_vm4, %v542_v25, %v774_v55  ;;  %v252_v27 = vrot.slane %v5848_v30, 4 }
  0x96   :  { %v253_v48 = vrot.slane %v5848_v30, 6  ;;  %v260_v52 = vrot.slane %v5857_v21, 2  ;;  %v776_v37 = vsel %vm690_vm5, %v8118_v33, %v775_v17  ;;  %v261_v11 = vrot.slane %v5857_v21, 4 }
  0x97   :  { %v5884_v60 = vsel %vm1496_vm8, %v1512_v6, %v1513_v31  ;;  %v262_v57 = vrot.slane %v5857_v21, 6  ;;  %v777_v49 = vsel %vm8088_vm6, %v8119_v13, %v776_v37  ;;  %v263_v22 = vrot.slane %v5872_v54, 2 }
  0x98   :  { %v4728_v28 = vpack.i.bf16 %v5884_v60, %v5578_v34  ;;  %v264_v32 = vrot.slane %v5872_v54, 4  ;;  %v5895_v45 = vsel %vm8085_vm7, %v376_v9, %v777_v49  ;;  %v265_v6 = vrot.slane %v5872_v54, 6 }
  0x99   :  { %v532_v53 = vperm.slane %v249_v18, 1  ;;  %v533_v59 = vperm.slane %v250_v19, 1  ;;  %4764 = vrot.lane.b32.xlu0 %v4763_v38, %s4972_s27  ;;  %v1518_v25 = vrot.slane %v5895_v45, 1  ;;  %v5901_v24 = vperm.slane %v251_v46, 1 }
  0x9a   :  { %4729 = vrot.lane.b32.xlu2 %v4728_v28, %s4976_s21  ;;  %v5903_v34 = vperm.slane %v252_v27, 1  ;;  %v547_v62 = vperm.slane %v260_v52, 1  ;;  %v548_v58 = vperm.slane %v261_v11, 1  ;;  %v549_v0 = vperm.slane %v262_v57, 1 }
  0x9b   :  { %v5905_v4 = vperm.slane %v263_v22, 1  ;;  %v5907_v9 = vperm.slane %v264_v32, 1  ;;  %v5910_v15 = vsel %vm1496_vm8, %v1518_v25, %v1519_v2  ;;  %v1049_v5 = vperm.slane %v5828_v43, 0 }
  0x9c   :  { %v1050_v23 = vperm.slane %v248_v29, 0  ;;  %v1051_v1 = vperm.slane %v249_v18, 0  ;;  %v4768_v8 = vpack.i.bf16 %v5910_v15, %v5865_v35  ;;  %v1052_v38 = vperm.slane %v250_v19, 0 }
  0x9d   :  { %v1053_v41 = vperm.slane %v5848_v30, 0  ;;  %v1054_v50 = vperm.slane %v251_v46, 0  ;;  %v1055_v36 = vperm.slane %v252_v27, 0  ;;  %v1056_v55 = vperm.slane %v253_v48, 0 }
  0x9e   :  { %v1065_v31 = vperm.slane %v5857_v21, 0  ;;  %v1066_v17 = vperm.slane %v260_v52, 0  ;;  %4769 = vrot.lane.b32.xlu1 %v4768_v8, %s4976_s21  ;;  %v1067_v2 = vperm.slane %v261_v11, 0  ;;  %v1068_v33 = vperm.slane %v262_v57, 0 }
  0x9f   :  { %v1069_v37 = vperm.slane %v5872_v54, 0  ;;  %v1070_v13 = vperm.slane %v263_v22, 0  ;;  %v1071_v18 = vperm.slane %v264_v32, 0  ;;  %v1072_v49 = vperm.slane %v265_v6, 0 }
  0xa0   :  { %v1293_v28 = vsel %vm1201_vm1, %v1050_v23, %v1049_v5  ;;  %v1307_v19 = vsel %vm1201_vm1, %v1066_v17, %v1065_v31  ;;  %v531_v52 = vperm.slane %v248_v29, 1  ;;  %v375_v25 = vrot.slane %v5848_v30, 7 }
  0xa1   :  { %v1294_v46 = vsel %vm682_vm0, %v1051_v1, %v1293_v28  ;;  %v1308_v27 = vsel %vm682_vm0, %v1067_v2, %v1307_v19  ;;  %v377_v22 = vrot.slane %v5872_v54, 7  ;;  %v530_v32 = vperm.slane %v5828_v43, 1 }
  0xa2   :  { %v1295_v11 = vsel %vm684_vm2, %v1052_v38, %v1294_v46  ;;  %v1309_v57 = vsel %vm684_vm2, %v1068_v33, %v1308_v27  ;;  %v534_v1 = vperm.slane %v5848_v30, 1  ;;  %v537_v8 = vperm.slane %v253_v48, 1 }
  0xa3   :  { %v1296_v5 = vsel %vm8089_vm3, %v1053_v41, %v1295_v11  ;;  %v1310_v23 = vsel %vm8089_vm3, %v1069_v37, %v1309_v57  ;;  %v546_v17 = vperm.slane %v5857_v21, 1  ;;  %v550_v38 = vperm.slane %v5872_v54, 1  ;;  %v6002_v11 = vld [vmem:[%s8014_s0 + $0x118] sm:$0xff] }
  0xa4   :  { %v1297_v31 = vsel %vm688_vm4, %v1054_v50, %v1296_v5  ;;  %v1311_v29 = vsel %vm688_vm4, %v1070_v13, %v1310_v23  ;;  %v553_v43 = vperm.slane %v265_v6, 1  ;;  %v766_v41 = vsel %vm682_vm0, %v531_v52, %v530_v32 }
  0xa5   :  { %v1298_v2 = vsel %vm690_vm5, %v1055_v36, %v1297_v31  ;;  %v1312_v33 = vsel %vm690_vm5, %v1071_v18, %v1311_v29  ;;  %v767_v48 = vsel %vm684_vm2, %v532_v53, %v766_v41  ;;  %v778_v50 = vsel %vm682_vm0, %v547_v62, %v546_v17  ;;  %v5955_v53 = vld [vmem:[%s8014_s0 + $0x1f0] sm:$0xff] }
  0xa6   :  { %v1299_v37 = vsel %vm8088_vm6, %v1056_v55, %v1298_v2  ;;  %v1313_v30 = vsel %vm8088_vm6, %v1072_v49, %v1312_v33  ;;  %v768_v21 = vsel %vm8089_vm3, %v533_v59, %v767_v48  ;;  %v779_v54 = vsel %vm684_vm2, %v548_v58, %v778_v50 }
  0xa7   :  { %v4778_v13 = vpack.i.bf16 %v1313_v30, %v1299_v37  ;;  %v1724_v28 = vrot.slane %v537_v8, 1  ;;  %v769_v36 = vsel %vm688_vm4, %v534_v1, %v768_v21  ;;  %v780_v6 = vsel %vm8089_vm3, %v549_v0, %v779_v54 }
  0xa8   :  { %v1727_v18 = vrot.slane %v553_v43, 1  ;;  %v505_v55 = vperm.slane %v229_v51, 1  ;;  %v770_v59 = vsel %vm690_vm5, %v5901_v24, %v769_v36  ;;  %v781_v62 = vsel %vm688_vm4, %v550_v38, %v780_v6  ;;  %v5974_v24 = vld [vmem:[%s8014_s0 + $0x1f8] sm:$0xff]  ;;  %v8120_v38 = vld [vmem:[#allocation6_spill] sm:$0xff]  ;;  %v6044_v36 = vld [vmem:[%s8014_s0 + $0x100] sm:$0xff] }
  0xa9   :  { %4779 = vrot.lane.b32.xlu0 %v4778_v13, %s4975_s14  ;;  %v521_v58 = vperm.slane %v241_v20, 1  ;;  %v4798_v0 = vpack.i.bf16 %v5358_v40, %v5910_v15  ;;  %v771_v51 = vsel %vm8088_vm6, %v5903_v34, %v770_v59  ;;  %v782_v16 = vsel %vm690_vm5, %v5905_v4, %v781_v62 }
  0xaa   :  { %v1718_v49 = vrot.slane %v505_v55, 1  ;;  %v4758_v19 = vpack.i.bf16 %v5865_v35, %v5884_v60  ;;  %v783_v20 = vsel %vm8088_vm6, %v5907_v9, %v782_v16  ;;  %v5979_v44 = vsel %vm8085_vm7, %v375_v25, %v771_v51  ;;  %v5992_v60 = vld [vmem:[%s8014_s0 + $0x110] sm:$0xff] }
  0xab   :  { %v1721_v46 = vrot.slane %v521_v58, 1  ;;  %v266_v34 = vrot.slane %v5955_v53, 2  ;;  %v5983_v4 = vsel %vm8085_vm7, %v377_v22, %v783_v20  ;;  %v1723_v27 = vrot.slane %v5979_v44, 1 }
  0xac   :  { %v1719_v35 = vsel %vm1496_vm8, %v1717_v56, %v1718_v49  ;;  %v267_v9 = vrot.slane %v5955_v53, 4  ;;  %v1726_v52 = vrot.slane %v5983_v4, 1  ;;  %v268_v47 = vrot.slane %v5955_v53, 6  ;;  %v6062_v49 = vld [vmem:[%s8014_s0 + $0x108] sm:$0xff] }
  0xad   :  { %v1722_v25 = vsel %vm1496_vm8, %v1720_v3, %v1721_v46  ;;  %v269_v56 = vrot.slane %v5974_v24, 2  ;;  %v1725_v57 = vsel %vm1496_vm8, %v1723_v27, %v1724_v28  ;;  %v270_v32 = vrot.slane %v5974_v24, 4 }
  0xae   :  { %v4743_v22 = vpack.i.bf16 %v1722_v25, %v1719_v35  ;;  %v271_v5 = vrot.slane %v5974_v24, 6  ;;  %v1728_v63 = vsel %vm1496_vm8, %v1726_v52, %v1727_v18  ;;  %v278_v3 = vrot.slane %v5992_v60, 2  ;;  %v6069_v35 = vld [vmem:[%s8014_s0 + $0x120] sm:$0xff] }
  0xaf   :  { %v279_v23 = vrot.slane %v5992_v60, 4  ;;  %v280_v1 = vrot.slane %v5992_v60, 6  ;;  %v4783_v8 = vpack.i.bf16 %v1728_v63, %v1725_v57  ;;  %v281_v31 = vrot.slane %v6002_v11, 2 }
  0xb0   :  { %4744 = vrot.lane.b32.xlu2 %v4743_v22, %s4979_s20  ;;  %v8059_v29 = vrot.slane %v6002_v11, 4  ;;  %v8058_v17 = vrot.slane %v6002_v11, 6  ;;  %v8121_v2 = vpack.i.bf16 %v8120_v38, %v8115_v7  ;;  %v378_v33 = vrot.slane %v5974_v24, 7 }
  0xb1   :  { %v380_v43 = vrot.slane %v6002_v11, 7  ;;  %v554_v41 = vperm.slane %v5955_v53, 1  ;;  %v555_v37 = vperm.slane %v266_v34, 1  ;;  %4784 = vrot.lane.b32.xlu1 %v4783_v8, %s4979_s20  ;;  %v556_v30 = vperm.slane %v267_v9, 1 }
  0xb2   :  { %4794 = vrot.lane.b32.xlu0 %v8121_v2, %s4973_s28  ;;  %v557_v48 = vperm.slane %v268_v47, 1  ;;  %v558_v7 = vperm.slane %v5974_v24, 1  ;;  %v559_v50 = vperm.slane %v269_v56, 1  ;;  %v560_v13 = vperm.slane %v270_v32, 1  ;;  %v6081_v2 = vld [vmem:[%s8014_s0 + $0x128] sm:$0xff] }
  0xb3   :  { %v561_v21 = vperm.slane %v271_v5, 1  ;;  %v570_v54 = vperm.slane %v5992_v60, 1  ;;  %v571_v28 = vperm.slane %v278_v3, 1  ;;  %v572_v6 = vperm.slane %v279_v23, 1 }
  0xb4   :  { %v573_v18 = vperm.slane %v280_v1, 1  ;;  %v574_v55 = vperm.slane %v6002_v11, 1  ;;  %v575_v59 = vperm.slane %v281_v31, 1  ;;  %v576_v62 = vperm.slane %v8059_v29, 1 }
  0xb5   :  { %v577_v58 = vperm.slane %v8058_v17, 1  ;;  %v784_v51 = vsel %vm682_vm0, %v555_v37, %v554_v41  ;;  %v796_v16 = vsel %vm682_vm0, %v571_v28, %v570_v54  ;;  %v1522_v27 = vrot.slane %v561_v21, 1 }
  0xb6   :  { %v785_v20 = vsel %vm684_vm2, %v556_v30, %v784_v51  ;;  %v797_v46 = vsel %vm684_vm2, %v572_v6, %v796_v16  ;;  %v8057_v52 = vrot.slane %v6044_v36, 2  ;;  %v8056_v63 = vrot.slane %v6044_v36, 4 }
  0xb7   :  { %v786_v25 = vsel %vm8089_vm3, %v557_v48, %v785_v20  ;;  %v798_v57 = vsel %vm8089_vm3, %v573_v18, %v797_v46  ;;  %v1525_v22 = vrot.slane %v577_v58, 1  ;;  %v8055_v41 = vrot.slane %v6044_v36, 6 }
  0xb8   :  { %4759 = vrot.lane.b32.xlu2 %v4758_v19, %s4977_s26  ;;  %v787_v8 = vsel %vm688_vm4, %v558_v7, %v786_v25  ;;  %v799_v38 = vsel %vm688_vm4, %v574_v55, %v798_v57  ;;  %v8054_v37 = vrot.slane %v6062_v49, 2  ;;  %v8050_v21 = vrot.slane %v6062_v49, 4 }
  0xb9   :  { %v788_v30 = vsel %vm690_vm5, %v559_v50, %v787_v8  ;;  %v800_v48 = vsel %vm690_vm5, %v575_v59, %v799_v38  ;;  %v8049_v19 = vrot.slane %v6069_v35, 2  ;;  %4799 = vrot.lane.b32.xlu1 %v4798_v0, %s4977_s26  ;;  %v8047_v28 = vrot.slane %v6069_v35, 4 }
  0xba   :  { %v789_v7 = vsel %vm8088_vm6, %v560_v13, %v788_v30  ;;  %v801_v54 = vsel %vm8088_vm6, %v576_v62, %v800_v48  ;;  %v8046_v6 = vrot.slane %v6069_v35, 6  ;;  %v8048_v55 = vrot.slane %v6081_v2, 2 }
  0xbb   :  { %v6098_v50 = vsel %vm8085_vm7, %v378_v33, %v789_v7  ;;  %v6101_v18 = vsel %vm8085_vm7, %v380_v43, %v801_v54  ;;  %v8052_v59 = vrot.slane %v6081_v2, 4  ;;  %v379_v0 = vrot.slane %v6062_v49, 7  ;;  %v6142_v7 = vld [vmem:[%s8014_s0 + $0x130] sm:$0xff] }
  0xbc   :  { %8122 = vst [vmem:[#allocation8_spill] sm:$0xff] %v6101_v18  ;;  %v1521_v40 = vrot.slane %v6098_v50, 1  ;;  %v1524_v15 = vrot.slane %v6101_v18, 1  ;;  %v381_v13 = vrot.slane %v6081_v2, 7  ;;  %v562_v62 = vperm.slane %v6044_v36, 1 }
  0xbd   :  { %v563_v33 = vperm.slane %v8057_v52, 1  ;;  %v564_v43 = vperm.slane %v8056_v63, 1  ;;  %v565_v58 = vperm.slane %v8055_v41, 1  ;;  %v566_v20 = vperm.slane %v6062_v49, 1 }
  0xbe   :  { %v6117_v51 = vsel %vm1496_vm8, %v1521_v40, %v1522_v27  ;;  %v6120_v16 = vsel %vm1496_vm8, %v1524_v15, %v1525_v22  ;;  %v567_v46 = vperm.slane %v8054_v37, 1  ;;  %v568_v57 = vperm.slane %v8050_v21, 1 }
  0xbf   :  { %v4808_v25 = vpack.i.bf16 %v6120_v16, %v6117_v51  ;;  %v578_v8 = vperm.slane %v6069_v35, 1  ;;  %v579_v27 = vperm.slane %v8049_v19, 1  ;;  %v580_v22 = vperm.slane %v8047_v28, 1 }
  0xc0   :  { %v581_v38 = vperm.slane %v8046_v6, 1  ;;  %v582_v30 = vperm.slane %v6081_v2, 1  ;;  %v583_v48 = vperm.slane %v8048_v55, 1  ;;  %v584_v54 = vperm.slane %v8052_v59, 1 }
  0xc1   :  { %4809 = vrot.lane.b32.xlu0 %v4808_v25, %s4976_s21  ;;  %v790_v40 = vsel %vm682_vm0, %v563_v33, %v562_v62  ;;  %v802_v15 = vsel %vm682_vm0, %v579_v27, %v578_v8  ;;  %v4773_v6 = vpack.i.bf16 %v5983_v4, %v5979_v44  ;;  %v8053_v19 = vrot.slane %v6062_v49, 6  ;;  %v6158_v25 = vld [vmem:[%s8014_s0 + $0x138] sm:$0xff] }
  0xc2   :  { %v791_v28 = vsel %vm684_vm2, %v564_v43, %v790_v40  ;;  %v803_v55 = vsel %vm684_vm2, %v580_v22, %v802_v15  ;;  %v8051_v21 = vrot.slane %v6081_v2, 6  ;;  %v290_v44 = vrot.slane %v6142_v7, 2 }
  0xc3   :  { %v792_v62 = vsel %vm8089_vm3, %v565_v58, %v791_v28  ;;  %v804_v33 = vsel %vm8089_vm3, %v581_v38, %v803_v55  ;;  %4774 = vrot.lane.b32.xlu2 %v4773_v6, %s4974_s29  ;;  %v291_v4 = vrot.slane %v6142_v7, 4  ;;  %v569_v27 = vperm.slane %v8053_v19, 1 }
  0xc4   :  { %v793_v43 = vsel %vm688_vm4, %v566_v20, %v792_v62  ;;  %v805_v8 = vsel %vm688_vm4, %v582_v30, %v804_v33  ;;  %v585_v22 = vperm.slane %v8051_v21, 1  ;;  %v292_v6 = vrot.slane %v6142_v7, 6 }
  0xc5   :  { %v794_v28 = vsel %vm690_vm5, %v567_v46, %v793_v43  ;;  %v806_v55 = vsel %vm690_vm5, %v583_v48, %v805_v8  ;;  %v293_v58 = vrot.slane %v6158_v25, 2  ;;  %v1730_v40 = vrot.slane %v569_v27, 1 }
  0xc6   :  { %v795_v38 = vsel %vm8088_vm6, %v568_v57, %v794_v28  ;;  %v807_v20 = vsel %vm8088_vm6, %v584_v54, %v806_v55  ;;  %v1733_v30 = vrot.slane %v585_v22, 1  ;;  %v294_v33 = vrot.slane %v6158_v25, 4  ;;  %v6194_v55 = vld [vmem:[%s8014_s0 + $0x158] sm:$0xff] }
  0xc7   :  { %v930_v15 = vsel %vm8085_vm7, %v379_v0, %v795_v38  ;;  %v932_v62 = vsel %vm8085_vm7, %v381_v13, %v807_v20  ;;  %v382_v46 = vrot.slane %v6158_v25, 7  ;;  %v586_v21 = vperm.slane %v6142_v7, 1  ;;  %v6186_v0 = vld [vmem:[%s8014_s0 + $0x150] sm:$0xff] }
  0xc8   :  { %v1732_v43 = vrot.slane %v932_v62, 1  ;;  %v4813_v48 = vpack.i.bf16 %v932_v62, %v930_v15  ;;  %v1729_v8 = vrot.slane %v930_v15, 1  ;;  %v587_v59 = vperm.slane %v290_v44, 1 }
  0xc9   :  { %v588_v19 = vperm.slane %v291_v4, 1  ;;  %v589_v57 = vperm.slane %v292_v6, 1  ;;  %v590_v54 = vperm.slane %v6158_v25, 1  ;;  %v591_v22 = vperm.slane %v293_v58, 1 }
  0xca   :  { %4814 = vrot.lane.b32.xlu1 %v4813_v48, %s4974_s29  ;;  %v1731_v13 = vsel %vm1496_vm8, %v1729_v8, %v1730_v40  ;;  %v1734_v27 = vsel %vm1496_vm8, %v1732_v43, %v1733_v30  ;;  %v592_v28 = vperm.slane %v294_v33, 1  ;;  %v808_v20 = vsel %vm682_vm0, %v587_v59, %v586_v21 }
  0xcb   :  { %v4823_v38 = vpack.i.bf16 %v1734_v27, %v1731_v13  ;;  %v4788_v15 = vpack.i.bf16 %v5336_v42, %v5895_v45  ;;  %v295_v62 = vrot.slane %v6158_v25, 6  ;;  %v809_v48 = vsel %vm684_vm2, %v588_v19, %v808_v20 }
  0xcc   :  { %v8065_v40 = vrot.slane %v6186_v0, 2  ;;  %v8064_v30 = vrot.slane %v6186_v0, 4  ;;  %v8063_v43 = vrot.slane %v6186_v0, 6  ;;  %v810_v8 = vsel %vm8089_vm3, %v589_v57, %v809_v48 }
  0xcd   :  { %4824 = vrot.lane.b32.xlu0 %v4823_v38, %s4979_s20  ;;  %4789 = vrot.lane.b32.xlu2 %v4788_v15, %s4978_s17  ;;  %v593_v21 = vperm.slane %v295_v62, 1  ;;  %v8062_v59 = vrot.slane %v6194_v55, 2  ;;  %v8060_v13 = vrot.slane %v6194_v55, 4  ;;  %v811_v27 = vsel %vm688_vm4, %v590_v54, %v810_v8 }
  0xce   :  { %v8061_v19 = vrot.slane %v6194_v55, 6  ;;  %v1105_v20 = vperm.slane %v6142_v7, 0  ;;  %v1106_v37 = vperm.slane %v290_v44, 0  ;;  %v812_v41 = vsel %vm690_vm5, %v591_v22, %v811_v27 }
  0xcf   :  { %v1528_v63 = vrot.slane %v593_v21, 1  ;;  %v1107_v38 = vperm.slane %v291_v4, 0  ;;  %v1108_v52 = vperm.slane %v292_v6, 0  ;;  %v813_v57 = vsel %vm8088_vm6, %v592_v28, %v812_v41 }
  0xd0   :  { %v1109_v15 = vperm.slane %v6158_v25, 0  ;;  %v1110_v48 = vperm.slane %v293_v58, 0  ;;  %v1111_v17 = vperm.slane %v294_v33, 0  ;;  %v6216_v29 = vsel %vm8085_vm7, %v382_v46, %v813_v57 }
  0xd1   :  { %8123 = vst [vmem:[#allocation7_spill] sm:$0xff] %v6216_v29  ;;  %v1112_v54 = vperm.slane %v295_v62, 0  ;;  %v1121_v8 = vperm.slane %v6186_v0, 0  ;;  %v1122_v7 = vperm.slane %v8065_v40, 0  ;;  %v1527_v44 = vrot.slane %v6216_v29, 1 }
  0xd2   :  { %v4828_v4 = vpack.i.bf16 %v6216_v29, %v6101_v18  ;;  %v1123_v41 = vperm.slane %v8064_v30, 0  ;;  %v1124_v25 = vperm.slane %v8063_v43, 0  ;;  %v1125_v6 = vperm.slane %v6194_v55, 0 }
  0xd3   :  { %v1126_v58 = vperm.slane %v8062_v59, 0  ;;  %v1127_v33 = vperm.slane %v8060_v13, 0  ;;  %v1128_v46 = vperm.slane %v8061_v19, 0  ;;  %v6237_v22 = vsel %vm1496_vm8, %v1527_v44, %v1528_v63 }
  0xd4   :  { %4829 = vrot.lane.b32.xlu1 %v4828_v4, %s4978_s17  ;;  %v1342_v28 = vsel %vm1201_vm1, %v1106_v37, %v1105_v20  ;;  %v1356_v62 = vsel %vm1201_vm1, %v1122_v7, %v1121_v8  ;;  %v1073_v21 = vperm.slane %v5955_v53, 0  ;;  %v4838_v27 = vpack.i.bf16 %v6237_v22, %v6120_v16 }
  0xd5   :  { %v1343_v57 = vsel %vm682_vm0, %v1107_v38, %v1342_v28  ;;  %v1357_v13 = vsel %vm682_vm0, %v1123_v41, %v1356_v62  ;;  %v1074_v19 = vperm.slane %v266_v34, 0  ;;  %v1075_v37 = vperm.slane %v267_v9, 0 }
  0xd6   :  { %v1344_v4 = vsel %vm684_vm2, %v1108_v52, %v1343_v57  ;;  %v1358_v63 = vsel %vm684_vm2, %v1124_v25, %v1357_v13  ;;  %v1076_v20 = vperm.slane %v268_v47, 0  ;;  %4839 = vrot.lane.b32.xlu0 %v4838_v27, %s4977_s26  ;;  %v1077_v8 = vperm.slane %v5974_v24, 0 }
  0xd7   :  { %v1345_v16 = vsel %vm8089_vm3, %v1109_v15, %v1344_v4  ;;  %v1359_v38 = vsel %vm8089_vm3, %v1125_v6, %v1358_v63  ;;  %v1078_v34 = vperm.slane %v269_v56, 0  ;;  %v1079_v9 = vperm.slane %v270_v32, 0  ;;  %v6274_v56 = vld [vmem:[%s8014_s0 + $0x140] sm:$0xff]  ;;  %v6296_v6 = vld [vmem:[%s8014_s0 + $0x148] sm:$0xff] }
  0xd8   :  { %v1346_v52 = vsel %vm688_vm4, %v1110_v48, %v1345_v16  ;;  %v1360_v13 = vsel %vm688_vm4, %v1126_v58, %v1359_v38  ;;  %v1080_v53 = vperm.slane %v271_v5, 0  ;;  %v1089_v7 = vperm.slane %v5992_v60, 0 }
  0xd9   :  { %v1347_v47 = vsel %vm690_vm5, %v1111_v17, %v1346_v52  ;;  %v1361_v15 = vsel %vm690_vm5, %v1127_v33, %v1360_v13  ;;  %v1090_v44 = vperm.slane %v278_v3, 0  ;;  %v1091_v32 = vperm.slane %v279_v23, 0  ;;  %v6305_v33 = vld [vmem:[%s8014_s0 + $0x160] sm:$0xff] }
  0xda   :  { %v6277_v48 = vsel %vm8088_vm6, %v1112_v54, %v1347_v47  ;;  %v6280_v24 = vsel %vm8088_vm6, %v1128_v46, %v1361_v15  ;;  %v1092_v5 = vperm.slane %v280_v1, 0  ;;  %v1093_v17 = vperm.slane %v6002_v11, 0 }
  0xdb   :  { %v4843_v3 = vpack.i.bf16 %v6280_v24, %v6277_v48  ;;  %v1094_v41 = vperm.slane %v281_v31, 0  ;;  %v8124_v54 = vrot.slane %v6002_v11, 4  ;;  %v8125_v23 = vrot.slane %v6002_v11, 6  ;;  %v6314_v11 = vld [vmem:[%s8014_s0 + $0x168] sm:$0xff] }
  0xdc   :  { %v1314_v1 = vsel %vm1201_vm1, %v1074_v19, %v1073_v21  ;;  %v1328_v58 = vsel %vm1201_vm1, %v1090_v44, %v1089_v7  ;;  %v296_v31 = vrot.slane %v6274_v56, 2  ;;  %v297_v19 = vrot.slane %v6274_v56, 4 }
  0xdd   :  { %v1095_v25 = vperm.slane %v8124_v54, 0  ;;  %v1096_v60 = vperm.slane %v8125_v23, 0  ;;  %4844 = vrot.lane.b32.xlu1 %v4843_v3, %s4972_s27  ;;  %v1315_v46 = vsel %vm682_vm0, %v1075_v37, %v1314_v1  ;;  %v1329_v28 = vsel %vm682_vm0, %v1091_v32, %v1328_v58 }
  0xde   :  { %v298_v62 = vrot.slane %v6274_v56, 6  ;;  %v1316_v21 = vsel %vm684_vm2, %v1076_v20, %v1315_v46  ;;  %v1330_v27 = vsel %vm684_vm2, %v1092_v5, %v1329_v28  ;;  %v299_v57 = vrot.slane %v6296_v6, 2 }
  0xdf   :  { %v300_v4 = vrot.slane %v6296_v6, 4  ;;  %v1317_v63 = vsel %vm8089_vm3, %v1077_v8, %v1316_v21  ;;  %v1331_v37 = vsel %vm8089_vm3, %v1093_v17, %v1330_v27  ;;  %v308_v16 = vrot.slane %v6305_v33, 2 }
  0xe0   :  { %v309_v38 = vrot.slane %v6305_v33, 4  ;;  %v1318_v52 = vsel %vm688_vm4, %v1078_v34, %v1317_v63  ;;  %v1332_v13 = vsel %vm688_vm4, %v1094_v41, %v1331_v37  ;;  %v310_v20 = vrot.slane %v6305_v33, 6 }
  0xe1   :  { %v311_v47 = vrot.slane %v6314_v11, 2  ;;  %v1319_v15 = vsel %vm690_vm5, %v1079_v9, %v1318_v52  ;;  %v1333_v7 = vsel %vm690_vm5, %v1095_v25, %v1332_v13  ;;  %v312_v8 = vrot.slane %v6314_v11, 4 }
  0xe2   :  { %v383_v44 = vrot.slane %v6296_v6, 7  ;;  %v6335_v32 = vsel %vm8088_vm6, %v1080_v53, %v1319_v15  ;;  %v6338_v5 = vsel %vm8088_vm6, %v1096_v60, %v1333_v7  ;;  %v385_v34 = vrot.slane %v6314_v11, 7 }
  0xe3   :  { %8126 = vst [vmem:[#allocation2_spill] sm:$0xff] %v6335_v32  ;;  %v594_v3 = vperm.slane %v6274_v56, 1  ;;  %v4803_v17 = vpack.i.bf16 %v6338_v5, %v6335_v32  ;;  %v595_v9 = vperm.slane %v296_v31, 1  ;;  %v596_v41 = vperm.slane %v297_v19, 1 }
  0xe4   :  { %v597_v54 = vperm.slane %v298_v62, 1  ;;  %v598_v25 = vperm.slane %v6296_v6, 1  ;;  %v599_v23 = vperm.slane %v299_v57, 1  ;;  %v600_v1 = vperm.slane %v300_v4, 1 }
  0xe5   :  { %v610_v53 = vperm.slane %v6305_v33, 1  ;;  %4804 = vrot.lane.b32.xlu2 %v4803_v17, %s4972_s27  ;;  %v611_v60 = vperm.slane %v308_v16, 1  ;;  %v612_v58 = vperm.slane %v309_v38, 1  ;;  %v613_v46 = vperm.slane %v310_v20, 1 }
  0xe6   :  { %v614_v28 = vperm.slane %v6314_v11, 1  ;;  %v615_v21 = vperm.slane %v311_v47, 1  ;;  %v616_v27 = vperm.slane %v312_v8, 1  ;;  %v814_v63 = vsel %vm682_vm0, %v595_v9, %v594_v3 }
  0xe7   :  { %v815_v52 = vsel %vm684_vm2, %v596_v41, %v814_v63  ;;  %v826_v13 = vsel %vm682_vm0, %v611_v60, %v610_v53  ;;  %v8066_v15 = vrot.slane %v6314_v11, 6  ;;  %v1113_v7 = vperm.slane %v6274_v56, 0 }
  0xe8   :  { %v816_v17 = vsel %vm8089_vm3, %v597_v54, %v815_v52  ;;  %v827_v59 = vsel %vm684_vm2, %v612_v58, %v826_v13  ;;  %v1114_v43 = vperm.slane %v296_v31, 0  ;;  %v1115_v30 = vperm.slane %v297_v19, 0 }
  0xe9   :  { %v817_v40 = vsel %vm688_vm4, %v598_v25, %v816_v17  ;;  %v828_v3 = vsel %vm8089_vm3, %v613_v46, %v827_v59  ;;  %v1116_v9 = vperm.slane %v298_v62, 0  ;;  %v1117_v37 = vperm.slane %v6296_v6, 0  ;;  %v4645_v46 = vpop.permute.xlu0 %4644 }
  0xea   :  { %v818_v41 = vsel %vm690_vm5, %v599_v23, %v817_v40  ;;  %v829_v53 = vsel %vm688_vm4, %v614_v28, %v828_v3  ;;  %v1118_v60 = vperm.slane %v299_v57, 0  ;;  %v1119_v63 = vperm.slane %v300_v4, 0 }
  0xeb   :  { %v819_v56 = vsel %vm8088_vm6, %v600_v1, %v818_v41  ;;  %v830_v54 = vsel %vm690_vm5, %v615_v21, %v829_v53  ;;  %v8127_v31 = vrot.slane %v6296_v6, 6  ;;  %v1129_v25 = vperm.slane %v6305_v33, 0 }
  0xec   :  { %v831_v59 = vsel %vm8088_vm6, %v616_v27, %v830_v54  ;;  %v6368_v62 = vsel %vm8085_vm7, %v383_v44, %v819_v56  ;;  %v1130_v58 = vperm.slane %v308_v16, 0  ;;  %v1131_v40 = vperm.slane %v309_v38, 0 }
  0xed   :  { %v1120_v19 = vperm.slane %v8127_v31, 0  ;;  %v6371_v23 = vsel %vm8085_vm7, %v385_v34, %v831_v59  ;;  %v1132_v4 = vperm.slane %v310_v20, 0  ;;  %v1133_v1 = vperm.slane %v6314_v11, 0 }
  0xee   :  { %v4853_v33 = vpack.i.bf16 %v6371_v23, %v6368_v62  ;;  %v1134_v21 = vperm.slane %v311_v47, 0  ;;  %v1135_v27 = vperm.slane %v312_v8, 0  ;;  %v1136_v16 = vperm.slane %v8066_v15, 0 }
  0xef   :  { %v1349_v38 = vsel %vm1201_vm1, %v1114_v43, %v1113_v7  ;;  %v1363_v44 = vsel %vm1201_vm1, %v1130_v58, %v1129_v25  ;;  %vm1945_vm9 = vcmask 31744   ;;  %v4647_v52 = vunpack.i.h.bf16 %v4645_v46 }
  0xf0   :  { %4854 = vrot.lane.b32.xlu0 %v4853_v33, %s4974_s29  ;;  %v1350_v20 = vsel %vm682_vm0, %v1115_v30, %v1349_v38  ;;  %v1364_v34 = vsel %vm682_vm0, %v1131_v40, %v1363_v44  ;;  %v4646_v13 = vunpack.i.l.bf16 %v4645_v46  ;;  %v1081_v8 = vperm.slane %v6044_v36, 0 }
  0xf1   :  { %v1351_v17 = vsel %vm684_vm2, %v1116_v9, %v1350_v20  ;;  %v1365_v47 = vsel %vm684_vm2, %v1132_v4, %v1364_v34  ;;  %v8128_v3 = vrot.slane %v6044_v36, 2  ;;  %v6398_v53 = vsel %vm1945_vm9, %v5347_v26, %v4647_v52  ;;  %v6494_v57 = vpop.permute.xlu0 %4664 }
  0xf2   :  { %v1352_v7 = vsel %vm8089_vm3, %v1117_v37, %v1351_v17  ;;  %v1366_v41 = vsel %vm8089_vm3, %v1133_v1, %v1365_v47  ;;  %v6394_v30 = vsel %vm1945_vm9, %v5336_v42, %v4646_v13  ;;  %v8129_v54 = vrot.slane %v6044_v36, 4  ;;  %v6429_v47 = vpop.permute.xlu1 %4649 }
  0xf3   :  { %v1082_v43 = vperm.slane %v8128_v3, 0  ;;  %v1353_v9 = vsel %vm688_vm4, %v1118_v60, %v1352_v7  ;;  %v1367_v56 = vsel %vm688_vm4, %v1134_v21, %v1366_v41  ;;  %v8130_v25 = vrot.slane %v6044_v36, 6  ;;  %v6434_v3 = vld [vmem:[%s8014_s0 + $0x170] sm:$0xff] }
  0xf4   :  { %v1083_v31 = vperm.slane %v8129_v54, 0  ;;  %v1354_v59 = vsel %vm690_vm5, %v1119_v63, %v1353_v9  ;;  %v1368_v58 = vsel %vm690_vm5, %v1135_v27, %v1367_v56  ;;  %v1085_v42 = vperm.slane %v6062_v49, 0  ;;  %v6442_v54 = vpop.permute.xlu2 %4659 }
  0xf5   :  { %v1084_v37 = vperm.slane %v8130_v25, 0  ;;  %v8131_v40 = vrot.slane %v6062_v49, 2  ;;  %v1355_v4 = vsel %vm8088_vm6, %v1120_v19, %v1354_v59  ;;  %v1369_v60 = vsel %vm8088_vm6, %v1136_v16, %v1368_v58 }
  0xf6   :  { %v8132_v1 = vrot.slane %v6062_v49, 4  ;;  %v8133_v33 = vrot.slane %v6062_v49, 6  ;;  %v4858_v21 = vpack.i.bf16 %v1369_v60, %v1355_v4  ;;  %v1097_v63 = vperm.slane %v6069_v35, 0 }
  0xf7   :  { %v1086_v26 = vperm.slane %v8131_v40, 0  ;;  %v8134_v27 = vrot.slane %v6069_v35, 2  ;;  %v8135_v44 = vrot.slane %v6069_v35, 4  ;;  %v8136_v34 = vrot.slane %v6069_v35, 6 }
  0xf8   :  { %v1087_v46 = vperm.slane %v8132_v1, 0  ;;  %v1088_v36 = vperm.slane %v8133_v33, 0  ;;  %v1101_v16 = vperm.slane %v6081_v2, 0  ;;  %v8137_v52 = vrot.slane %v6081_v2, 2  ;;  %4859 = vrot.lane.b32.xlu1 %v4858_v21, %s4975_s14 }
  0xf9   :  { %v1098_v38 = vperm.slane %v8134_v27, 0  ;;  %v1099_v20 = vperm.slane %v8135_v44, 0  ;;  %v1100_v19 = vperm.slane %v8136_v34, 0  ;;  %v8138_v49 = vrot.slane %v6081_v2, 4 }
  0xfa   :  { %v1102_v13 = vperm.slane %v8137_v52, 0  ;;  %v8139_v35 = vrot.slane %v6081_v2, 6  ;;  %v1321_v41 = vsel %vm1201_vm1, %v1082_v43, %v1081_v8  ;;  %v4652_v56 = vunpack.i.h.bf16 %v6429_v47  ;;  %v6451_v2 = vld [vmem:[%s8014_s0 + $0x178] sm:$0xff] }
  0xfb   :  { %v1103_v17 = vperm.slane %v8138_v49, 0  ;;  %v1335_v9 = vsel %vm1201_vm1, %v1098_v38, %v1097_v63  ;;  %v1322_v25 = vsel %vm682_vm0, %v1083_v31, %v1321_v41  ;;  %v4651_v58 = vunpack.i.l.bf16 %v6429_v47 }
  0xfc   :  { %v1104_v7 = vperm.slane %v8139_v35, 0  ;;  %v1336_v59 = vsel %vm682_vm0, %v1099_v20, %v1335_v9  ;;  %v4662_v40 = vunpack.i.h.bf16 %v6442_v54  ;;  %v1323_v8 = vsel %vm684_vm2, %v1084_v37, %v1322_v25 }
  0xfd   :  { %v1337_v43 = vsel %vm684_vm2, %v1100_v19, %v1336_v59  ;;  %v314_v60 = vrot.slane %v6434_v3, 2  ;;  %v1324_v31 = vsel %vm8089_vm3, %v1085_v42, %v1323_v8  ;;  %v315_v33 = vrot.slane %v6434_v3, 4 }
  0xfe   :  { %v1338_v1 = vsel %vm8089_vm3, %v1101_v16, %v1337_v43  ;;  %v316_v21 = vrot.slane %v6434_v3, 6  ;;  %v1325_v63 = vsel %vm688_vm4, %v1086_v26, %v1324_v31  ;;  %v317_v37 = vrot.slane %v6451_v2, 2 }
  0xff   :  { %v1339_v27 = vsel %vm688_vm4, %v1102_v13, %v1338_v1  ;;  %v318_v38 = vrot.slane %v6451_v2, 4  ;;  %v1326_v44 = vsel %vm690_vm5, %v1087_v46, %v1325_v63  ;;  %v384_v42 = vrot.slane %v6194_v55, 7 }
 0x100   :  { %v1340_v20 = vsel %vm690_vm5, %v1103_v17, %v1339_v27  ;;  %v386_v34 = vrot.slane %v6451_v2, 7  ;;  %v1327_v19 = vsel %vm8088_vm6, %v1088_v36, %v1326_v44  ;;  %v602_v26 = vperm.slane %v6186_v0, 1 }
 0x101   :  { %v1341_v16 = vsel %vm8088_vm6, %v1104_v7, %v1340_v20  ;;  %v8140_v52 = vrot.slane %v6186_v0, 2  ;;  %v8141_v35 = vrot.slane %v6186_v0, 4  ;;  %v8142_v46 = vrot.slane %v6186_v0, 6 }
 0x102   :  { %v4818_v49 = vpack.i.bf16 %v1341_v16, %v1327_v19  ;;  %v606_v9 = vperm.slane %v6194_v55, 1  ;;  %v8143_v25 = vrot.slane %v6194_v55, 2  ;;  %v8144_v36 = vrot.slane %v6194_v55, 4 }
 0x103   :  { %v603_v13 = vperm.slane %v8140_v52, 1  ;;  %v604_v41 = vperm.slane %v8141_v35, 1  ;;  %v605_v17 = vperm.slane %v8142_v46, 1  ;;  %v618_v8 = vperm.slane %v6434_v3, 1 }
 0x104   :  { %v607_v59 = vperm.slane %v8143_v25, 1  ;;  %v608_v7 = vperm.slane %v8144_v36, 1  ;;  %v619_v43 = vperm.slane %v314_v60, 1  ;;  %4819 = vrot.lane.b32.xlu2 %v4818_v49, %s4975_s14  ;;  %v620_v31 = vperm.slane %v315_v33, 1 }
 0x105   :  { %v621_v1 = vperm.slane %v316_v21, 1  ;;  %v622_v63 = vperm.slane %v6451_v2, 1  ;;  %v623_v27 = vperm.slane %v317_v37, 1  ;;  %v624_v0 = vperm.slane %v318_v38, 1 }
 0x106   :  { %v820_v44 = vsel %vm682_vm0, %v603_v13, %v602_v26  ;;  %v832_v20 = vsel %vm682_vm0, %v619_v43, %v618_v8  ;;  %v319_v19 = vrot.slane %v6451_v2, 6  ;;  %v1137_v35 = vperm.slane %v6434_v3, 0 }
 0x107   :  { %v821_v16 = vsel %vm684_vm2, %v604_v41, %v820_v44  ;;  %v833_v52 = vsel %vm684_vm2, %v620_v31, %v832_v20  ;;  %v1138_v46 = vperm.slane %v314_v60, 0  ;;  %v1139_v36 = vperm.slane %v315_v33, 0  ;;  %v6523_v44 = vpop.permute.xlu1 %4654 }
 0x108   :  { %v822_v49 = vsel %vm8089_vm3, %v605_v17, %v821_v16  ;;  %v834_v25 = vsel %vm8089_vm3, %v621_v1, %v833_v52  ;;  %v1140_v28 = vperm.slane %v316_v21, 0  ;;  %v1141_v8 = vperm.slane %v6451_v2, 0 }
 0x109   :  { %v823_v26 = vsel %vm688_vm4, %v606_v9, %v822_v49  ;;  %v835_v13 = vsel %vm688_vm4, %v622_v63, %v834_v25  ;;  %v1142_v41 = vperm.slane %v317_v37, 0  ;;  %v1143_v60 = vperm.slane %v318_v38, 0 }
 0x10a   :  { %v824_v43 = vsel %vm690_vm5, %v607_v59, %v823_v26  ;;  %v836_v3 = vsel %vm690_vm5, %v623_v27, %v835_v13  ;;  %v1144_v17 = vperm.slane %v319_v19, 0  ;;  %v1370_v31 = vsel %vm1201_vm1, %v1138_v46, %v1137_v35  ;;  %v4670_v46 = vpop.permute.xlu2 %4669 }
 0x10b   :  { %v825_v33 = vsel %vm8088_vm6, %v608_v7, %v824_v43  ;;  %v837_v21 = vsel %vm8088_vm6, %v624_v0, %v836_v3  ;;  %v1371_v59 = vsel %vm682_vm0, %v1139_v36, %v1370_v31  ;;  %v92_v7 = vld [vmem:[%s8014_s0 + $0x190] sm:$0xff]  ;;  %v4833_v16 = vpack.i.bf16 %v6277_v48, %v6338_v5 }
 0x10c   :  { %v6508_v1 = vsel %vm8085_vm7, %v384_v42, %v825_v33  ;;  %v6511_v37 = vsel %vm8085_vm7, %v386_v34, %v837_v21  ;;  %v1372_v42 = vsel %vm684_vm2, %v1140_v28, %v1371_v59  ;;  %v6528_v34 = vld [vmem:[%s8014_s0 + $0x198] sm:$0xff]  ;;  %v4657_v52 = vunpack.i.h.bf16 %v6523_v44 }
 0x10d   :  { %8145 = vst [vmem:[#allocation3_spill] sm:$0xff] %v6508_v1  ;;  %v1533_v63 = vrot.slane %v6511_v37, 1  ;;  %v4868_v27 = vpack.i.bf16 %v6511_v37, %v6508_v1  ;;  %v1530_v0 = vrot.slane %v6508_v1, 1  ;;  %v1373_v20 = vsel %vm8089_vm3, %v1141_v8, %v1372_v42  ;;  %4834 = vrot.lane.b32.xlu2 %v4833_v16, %s4973_s28 }
 0x10e   :  { %8146 = vst [vmem:[#allocation4_spill] sm:$0xff] %v6511_v37  ;;  %v4656_v35 = vunpack.i.l.bf16 %v6523_v44  ;;  %v1374_v28 = vsel %vm688_vm4, %v1142_v41, %v1373_v20  ;;  %v4672_v49 = vunpack.i.h.bf16 %v4670_v46  ;;  %v4671_v25 = vunpack.i.l.bf16 %v4670_v46  ;;  %v6633_v44 = vld [vmem:[%s8014_s0 + $0x1a0] sm:$0xff] }
 0x10f   :  { %4869 = vrot.lane.b32.xlu0 %v4868_v27, %s4978_s17  ;;  %v326_v36 = vrot.slane %v92_v7, 2  ;;  %v1375_v26 = vsel %vm690_vm5, %v1143_v60, %v1374_v28  ;;  %v327_v13 = vrot.slane %v92_v7, 4  ;;  %v328_v8 = vrot.slane %v92_v7, 6 }
 0x110   :  { %v329_v48 = vrot.slane %v6528_v34, 2  ;;  %v1376_v5 = vsel %vm8088_vm6, %v1144_v17, %v1375_v26  ;;  %v6543_v43 = vsel %vm1945_vm9, %v5435_v39, %v4672_v49  ;;  %v6547_v41 = vsel %vm1945_vm9, %v5393_v14, %v4671_v25  ;;  %v4675_v25 = vpop.permute.xlu0 %4674 }
 0x111   :  { %v330_v3 = vrot.slane %v6528_v34, 4  ;;  %v4873_v60 = vpack.i.bf16 %v1376_v5, %v6280_v24  ;;  %v331_v33 = vrot.slane %v6528_v34, 6  ;;  %v635_v21 = vperm.slane %v326_v36, 1 }
 0x112   :  { %v636_v31 = vperm.slane %v327_v13, 1  ;;  %v637_v59 = vperm.slane %v328_v8, 1  ;;  %v639_v27 = vperm.slane %v329_v48, 1  ;;  %v1153_v17 = vperm.slane %v92_v7, 0 }
 0x113   :  { %v640_v42 = vperm.slane %v330_v3, 1  ;;  %4874 = vrot.lane.b32.xlu1 %v4873_v60, %s4973_s28  ;;  %v1154_v39 = vperm.slane %v326_v36, 0  ;;  %v1155_v20 = vperm.slane %v327_v13, 0  ;;  %v1156_v16 = vperm.slane %v328_v8, 0 }
 0x114   :  { %v1157_v14 = vperm.slane %v6528_v34, 0  ;;  %v1158_v46 = vperm.slane %v329_v48, 0  ;;  %v1159_v28 = vperm.slane %v330_v3, 0  ;;  %v1160_v49 = vperm.slane %v331_v33, 0 }
 0x115   :  { %v388_v24 = vrot.slane %v6528_v34, 7  ;;  %v1384_v26 = vsel %vm1201_vm1, %v1154_v39, %v1153_v17  ;;  %v625_v9 = vperm.slane %v319_v19, 1  ;;  %v634_v38 = vperm.slane %v92_v7, 1 }
 0x116   :  { %v638_v15 = vperm.slane %v6528_v34, 1  ;;  %v1385_v36 = vsel %vm682_vm0, %v1155_v20, %v1384_v26  ;;  %v641_v13 = vperm.slane %v331_v33, 1  ;;  %vm8086_vm10 = vcmask 64512   ;;  %v6622_v26 = vld [vmem:[%s8014_s0 + $0x188] sm:$0xff] }
 0x117   :  { %vm8074_vm11 = vcmask 97280   ;;  %v1386_v8 = vsel %vm684_vm2, %v1156_v16, %v1385_v36  ;;  %v844_v48 = vsel %vm682_vm0, %v635_v21, %v634_v38  ;;  %v1534_v3 = vrot.slane %v625_v9, 1  ;;  %v1430_v9 = vld [vmem:[%s8015_s1 + $0x10] sm:$0x3] }
 0x118   :  { %v4677_v60 = vunpack.i.h.bf16 %v4675_v25  ;;  %v1387_v4 = vsel %vm8089_vm3, %v1157_v14, %v1386_v8  ;;  %v845_v17 = vsel %vm684_vm2, %v636_v31, %v844_v48  ;;  %v1537_v2 = vrot.slane %v641_v13, 1  ;;  %v4545_v48 = vld [vmem:[%s8015_s1 + $0x8] sm:$0xff] }
 0x119   :  { %v4676_v19 = vunpack.i.l.bf16 %v4675_v25  ;;  %v1388_v7 = vsel %vm688_vm4, %v1158_v46, %v1387_v4  ;;  %v846_v34 = vsel %vm8089_vm3, %v637_v59, %v845_v17  ;;  %v6569_v33 = vsel %vm1496_vm8, %v1533_v63, %v1534_v3  ;;  %v6594_v46 = vpop.permute.xlu1 %4684 }
 0x11a   :  { %v1964_v38 = vsel %vm8086_vm10, %v6398_v53, %v4677_v60  ;;  %v1389_v21 = vsel %vm690_vm5, %v1159_v28, %v1388_v7  ;;  %v847_v31 = vsel %vm688_vm4, %v638_v15, %v846_v34  ;;  %v8147_v20 = vrot.slane %v6194_v55, 6 }
 0x11b   :  { %v1963_v4 = vsel %vm8086_vm10, %v6394_v30, %v4676_v19  ;;  %v1981_v59 = vsel %vm8074_vm11, %v1964_v38, %v4652_v56  ;;  %v6584_v63 = vsel %vm8088_vm6, %v1160_v49, %v1389_v21  ;;  %v848_v53 = vsel %vm690_vm5, %v639_v27, %v847_v31 }
 0x11c   :  { %v1980_v39 = vsel %vm8074_vm11, %v1963_v4, %v4651_v58  ;;  %v609_v16 = vperm.slane %v8147_v20, 1  ;;  %v4883_v15 = vpack.i.bf16 %v6584_v63, %v1376_v5  ;;  %v849_v30 = vsel %vm8088_vm6, %v640_v42, %v848_v53  ;;  %v4680_v58 = vpop.permute.xlu2 %4679  ;;  %v6606_v42 = vld [vmem:[%s8014_s0 + $0x180] sm:$0xff] }
 0x11d   :  { %v2101_v14 = vunpack.c.l.b16 %v1430_v9  ;;  %vm8073_vm12 = vcmask 1041408   ;;  %v6597_v56 = vsel %vm8085_vm7, %v388_v24, %v849_v30  ;;  %vm8075_vm13 = vcmask 130048  }
 0x11e   :  { %v1531_v28 = vrot.slane %v609_v16, 1  ;;  %4884 = vrot.lane.b32.xlu0 %v4883_v15, %s4972_s27  ;;  %v1536_v55 = vrot.slane %v6597_v56, 1  ;;  %vm2013_vm14 = vcmask 162816   ;;  %v1997_v24 = vsel %vm8075_vm13, %v1980_v39, %v4656_v35 }
 0x11f   :  { %v2104_v5 = vpack.c.b16 %v2101_v14, %v2101_v14  ;;  %v1998_v25 = vsel %vm8075_vm13, %v1981_v59, %v4657_v52  ;;  %vm2030_vm15 = vcmask 195584   ;;  %v4682_v8 = vunpack.i.h.bf16 %v4680_v58 }
 0x120   :  { %v6611_v49 = vsel %vm1496_vm8, %v1530_v0, %v1531_v28  ;;  %v6625_v36 = vsel %vm1496_vm8, %v1536_v55, %v1537_v2  ;;  %v4681_v35 = vunpack.i.l.bf16 %v4680_v58  ;;  %v320_v3 = vrot.slane %v6606_v42, 2 }
 0x121   :  { %v4848_v0 = vpack.i.bf16 %v6611_v49, %v6237_v22  ;;  %v2134_v13 = vsel %vm8073_vm12, %v2104_v5, 0  ;;  %v4888_v52 = vpack.i.bf16 %v6625_v36, %v6569_v33  ;;  %v6643_v22 = vld [vmem:[%s8014_s0 + $0x1a8] sm:$0xff]  ;;  %v321_v60 = vrot.slane %v6606_v42, 4 }
 0x122   :  { %2141 = vmatpush.bf16.msra.mxu0 %v2134_v13  ;;  %v2015_v17 = vsel %vm2013_vm14, %v1998_v25, %v4682_v8  ;;  %v322_v2 = vrot.slane %v6606_v42, 6  ;;  %v323_v19 = vrot.slane %v6622_v26, 2  ;;  %v324_v7 = vrot.slane %v6622_v26, 4 }
 0x123   :  { %4849 = vrot.lane.b32.xlu2 %v4848_v0, %s4976_s21  ;;  %4889 = vrot.lane.b32.xlu1 %v4888_v52, %s4976_s21  ;;  %v6656_v34 = vsel %vm2030_vm15, %v2015_v17, %v4662_v40  ;;  %v2014_v38 = vsel %vm2013_vm14, %v1997_v24, %v4681_v35  ;;  %v325_v9 = vrot.slane %v6622_v26, 6  ;;  %v332_v21 = vrot.slane %v6633_v44, 2 }
 0x124   :  { %v8148_v31 = vunpack.i.l.bf16 %v6442_v54  ;;  %v333_v59 = vrot.slane %v6633_v44, 4  ;;  %v334_v53 = vrot.slane %v6633_v44, 6  ;;  %v335_v39 = vrot.slane %v6643_v22, 2  ;;  %v4544_v54 = vld [vmem:[%s8015_s1] sm:$0xff] }
 0x125   :  { %v336_v40 = vrot.slane %v6643_v22, 4  ;;  %v337_v20 = vrot.slane %v6643_v22, 6  ;;  %v628_v16 = vperm.slane %v321_v60, 1  ;;  %v629_v15 = vperm.slane %v322_v2, 1 }
 0x126   :  { %v6664_v4 = vsel %vm2030_vm15, %v2014_v38, %v8148_v31  ;;  %2142 = vmatpush.bf16.msra.mxu0 %v4545_v48  ;;  %v631_v30 = vperm.slane %v323_v19, 1  ;;  %v6674_v14 = vperm.slane %v324_v7, 1  ;;  %v643_v28 = vperm.slane %v332_v21, 1 }
 0x127   :  { %v644_v58 = vperm.slane %v333_v59, 1  ;;  %v645_v55 = vperm.slane %v334_v53, 1  ;;  %v647_v5 = vperm.slane %v335_v39, 1  ;;  %v6676_v24 = vperm.slane %v336_v40, 1 }
 0x128   :  { %v1145_v25 = vperm.slane %v6606_v42, 0  ;;  %v1146_v0 = vperm.slane %v320_v3, 0  ;;  %v1147_v13 = vperm.slane %v321_v60, 0  ;;  %v1148_v8 = vperm.slane %v322_v2, 0 }
 0x129   :  { %v1149_v52 = vperm.slane %v6622_v26, 0  ;;  %v1150_v35 = vperm.slane %v323_v19, 0  ;;  %v1151_v48 = vperm.slane %v324_v7, 0  ;;  %v1152_v17 = vperm.slane %v325_v9, 0 }
 0x12a   :  { %v1161_v38 = vperm.slane %v6633_v44, 0  ;;  %2143 = vmatpush.bf16.msra.mxu0 %v4544_v54  ;;  %v1162_v31 = vperm.slane %v332_v21, 0  ;;  %v1163_v27 = vperm.slane %v333_v59, 0  ;;  %v1164_v47 = vperm.slane %v334_v53, 0 }
 0x12b   :  { %v1165_v37 = vperm.slane %v6643_v22, 0  ;;  %v1166_v29 = vperm.slane %v335_v39, 0  ;;  %v1167_v1 = vperm.slane %v336_v40, 0  ;;  %v1168_v32 = vperm.slane %v337_v20, 0  ;;  %v4690_v39 = vpop.permute.xlu0 %4689  ;;  %v4695_v40 = vpop.permute.xlu1 %4694 }
 0x12c   :  { %v1377_v18 = vsel %vm1201_vm1, %v1146_v0, %v1145_v25  ;;  %v1391_v2 = vsel %vm1201_vm1, %v1162_v31, %v1161_v38  ;;  %v627_v19 = vperm.slane %v320_v3, 1  ;;  %v387_v7 = vrot.slane %v6622_v26, 7  ;;  %v4700_v3 = vpop.permute.xlu2 %4699 }
 0x12d   :  { %v1378_v60 = vsel %vm682_vm0, %v1147_v13, %v1377_v18  ;;  %v1392_v21 = vsel %vm682_vm0, %v1163_v27, %v1391_v2  ;;  %v389_v59 = vrot.slane %v6643_v22, 7  ;;  %v626_v53 = vperm.slane %v6606_v42, 1 }
 0x12e   :  { %v1379_v12 = vsel %vm684_vm2, %v1148_v8, %v1378_v60  ;;  %v1393_v25 = vsel %vm684_vm2, %v1164_v47, %v1392_v21  ;;  %v630_v18 = vperm.slane %v6622_v26, 1  ;;  %v633_v0 = vperm.slane %v325_v9, 1 }
 0x12f   :  { %v1380_v54 = vsel %vm8089_vm3, %v1149_v52, %v1379_v12  ;;  %v1394_v8 = vsel %vm8089_vm3, %v1165_v37, %v1393_v25  ;;  %v642_v27 = vperm.slane %v6633_v44, 1  ;;  %v646_v38 = vperm.slane %v6643_v22, 1 }
 0x130   :  { %v1381_v13 = vsel %vm688_vm4, %v1150_v35, %v1380_v54  ;;  %v1395_v31 = vsel %vm688_vm4, %v1166_v29, %v1394_v8  ;;  %v649_v60 = vperm.slane %v337_v20, 1  ;;  %v838_v12 = vsel %vm682_vm0, %v627_v19, %v626_v53 }
 0x131   :  { %v1382_v42 = vsel %vm690_vm5, %v1151_v48, %v1381_v13  ;;  %v1396_v26 = vsel %vm690_vm5, %v1167_v1, %v1395_v31  ;;  %v839_v9 = vsel %vm684_vm2, %v628_v16, %v838_v12  ;;  %v850_v52 = vsel %vm682_vm0, %v643_v28, %v642_v27 }
 0x132   :  { %v1383_v47 = vsel %vm8088_vm6, %v1152_v17, %v1382_v42  ;;  %v1397_v37 = vsel %vm8088_vm6, %v1168_v32, %v1396_v26  ;;  %v840_v44 = vsel %vm8089_vm3, %v629_v15, %v839_v9  ;;  %v851_v22 = vsel %vm684_vm2, %v644_v58, %v850_v52 }
 0x133   :  { %v1742_v35 = vrot.slane %v633_v0, 1  ;;  %v4898_v48 = vpack.i.bf16 %v1397_v37, %v1383_v47  ;;  %v841_v29 = vsel %vm688_vm4, %v630_v18, %v840_v44  ;;  %v852_v20 = vsel %vm8089_vm3, %v645_v55, %v851_v22  ;;  %v6732_v25 = vpop.permute.xlu0 %4704  ;;  %v6734_v18 = vpop.permute.xlu1 %4709  ;;  %v96_v47 = vld [vmem:[%s8014_s0 + $0x1b0] sm:$0xff] }
 0x134   :  { %v1745_v2 = vrot.slane %v649_v60, 1  ;;  %v842_v17 = vsel %vm690_vm5, %v631_v30, %v841_v29  ;;  %v853_v1 = vsel %vm688_vm4, %v646_v38, %v852_v20  ;;  %v4692_v16 = vunpack.i.h.bf16 %v4690_v39 }
 0x135   :  { %v4691_v19 = vunpack.i.l.bf16 %v4690_v39  ;;  %4899 = vrot.lane.b32.xlu0 %v4898_v48, %s4975_s14  ;;  %v843_v32 = vsel %vm8088_vm6, %v6674_v14, %v842_v17  ;;  %v854_v15 = vsel %vm690_vm5, %v647_v5, %v853_v1  ;;  %v8149_v28 = vrot.slane %v6296_v6, 6 }
 0x136   :  { %v8150_v21 = vrot.slane %v6314_v11, 6  ;;  %v855_v30 = vsel %vm8088_vm6, %v6676_v24, %v854_v15  ;;  %v6722_v53 = vsel %vm8085_vm7, %v387_v7, %v843_v32  ;;  %v1966_v39 = vsel %vm8086_vm10, %v6543_v43, %v4692_v16  ;;  %v6737_v43 = vpop.permute.xlu2 %4714 }
 0x137   :  { %v601_v58 = vperm.slane %v8149_v28, 1  ;;  %v1965_v14 = vsel %vm8086_vm10, %v6547_v41, %v4691_v19  ;;  %v6729_v5 = vsel %vm8085_vm7, %v389_v59, %v855_v30  ;;  %v1741_v6 = vrot.slane %v6722_v53, 1 }
 0x138   :  { %v617_v55 = vperm.slane %v8150_v21, 1  ;;  %v1744_v24 = vrot.slane %v6729_v5, 1  ;;  %v4697_v7 = vunpack.i.h.bf16 %v4695_v40  ;;  %v4696_v0 = vunpack.i.l.bf16 %v4695_v40 }
 0x139   :  { %v1736_v54 = vrot.slane %v601_v58, 1  ;;  %v4702_v13 = vunpack.i.h.bf16 %v4700_v3  ;;  %v1743_v41 = vsel %vm1496_vm8, %v1741_v6, %v1742_v35  ;;  %v8151_v59 = vrot.slane %v6368_v62, 1 }
 0x13a   :  { %v1739_v11 = vrot.slane %v617_v55, 1  ;;  %v8152_v27 = vrot.slane %v6371_v23, 1  ;;  %v4701_v42 = vunpack.i.l.bf16 %v4700_v3  ;;  %v1746_v31 = vsel %vm1496_vm8, %v1744_v24, %v1745_v2  ;;  %v6757_v23 = vld [vmem:[%s8014_s0 + $0x1b8] sm:$0xff] }
 0x13b   :  { %v1737_v8 = vsel %vm1496_vm8, %v8151_v59, %v1736_v54  ;;  %v1983_v12 = vsel %vm8074_vm11, %v1966_v39, %v4697_v7  ;;  %v1982_v40 = vsel %vm8074_vm11, %v1965_v14, %v4696_v0  ;;  %v4903_v26 = vpack.i.bf16 %v1746_v31, %v1743_v41  ;;  %v6780_v14 = vpop.permute.xlu0 %4719  ;;  %v6782_v6 = vpop.permute.xlu1 %4724 }
 0x13c   :  { %v1740_v38 = vsel %vm1496_vm8, %v8152_v27, %v1739_v11  ;;  %v2000_v62 = vsel %vm8075_vm13, %v1983_v12, %v4702_v13  ;;  %v1999_v9 = vsel %vm8075_vm13, %v1982_v40, %v4701_v42  ;;  %vm2047_vm12 = vcmask 228352  }
 0x13d   :  { %v4863_v60 = vpack.i.bf16 %v1740_v38, %v1737_v8  ;;  %v8153_v3 = vunpack.i.l.bf16 %v6494_v57  ;;  %v8154_v37 = vunpack.i.h.bf16 %v6494_v57  ;;  %vm8087_vm11 = vcmask 261120   ;;  %4904 = vrot.lane.b32.xlu1 %v4903_v26, %s4979_s20 }
 0x13e   :  { %vm2107_vm13 = vcmask 293888   ;;  %v8155_v22 = vunpack.i.l.bf16 %v6594_v46  ;;  %v8156_v48 = vunpack.i.h.bf16 %v6594_v46  ;;  %v338_v20 = vrot.slane %v96_v47, 2  ;;  %v6786_v0 = vpop.permute.xlu2 %4729 }
 0x13f   :  { %4864 = vrot.lane.b32.xlu2 %v4863_v60, %s4979_s20  ;;  %v2048_v52 = vsel %vm2047_vm12, %v6664_v4, %v8153_v3  ;;  %v2049_v44 = vsel %vm2047_vm12, %v6656_v34, %v8154_v37  ;;  %v339_v2 = vrot.slane %v96_v47, 4  ;;  %v340_v17 = vrot.slane %v96_v47, 6 }
 0x140   :  { %v2065_v35 = vsel %vm8087_vm11, %v2048_v52, %v8155_v22  ;;  %v2066_v29 = vsel %vm8087_vm11, %v2049_v44, %v8156_v48  ;;  %v341_v57 = vrot.slane %v6757_v23, 2  ;;  %v342_v34 = vrot.slane %v6757_v23, 4  ;;  %v6821_v48 = vld [vmem:[%s8014_s0 + $0x1d8] sm:$0xff] }
 0x141   :  { %v2081_v4 = vpack.c.bf16 %v2066_v29, %v2065_v35  ;;  %v343_v1 = vrot.slane %v6757_v23, 6  ;;  %v651_v16 = vperm.slane %v338_v20, 1  ;;  %v652_v19 = vperm.slane %v339_v2, 1 }
 0x142   :  { %v1169_v32 = vperm.slane %v96_v47, 0  ;;  %v653_v15 = vperm.slane %v340_v17, 1  ;;  %v655_v28 = vperm.slane %v341_v57, 1  ;;  %v656_v46 = vperm.slane %v342_v34, 1 }
 0x143   :  { %4188 = vmatmul.msk.bf16.vlgmr.msra.gmra.mxu0 %vm2107_vm13, %v2081_v4  ;;  %v1170_v58 = vperm.slane %v338_v20, 0  ;;  %v1171_v21 = vperm.slane %v339_v2, 0  ;;  %v1172_v55 = vperm.slane %v340_v17, 0  ;;  %v1173_v30 = vperm.slane %v6757_v23, 0  ;;  %v6828_v4 = vpop.permute.xlu0 %4734  ;;  %v6830_v17 = vpop.permute.xlu1 %4739 }
 0x144   :  { %v1174_v39 = vperm.slane %v341_v57, 0  ;;  %v1175_v54 = vperm.slane %v342_v34, 0  ;;  %v1176_v11 = vperm.slane %v343_v1, 0  ;;  %v390_v7 = vrot.slane %v6757_v23, 7 }
 0x145   :  { %v1398_v24 = vsel %vm1201_vm1, %v1170_v58, %v1169_v32  ;;  %v650_v41 = vperm.slane %v96_v47, 1  ;;  %v654_v59 = vperm.slane %v6757_v23, 1  ;;  %v657_v8 = vperm.slane %v343_v1, 1 }
 0x146   :  { %v1399_v13 = vsel %vm682_vm0, %v1171_v21, %v1398_v24  ;;  %v4707_v38 = vunpack.i.h.bf16 %v6732_v25  ;;  %v4706_v42 = vunpack.i.l.bf16 %v6732_v25  ;;  %v4878_v31 = vpack.i.bf16 %v6569_v33, %v6611_v49  ;;  %v6806_v33 = vld [vmem:[%s8014_s0 + $0x1d0] sm:$0xff]  ;;  %v6840_v1 = vpop.permute.xlu2 %4744  ;;  %v6868_v24 = vld [vmem:[%s8014_s0 + $0x1c8] sm:$0xff] }
 0x147   :  { %v1400_v27 = vsel %vm684_vm2, %v1172_v55, %v1399_v13  ;;  %v856_v12 = vsel %vm682_vm0, %v651_v16, %v650_v41  ;;  %v1540_v40 = vrot.slane %v657_v8, 1  ;;  %v4712_v26 = vunpack.i.h.bf16 %v6734_v18  ;;  %v6856_v55 = vld [vmem:[%s8014_s0 + $0x1c0] sm:$0xff] }
 0x148   :  { %v1401_v60 = vsel %vm8089_vm3, %v1173_v30, %v1400_v27  ;;  %v857_v23 = vsel %vm684_vm2, %v652_v19, %v856_v12  ;;  %v2016_v3 = vsel %vm2013_vm14, %v1999_v9, %v4706_v42  ;;  %v2017_v52 = vsel %vm2013_vm14, %v2000_v62, %v4707_v38  ;;  %4879 = vrot.lane.b32.xlu2 %v4878_v31, %s4977_s26  ;;  %v6880_v8 = vld [vmem:[%s8014_s0 + $0x1e0] sm:$0xff]  ;;  %v6887_v42 = vld [vmem:[%s8014_s0 + $0x1e8] sm:$0xff] }
 0x149   :  { %v1402_v47 = vsel %vm688_vm4, %v1174_v39, %v1401_v60  ;;  %v858_v25 = vsel %vm8089_vm3, %v653_v15, %v857_v23  ;;  %v4711_v37 = vunpack.i.l.bf16 %v6734_v18  ;;  %v2034_v44 = vsel %vm2030_vm15, %v2017_v52, %v4712_v26 }
 0x14a   :  { %v1403_v49 = vsel %vm690_vm5, %v1175_v54, %v1402_v47  ;;  %v859_v62 = vsel %vm688_vm4, %v654_v59, %v858_v25  ;;  %v4717_v9 = vunpack.i.h.bf16 %v6737_v43  ;;  %v4716_v35 = vunpack.i.l.bf16 %v6737_v43 }
 0x14b   :  { %v6813_v22 = vsel %vm8088_vm6, %v1176_v11, %v1403_v49  ;;  %v860_v18 = vsel %vm690_vm5, %v655_v28, %v859_v62  ;;  %v2033_v20 = vsel %vm2030_vm15, %v2016_v3, %v4711_v37  ;;  %v350_v2 = vrot.slane %v6806_v33, 2  ;;  %v6899_v49 = vpop.permute.xlu0 %4749 }
 0x14c   :  { %v4913_v29 = vpack.i.bf16 %v6813_v22, %v6584_v63  ;;  %v861_v43 = vsel %vm8088_vm6, %v656_v46, %v860_v18  ;;  %v6834_v57 = vsel %vm2047_vm12, %v2033_v20, %v4716_v35  ;;  %v6837_v34 = vsel %vm2047_vm12, %v2034_v44, %v4717_v9  ;;  %v6905_v9 = vpop.permute.xlu1 %4754 }
 0x14d   :  { %v351_v63 = vrot.slane %v6806_v33, 4  ;;  %v6844_v16 = vsel %vm8085_vm7, %v390_v7, %v861_v43  ;;  %v352_v19 = vrot.slane %v6806_v33, 6  ;;  %v353_v32 = vrot.slane %v6821_v48, 2 }
 0x14e   :  { %4914 = vrot.lane.b32.xlu0 %v4913_v29, %s4973_s28  ;;  %v354_v15 = vrot.slane %v6821_v48, 4  ;;  %v1539_v28 = vrot.slane %v6844_v16, 1  ;;  %v355_v46 = vrot.slane %v6821_v48, 6  ;;  %v392_v58 = vrot.slane %v6821_v48, 7  ;;  %v6907_v35 = vpop.permute.xlu2 %4759 }
 0x14f   :  { %v666_v21 = vperm.slane %v6806_v33, 1  ;;  %v667_v30 = vperm.slane %v350_v2, 1  ;;  %v668_v39 = vperm.slane %v351_v63, 1  ;;  %v669_v54 = vperm.slane %v352_v19, 1 }
 0x150   :  { %v670_v11 = vperm.slane %v6821_v48, 1  ;;  %v1541_v7 = vsel %vm1496_vm8, %v1539_v28, %v1540_v40  ;;  %v671_v13 = vperm.slane %v353_v32, 1  ;;  %v672_v41 = vperm.slane %v354_v15, 1 }
 0x151   :  { %v673_v59 = vperm.slane %v355_v46, 1  ;;  %v4918_v27 = vpack.i.bf16 %v1541_v7, %v6625_v36  ;;  %v868_v38 = vsel %vm682_vm0, %v667_v30, %v666_v21  ;;  %v344_v31 = vrot.slane %v6856_v55, 2 }
 0x152   :  { %v8083_v60 = vrot.slane %v6856_v55, 4  ;;  %v869_v12 = vsel %vm684_vm2, %v668_v39, %v868_v38  ;;  %v8081_v26 = vrot.slane %v6856_v55, 6  ;;  %v8079_v47 = vrot.slane %v6868_v24, 2 }
 0x153   :  { %v1543_v40 = vrot.slane %v673_v59, 1  ;;  %4919 = vrot.lane.b32.xlu1 %v4918_v27, %s4977_s26  ;;  %v870_v36 = vsel %vm8089_vm3, %v669_v54, %v869_v12  ;;  %v8076_v23 = vrot.slane %v6868_v24, 4  ;;  %v8077_v3 = vrot.slane %v6880_v8, 2 }
 0x154   :  { %v8078_v52 = vrot.slane %v6880_v8, 4  ;;  %v871_v25 = vsel %vm688_vm4, %v670_v11, %v870_v36  ;;  %v8080_v37 = vrot.slane %v6880_v8, 6  ;;  %v8082_v44 = vrot.slane %v6887_v42, 2 }
 0x155   :  { %v8084_v62 = vrot.slane %v6887_v42, 4  ;;  %v872_v29 = vsel %vm690_vm5, %v671_v13, %v871_v25  ;;  %v391_v18 = vrot.slane %v6868_v24, 7  ;;  %v393_v20 = vrot.slane %v6887_v42, 7 }
 0x156   :  { %v658_v43 = vperm.slane %v6856_v55, 1  ;;  %v873_v28 = vsel %vm8088_vm6, %v672_v41, %v872_v29  ;;  %v659_v21 = vperm.slane %v344_v31, 1  ;;  %v660_v30 = vperm.slane %v8083_v60, 1  ;;  %v6951_v60 = vpop.permute.xlu0 %4764 }
 0x157   :  { %v661_v39 = vperm.slane %v8081_v26, 1  ;;  %v6921_v54 = vsel %vm8085_vm7, %v392_v58, %v873_v28  ;;  %v662_v11 = vperm.slane %v6868_v24, 1  ;;  %v663_v13 = vperm.slane %v8079_v47, 1 }
 0x158   :  { %v664_v41 = vperm.slane %v8076_v23, 1  ;;  %v1542_v59 = vrot.slane %v6921_v54, 1  ;;  %v674_v27 = vperm.slane %v6880_v8, 1  ;;  %v675_v38 = vperm.slane %v8077_v3, 1 }
 0x159   :  { %v676_v12 = vperm.slane %v8078_v52, 1  ;;  %v677_v58 = vperm.slane %v8080_v37, 1  ;;  %v678_v36 = vperm.slane %v6887_v42, 1  ;;  %v679_v25 = vperm.slane %v8082_v44, 1 }
 0x15a   :  { %v680_v29 = vperm.slane %v8084_v62, 1  ;;  %v6942_v28 = vsel %vm1496_vm8, %v1542_v59, %v1543_v40  ;;  %v862_v23 = vsel %vm682_vm0, %v659_v21, %v658_v43  ;;  %v874_v3 = vsel %vm682_vm0, %v675_v38, %v674_v27 }
 0x15b   :  { %v4722_v52 = vunpack.i.h.bf16 %v6780_v14  ;;  %v4928_v47 = vpack.i.bf16 %v6942_v28, %v1541_v7  ;;  %v863_v37 = vsel %vm684_vm2, %v660_v30, %v862_v23  ;;  %v875_v26 = vsel %vm684_vm2, %v676_v12, %v874_v3  ;;  %v6963_v30 = vpop.permute.xlu1 %4769 }
 0x15c   :  { %v4721_v44 = vunpack.i.l.bf16 %v6780_v14  ;;  %v864_v62 = vsel %vm8089_vm3, %v661_v39, %v863_v37  ;;  %v876_v40 = vsel %vm8089_vm3, %v677_v58, %v875_v26  ;;  %v4893_v43 = vpack.i.bf16 %v6729_v5, %v6722_v53  ;;  %v6965_v37 = vpop.permute.xlu2 %4774 }
 0x15d   :  { %v4727_v21 = vunpack.i.h.bf16 %v6782_v6  ;;  %4929 = vrot.lane.b32.xlu0 %v4928_v47, %s4976_s21  ;;  %v865_v7 = vsel %vm688_vm4, %v662_v11, %v864_v62  ;;  %v877_v23 = vsel %vm688_vm4, %v678_v36, %v876_v40  ;;  %v4726_v3 = vunpack.i.l.bf16 %v6782_v6 }
 0x15e   :  { %v4732_v14 = vunpack.i.h.bf16 %v6786_v0  ;;  %v866_v26 = vsel %vm690_vm5, %v663_v13, %v865_v7  ;;  %v878_v53 = vsel %vm690_vm5, %v679_v25, %v877_v23  ;;  %4894 = vrot.lane.b32.xlu2 %v4893_v43, %s4974_s29  ;;  %v4731_v47 = vunpack.i.l.bf16 %v6786_v0  ;;  %v6996_v43 = vpop.permute.xlu0 %4779 }
 0x15f   :  { %v1951_v5 = vsel %vm1945_vm9, %v5812_v10, %v4727_v21  ;;  %v867_v62 = vsel %vm8088_vm6, %v664_v41, %v866_v26  ;;  %v879_v6 = vsel %vm8088_vm6, %v680_v29, %v878_v53  ;;  %v1950_v39 = vsel %vm1945_vm9, %v5558_v61, %v4726_v3 }
 0x160   :  { %v1968_v11 = vsel %vm8086_vm10, %v1951_v5, %v4732_v14  ;;  %v942_v13 = vsel %vm8085_vm7, %v391_v18, %v867_v62  ;;  %v944_v59 = vsel %vm8085_vm7, %v393_v20, %v879_v6  ;;  %v1967_v27 = vsel %vm8086_vm10, %v1950_v39, %v4731_v47 }
 0x161   :  { %v349_v38 = vrot.slane %v6868_v24, 6  ;;  %v1750_v10 = vrot.slane %v944_v59, 1  ;;  %v4933_v12 = vpack.i.bf16 %v944_v59, %v942_v13  ;;  %v1747_v0 = vrot.slane %v942_v13, 1 }
 0x162   :  { %v361_v41 = vrot.slane %v6887_v42, 6  ;;  %v2067_v61 = vsel %vm8087_vm11, %v6834_v57, %v4721_v44  ;;  %v2068_v18 = vsel %vm8087_vm11, %v6837_v34, %v4722_v52  ;;  %v4948_v20 = vpack.i.bf16 %v6098_v50, %v6921_v54 }
 0x163   :  { %v665_v58 = vperm.slane %v349_v38, 1  ;;  %4934 = vrot.lane.b32.xlu1 %v4933_v12, %s4974_s29  ;;  %v2082_v25 = vpack.c.bf16 %v2068_v18, %v2067_v61  ;;  %v4737_v29 = vunpack.i.h.bf16 %v6828_v4  ;;  %v4736_v40 = vunpack.i.l.bf16 %v6828_v4  ;;  %v7006_v4 = vpop.permute.xlu1 %4784 }
 0x164   :  { %v681_v36 = vperm.slane %v361_v41, 1  ;;  %v4908_v57 = vpack.i.bf16 %v6844_v16, %v6597_v56  ;;  %v4742_v34 = vunpack.i.h.bf16 %v6830_v17  ;;  %v4741_v52 = vunpack.i.l.bf16 %v6830_v17  ;;  %v7013_v5 = vpop.permute.xlu2 %4789 }
 0x165   :  { %v1748_v21 = vrot.slane %v665_v58, 1  ;;  %4189 = vmatmul.msk.bf16.gmra.mxu0 %vm2107_vm13, %v2082_v25  ;;  %vm8157_vm7 = vcmask 97280   ;;  %v4747_v3 = vunpack.i.h.bf16 %v6840_v1  ;;  %vm8159_vm11 = vcmask 130048  }
 0x166   :  { %v1751_v44 = vrot.slane %v681_v36, 1  ;;  %v1984_v7 = vsel %vm8157_vm7, %v1967_v27, %v4736_v40  ;;  %vm8158_vm10 = vmmov %vm8157_vm7  ;;  %4909 = vrot.lane.b32.xlu2 %v4908_v57, %s4978_s17  ;;  %v4746_v17 = vunpack.i.l.bf16 %v6840_v1  ;;  %v4958_v6 = vpack.i.bf16 %v6117_v51, %v6942_v28  ;;  %v7043_v61 = vpop.permute.xlu0 %4794 }
 0x167   :  { %v1985_v23 = vsel %vm8158_vm10, %v1968_v11, %v4737_v29  ;;  %v1749_v14 = vsel %vm1496_vm8, %v1747_v0, %v1748_v21  ;;  %v2001_v26 = vsel %vm8159_vm11, %v1984_v7, %v4741_v52  ;;  %vm8160_vm6 = vmmov %vm8159_vm11  ;;  %v4752_v39 = vunpack.i.h.bf16 %v6899_v49 }
 0x168   :  { %v2002_v53 = vsel %vm8160_vm6, %v1985_v23, %v4742_v34  ;;  %v1752_v47 = vsel %vm1496_vm8, %v1750_v10, %v1751_v44  ;;  %v2018_v13 = vsel %vm2013_vm14, %v2001_v26, %v4746_v17  ;;  %v4751_v59 = vunpack.i.l.bf16 %v6899_v49  ;;  %v8161_v34 = vld [vmem:[#allocation9_spill] sm:$0xff] }
 0x169   :  { %v2019_v62 = vsel %vm2013_vm14, %v2002_v53, %v4747_v3  ;;  %v4943_v11 = vpack.i.bf16 %v1752_v47, %v1749_v14  ;;  %v1185_v27 = vperm.slane %v6806_v33, 0  ;;  %v1186_v12 = vperm.slane %v350_v2, 0 }
 0x16a   :  { %v2036_v1 = vsel %vm2030_vm15, %v2019_v62, %v4752_v39  ;;  %v1187_v10 = vperm.slane %v351_v63, 0  ;;  %v1188_v51 = vperm.slane %v352_v19, 0  ;;  %v2035_v28 = vsel %vm2030_vm15, %v2018_v13, %v4751_v59 }
 0x16b   :  { %4944 = vrot.lane.b32.xlu0 %v4943_v11, %s4979_s20  ;;  %v1189_v0 = vperm.slane %v6821_v48, 0  ;;  %v1190_v49 = vperm.slane %v353_v32, 0  ;;  %v1191_v58 = vperm.slane %v354_v15, 0  ;;  %4949 = vrot.lane.b32.xlu1 %v4948_v20, %s4978_s17  ;;  %v1192_v2 = vperm.slane %v355_v46, 0  ;;  %v7053_v29 = vpop.permute.xlu1 %4799 }
 0x16c   :  { %v1412_v33 = vsel %vm1201_vm1, %v1186_v12, %v1185_v27  ;;  %v4757_v63 = vunpack.i.h.bf16 %v6905_v9  ;;  %v4756_v19 = vunpack.i.l.bf16 %v6905_v9  ;;  %v4762_v32 = vunpack.i.h.bf16 %v6907_v35  ;;  %v7074_v17 = vpop.permute.xlu2 %4804 }
 0x16d   :  { %v1413_v18 = vsel %vm682_vm0, %v1187_v10, %v1412_v33  ;;  %v4761_v36 = vunpack.i.l.bf16 %v6907_v35  ;;  %v4767_v15 = vunpack.i.h.bf16 %v6951_v60  ;;  %v4766_v25 = vunpack.i.l.bf16 %v6951_v60 }
 0x16e   :  { %v1414_v20 = vsel %vm684_vm2, %v1188_v51, %v1413_v18  ;;  %v2052_v48 = vsel %vm2047_vm12, %v2035_v28, %v4756_v19  ;;  %v2053_v46 = vsel %vm2047_vm12, %v2036_v1, %v4757_v63  ;;  %v1177_v21 = vperm.slane %v6856_v55, 0 }
 0x16f   :  { %v1415_v9 = vsel %vm8089_vm3, %v1189_v0, %v1414_v20  ;;  %v1953_v40 = vsel %vm1945_vm9, %v5895_v45, %v4767_v15  ;;  %v1178_v35 = vperm.slane %v344_v31, 0  ;;  %v1952_v52 = vsel %vm1945_vm9, %v8161_v34, %v4766_v25 }
 0x170   :  { %v1416_v57 = vsel %vm688_vm4, %v1190_v49, %v1415_v9  ;;  %v8162_v44 = vrot.slane %v6856_v55, 4  ;;  %v8163_v7 = vrot.slane %v6856_v55, 6  ;;  %v1181_v45 = vperm.slane %v6868_v24, 0 }
 0x171   :  { %v1417_v3 = vsel %vm690_vm5, %v1191_v58, %v1416_v57  ;;  %v8164_v14 = vrot.slane %v6868_v24, 2  ;;  %v8165_v31 = vrot.slane %v6868_v24, 4  ;;  %vm8166_vm6 = vcmask 1047559  }
 0x172   :  { %v1179_v60 = vperm.slane %v8162_v44, 0  ;;  %v1180_v23 = vperm.slane %v8163_v7, 0  ;;  %v7077_v47 = vsel %vm8166_vm6, %v1192_v2, %v1417_v3  ;;  %v1184_v62 = vperm.slane %v349_v38, 0 }
 0x173   :  { %v1182_v26 = vperm.slane %v8164_v14, 0  ;;  %v1183_v53 = vperm.slane %v8165_v31, 0  ;;  %v1193_v55 = vperm.slane %v6880_v8, 0  ;;  %v8167_v39 = vrot.slane %v6880_v8, 2  ;;  %4959 = vrot.lane.b32.xlu0 %v4958_v6, %s4977_s26  ;;  %v7109_v19 = vpop.permute.xlu1 %4814 }
 0x174   :  { %v4923_v13 = vpack.i.bf16 %v7077_v47, %v6813_v22  ;;  %v8168_v59 = vrot.slane %v6880_v8, 4  ;;  %v8169_v1 = vrot.slane %v6880_v8, 6  ;;  %v1197_v10 = vperm.slane %v6887_v42, 0  ;;  %v7099_v22 = vpop.permute.xlu0 %4809 }
 0x175   :  { %v1194_v11 = vperm.slane %v8167_v39, 0  ;;  %v8170_v24 = vrot.slane %v6887_v42, 2  ;;  %v8171_v51 = vrot.slane %v6887_v42, 4  ;;  %v1200_v6 = vperm.slane %v361_v41, 0 }
 0x176   :  { %v1195_v27 = vperm.slane %v8168_v59, 0  ;;  %v1196_v12 = vperm.slane %v8169_v1, 0  ;;  %v1405_v0 = vsel %vm1201_vm1, %v1178_v35, %v1177_v21  ;;  %4924 = vrot.lane.b32.xlu2 %v4923_v13, %s4972_s27  ;;  %vm8172_vm7 = vcmask 261120  }
 0x177   :  { %v1198_v38 = vperm.slane %v8170_v24, 0  ;;  %v1199_v28 = vperm.slane %v8171_v51, 0  ;;  %v1406_v8 = vsel %vm682_vm0, %v1179_v60, %v1405_v0  ;;  %v1419_v49 = vsel %vm1201_vm1, %v1194_v11, %v1193_v55  ;;  %vm8173_vm8 = vmmov %vm8172_vm7  ;;  %v8184_v0 = vld [vmem:[#allocation2_spill] sm:$0xff] }
 0x178   :  { %v2069_v58 = vsel %vm8172_vm7, %v2052_v48, %v4761_v36  ;;  %v2070_v2 = vsel %vm8173_vm8, %v2053_v46, %v4762_v32  ;;  %v1407_v33 = vsel %vm684_vm2, %v1180_v23, %v1406_v8  ;;  %v1420_v63 = vsel %vm682_vm0, %v1195_v27, %v1419_v49  ;;  %vm8177_vm8 = vmmov %vm8166_vm6  ;;  %v4820_v23 = vpop.permute.xlu2 %4819 }
 0x179   :  { %v2083_v42 = vpack.c.bf16 %v2070_v2, %v2069_v58  ;;  %v4772_v41 = vunpack.i.h.bf16 %v6963_v30  ;;  %v1408_v18 = vsel %vm8089_vm3, %v1181_v45, %v1407_v33  ;;  %v1421_v15 = vsel %vm684_vm2, %v1196_v12, %v1420_v63 }
 0x17a   :  { %v4771_v20 = vunpack.i.l.bf16 %v6963_v30  ;;  %v4777_v25 = vunpack.i.h.bf16 %v6965_v37  ;;  %v1409_v36 = vsel %vm688_vm4, %v1182_v26, %v1408_v18  ;;  %v1422_v32 = vsel %vm8089_vm3, %v1197_v10, %v1421_v15 }
 0x17b   :  { %4190 = vmatmul.msk.bf16.gmra.mxu0 %vm2107_vm13, %v2083_v42  ;;  %vm8174_vm10 = vcmask 64512   ;;  %v4776_v46 = vunpack.i.l.bf16 %v6965_v37  ;;  %v1410_v9 = vsel %vm690_vm5, %v1183_v53, %v1409_v36  ;;  %v1423_v21 = vsel %vm688_vm4, %v1198_v38, %v1422_v32  ;;  %v4830_v13 = vpop.permute.xlu1 %4829  ;;  %v8181_v38 = vld [vmem:[#allocation8_spill] sm:$0xff] }
 0x17c   :  { %v1970_v48 = vsel %vm8174_vm10, %v1953_v40, %v4772_v41  ;;  %vm8175_vm11 = vmmov %vm8174_vm10  ;;  %v1411_v30 = vsel %vm8166_vm6, %v1184_v62, %v1410_v9  ;;  %v1424_v57 = vsel %vm690_vm5, %v1199_v28, %v1423_v21  ;;  %vm8176_vm7 = vcmask 97280   ;;  %v4825_v26 = vpop.permute.xlu0 %4824 }
 0x17d   :  { %v1969_v35 = vsel %vm8175_vm11, %v1952_v52, %v4771_v20  ;;  %v1987_v34 = vsel %vm8176_vm7, %v1970_v48, %v4777_v25  ;;  %v4782_v44 = vunpack.i.h.bf16 %v6996_v43  ;;  %v1425_v60 = vsel %vm8177_vm8, %v1200_v6, %v1424_v57  ;;  %vm8178_vm3 = vmmov %vm8176_vm7 }
 0x17e   :  { %v1986_v40 = vsel %vm8178_vm3, %v1969_v35, %v4776_v46  ;;  %v4781_v37 = vunpack.i.l.bf16 %v6996_v43  ;;  %v4787_v7 = vunpack.i.h.bf16 %v7006_v4  ;;  %v4938_v3 = vpack.i.bf16 %v1425_v60, %v1411_v30  ;;  %vm8185_vm6 = vmmov %vm8175_vm11 }
 0x17f   :  { %vm8179_vm4 = vcmask 130048   ;;  %v4786_v45 = vunpack.i.l.bf16 %v7006_v4  ;;  %v4792_v14 = vunpack.i.h.bf16 %v7013_v5  ;;  %v4791_v62 = vunpack.i.l.bf16 %v7013_v5  ;;  %vm8186_vm8 = vmmov %vm8176_vm7 }
 0x180   :  { %v2004_v52 = vsel %vm8179_vm4, %v1987_v34, %v4782_v44  ;;  %vm8180_vm5 = vmmov %vm8179_vm4  ;;  %v4797_v55 = vunpack.i.h.bf16 %v7043_v61  ;;  %4939 = vrot.lane.b32.xlu2 %v4938_v3, %s4975_s14  ;;  %v4796_v11 = vunpack.i.l.bf16 %v7043_v61  ;;  %v4802_v4 = vunpack.i.h.bf16 %v7053_v29  ;;  %v4835_v41 = vpop.permute.xlu2 %4834 }
 0x181   :  { %v2003_v31 = vsel %vm8180_vm5, %v1986_v40, %v4781_v37  ;;  %v2021_v53 = vsel %vm2013_vm14, %v2004_v52, %v4787_v7  ;;  %v4801_v1 = vunpack.i.l.bf16 %v7053_v29  ;;  %v4807_v5 = vunpack.i.h.bf16 %v7074_v17  ;;  %vm8187_vm5 = vmmov %vm8179_vm4 }
 0x182   :  { %v2020_v43 = vsel %vm2013_vm14, %v2003_v31, %v4786_v45  ;;  %v2038_v39 = vsel %vm2030_vm15, %v2021_v53, %v4792_v14  ;;  %v4806_v10 = vunpack.i.l.bf16 %v7074_v17  ;;  %v4812_v24 = vunpack.i.h.bf16 %v7099_v22  ;;  %v8189_v31 = vld [vmem:[#allocation3_spill] sm:$0xff] }
 0x183   :  { %v2037_v59 = vsel %vm2030_vm15, %v2020_v43, %v4791_v62  ;;  %v2055_v27 = vsel %vm2047_vm12, %v2038_v39, %v4797_v55  ;;  %v1955_v61 = vsel %vm1945_vm9, %v8181_v38, %v4807_v5  ;;  %vm8182_vm3 = vcmask 261120   ;;  %v8190_v62 = vld [vmem:[#allocation7_spill] sm:$0xff] }
 0x184   :  { %v2054_v12 = vsel %vm2047_vm12, %v2037_v59, %v4796_v11  ;;  %vm8183_vm10 = vmmov %vm8182_vm3  ;;  %v4811_v6 = vunpack.i.l.bf16 %v7099_v22  ;;  %v4953_v29 = vpack.i.bf16 %v8184_v0, %v7077_v47  ;;  %v1954_v8 = vsel %vm1945_vm9, %v6098_v50, %v4806_v10  ;;  %v4840_v18 = vpop.permute.xlu0 %4839 }
 0x185   :  { %v2071_v51 = vsel %vm8182_vm3, %v2054_v12, %v4801_v1  ;;  %v2072_v28 = vsel %vm8183_vm10, %v2055_v27, %v4802_v4  ;;  %v4817_v49 = vunpack.i.h.bf16 %v7109_v19  ;;  %v4816_v17 = vunpack.i.l.bf16 %v7109_v19  ;;  %v4845_v19 = vpop.permute.xlu1 %4844  ;;  %vm8188_vm10 = vmmov %vm8182_vm3 }
 0x186   :  { %v1971_v58 = vsel %vm8175_vm11, %v1954_v8, %v4811_v6  ;;  %v1972_v2 = vsel %vm8185_vm6, %v1955_v61, %v4812_v24  ;;  %v2084_v33 = vpack.c.bf16 %v2072_v28, %v2071_v51  ;;  %v4822_v63 = vunpack.i.h.bf16 %v4820_v23  ;;  %vm8191_vm11 = vmmov %vm8185_vm6 }
 0x187   :  { %v4821_v42 = vunpack.i.l.bf16 %v4820_v23  ;;  %v1988_v47 = vsel %vm8176_vm7, %v1971_v58, %v4816_v17  ;;  %v1989_v22 = vsel %vm8186_vm8, %v1972_v2, %v4817_v49  ;;  %v4827_v50 = vunpack.i.h.bf16 %v4825_v26  ;;  %vm8192_vm8 = vmmov %vm8176_vm7 }
 0x188   :  { %4954 = vrot.lane.b32.xlu2 %v4953_v29, %s4973_s28  ;;  %v4826_v15 = vunpack.i.l.bf16 %v4825_v26  ;;  %v2006_v25 = vsel %vm8187_vm5, %v1989_v22, %v4822_v63  ;;  %v4832_v36 = vunpack.i.h.bf16 %v4830_v13  ;;  %v4831_v32 = vunpack.i.l.bf16 %v4830_v13  ;;  %v4850_v40 = vpop.permute.xlu2 %4849  ;;  %vm8193_vm5 = vmmov %vm8179_vm4  ;;  %s4981_s28 = smov 64  }
 0x189   :  { %v2005_v20 = vsel %vm8179_vm4, %v1988_v47, %v4821_v42  ;;  %v2023_v46 = vsel %vm2013_vm14, %v2006_v25, %v4827_v50  ;;  %v4837_v9 = vunpack.i.h.bf16 %v4835_v41  ;;  %v4836_v21 = vunpack.i.l.bf16 %v4835_v41 }
 0x18a   :  { %v2022_v48 = vsel %vm2013_vm14, %v2005_v20, %v4826_v15  ;;  %v2040_v30 = vsel %vm2030_vm15, %v2023_v46, %v4832_v36  ;;  %v4842_v57 = vunpack.i.h.bf16 %v4840_v18  ;;  %v4841_v34 = vunpack.i.l.bf16 %v4840_v18 }
 0x18b   :  { %4191 = vmatmul.msk.bf16.gmra.mxu0 %vm2107_vm13, %v2084_v33  ;;  %v2039_v35 = vsel %vm2030_vm15, %v2022_v48, %v4831_v32  ;;  %v4847_v44 = vunpack.i.h.bf16 %v4845_v19  ;;  %v4846_v60 = vunpack.i.l.bf16 %v4845_v19  ;;  %v2057_v23 = vsel %vm2047_vm12, %v2040_v30, %v4837_v9  ;;  %v8195_v48 = vld [vmem:[#allocation4_spill] sm:$0xff] }
 0x18c   :  { %v4855_v37 = vpop.permute.xlu0 %4854  ;;  %v2056_v7 = vsel %vm2047_vm12, %v2039_v35, %v4836_v21  ;;  %v2074_v52 = vsel %vm8188_vm10, %v2057_v23, %v4842_v57  ;;  %v4852_v45 = vunpack.i.h.bf16 %v4850_v40  ;;  %v4851_v14 = vunpack.i.l.bf16 %v4850_v40  ;;  %vm8194_vm10 = vmmov %vm8182_vm3 }
 0x18d   :  { %v2073_v3 = vsel %vm8182_vm3, %v2056_v7, %v4841_v34  ;;  %v4860_v26 = vpop.permute.xlu1 %4859  ;;  %v1957_v53 = vsel %vm1945_vm9, %v8189_v31, %v4847_v44  ;;  %v1956_v55 = vsel %vm1945_vm9, %v8190_v62, %v4846_v60  ;;  %v4857_v39 = vunpack.i.h.bf16 %v4855_v37 }
 0x18e   :  { %v2085_v43 = vpack.c.bf16 %v2074_v52, %v2073_v3  ;;  %v4856_v11 = vunpack.i.l.bf16 %v4855_v37  ;;  %v1974_v4 = vsel %vm8191_vm11, %v1957_v53, %v4852_v45  ;;  %v1973_v13 = vsel %vm8185_vm6, %v1956_v55, %v4851_v14  ;;  %vm8196_vm11 = vmmov %vm8185_vm6  ;;  %v7207_v3 = vld [vmem:[%s8016_s2] ss:$0 sm:$0xff]  ;;  %s4980_s2 = smov 96  }
 0x18f   :  { %v4862_v59 = vunpack.i.h.bf16 %v4860_v26  ;;  %v4861_v27 = vunpack.i.l.bf16 %v4860_v26  ;;  %v1991_v5 = vsel %vm8192_vm8, %v1974_v4, %v4857_v39  ;;  %vm8197_vm8 = vmmov %vm8176_vm7 }
 0x190   :  { %v1990_v1 = vsel %vm8176_vm7, %v1973_v13, %v4856_v11 }
 0x191   :  { %v2007_v61 = vsel %vm8179_vm4, %v1990_v1, %v4861_v27  ;;  %v2008_v51 = vsel %vm8193_vm5, %v1991_v5, %v4862_v59  ;;  %vm8198_vm5 = vmmov %vm8179_vm4 }
 0x194   :  { %v4870_v10 = vpop.permute.xlu0 %4869 }
 0x195   :  { %v4872_v28 = vunpack.i.h.bf16 %v4870_v10  ;;  %v4871_v6 = vunpack.i.l.bf16 %v4870_v10  ;;  %v4875_v0 = vpop.permute.xlu1 %4874 }
 0x196   :  { %v4877_v49 = vunpack.i.h.bf16 %v4875_v0  ;;  %v4876_v17 = vunpack.i.l.bf16 %v4875_v0 }
 0x199   :  { %v4865_v12 = vpop.permute.xlu2 %4864 }
 0x19a   :  { %v4867_v24 = vunpack.i.h.bf16 %v4865_v12  ;;  %v4866_v38 = vunpack.i.l.bf16 %v4865_v12 }
 0x19b   :  { %4192 = vmatmul.msk.bf16.gmra.mxu0 %vm2107_vm13, %v2085_v43 }
 0x19c   :  { %v2024_v29 = vsel %vm2013_vm14, %v2007_v61, %v4866_v38  ;;  %v2025_v8 = vsel %vm2013_vm14, %v2008_v51, %v4867_v24  ;;  %v4885_v15 = vpop.permute.xlu0 %4884 }
 0x19d   :  { %v2041_v58 = vsel %vm2030_vm15, %v2024_v29, %v4871_v6  ;;  %v2042_v2 = vsel %vm2030_vm15, %v2025_v8, %v4872_v28  ;;  %v4890_v19 = vpop.permute.xlu1 %4889  ;;  %v4886_v20 = vunpack.i.l.bf16 %v4885_v15  ;;  %v4887_v25 = vunpack.i.h.bf16 %v4885_v15 }
 0x19e   :  { %v2058_v33 = vsel %vm2047_vm12, %v2041_v58, %v4876_v17  ;;  %v2059_v63 = vsel %vm2047_vm12, %v2042_v2, %v4877_v49  ;;  %v4891_v36 = vunpack.i.l.bf16 %v4890_v19  ;;  %v4892_v9 = vunpack.i.h.bf16 %v4890_v19 }
 0x19f   :  { %v1958_v46 = vsel %vm1945_vm9, %v8195_v48, %v4886_v20  ;;  %v1959_v21 = vsel %vm1945_vm9, %v6597_v56, %v4887_v25 }
 0x1a0   :  { %v1975_v30 = vsel %vm8196_vm11, %v1958_v46, %v4891_v36  ;;  %v1976_v40 = vsel %vm8185_vm6, %v1959_v21, %v4892_v9  ;;  %vm8200_vm11 = vcmask 1044484   ;;  %vm2585_vm6 = vcmask 1043456  }
 0x1a2   :  { %v4880_v42 = vpop.permute.xlu2 %4879 }
 0x1a3   :  { %v4882_v41 = vunpack.i.h.bf16 %v4880_v42  ;;  %v4881_v18 = vunpack.i.l.bf16 %v4880_v42 }
 0x1a5   :  { %v2075_v47 = vsel %vm8182_vm3, %v2058_v33, %v4881_v18  ;;  %v2076_v22 = vsel %vm8194_vm10, %v2059_v63, %v4882_v41  ;;  %vm8199_vm10 = vmmov %vm8182_vm3 }
 0x1a6   :  { %v2086_v50 = vpack.c.bf16 %v2076_v22, %v2075_v47 }
 0x1a7   :  { %v4900_v32 = vpop.permute.xlu0 %4899 }
 0x1a8   :  { %v4901_v44 = vunpack.i.l.bf16 %v4900_v32  ;;  %v4902_v37 = vunpack.i.h.bf16 %v4900_v32 }
 0x1ab   :  { %4193 = vmatmul.msk.bf16.gmra.mxu0 %vm2107_vm13, %v2086_v50 }
 0x1af   :  { %v4905_v60 = vpop.permute.xlu1 %4904 }
 0x1b0   :  { %v4906_v23 = vunpack.i.l.bf16 %v4905_v60  ;;  %v4907_v45 = vunpack.i.h.bf16 %v4905_v60 }
 0x1b8   :  { %v4895_v35 = vpop.permute.xlu2 %4894 }
 0x1b9   :  { %v4897_v57 = vunpack.i.h.bf16 %v4895_v35  ;;  %v4896_v34 = vunpack.i.l.bf16 %v4895_v35 }
 0x1bb   :  { %v1992_v7 = vsel %vm8176_vm7, %v1975_v30, %v4896_v34  ;;  %v1993_v56 = vsel %vm8197_vm8, %v1976_v40, %v4897_v57  ;;  %vm8201_vm7 = vcmask 1040384   ;;  %vm8202_vm8 = vmmov %vm8200_vm11 }
 0x1bc   :  { %v2009_v52 = vsel %vm8179_vm4, %v1992_v7, %v4901_v44  ;;  %v2010_v14 = vsel %vm8198_vm5, %v1993_v56, %v4902_v37  ;;  %vm8203_vm4 = vmmov %vm8201_vm7  ;;  %vm8204_vm5 = vcmask 64512  }
 0x1bd   :  { %v2026_v53 = vsel %vm2013_vm14, %v2009_v52, %v4906_v23  ;;  %v2027_v39 = vsel %vm2013_vm14, %v2010_v14, %v4907_v45 }
 0x1c0   :  { %v4915_v26 = vpop.permute.xlu0 %4914  ;;  %v2145_v31 = vpop.f32.mrf.mxu0 }
 0x1c1   :  { %v4910_v62 = vpop.permute.xlu2 %4909  ;;  %v4916_v55 = vunpack.i.l.bf16 %v4915_v26  ;;  %v2146_v43 = vadd.f32 %v7207_v3, %v2145_v31  ;;  %v4917_v13 = vunpack.i.h.bf16 %v4915_v26 }
 0x1c2   :  { %v4912_v11 = vunpack.i.h.bf16 %v4910_v62  ;;  %v4911_v4 = vunpack.i.l.bf16 %v4910_v62 }
 0x1c3   :  { %v2185_v59 = vmax.f32 %v2146_v43, 0.0 }
 0x1c4   :  { %v2043_v27 = vsel %vm2030_vm15, %v2026_v53, %v4911_v4  ;;  %v2044_v1 = vsel %vm2030_vm15, %v2027_v39, %v4912_v11 }
 0x1c5   :  { %v2060_v5 = vsel %vm2047_vm12, %v2043_v27, %v4916_v55  ;;  %v2220_v12 = vrot.slane %v2185_v59, 2  ;;  %v2221_v10 = vrot.slane %v2185_v59, 4  ;;  %v2061_v24 = vsel %vm2047_vm12, %v2044_v1, %v4917_v13  ;;  %v4920_v38 = vpop.permute.xlu1 %4919 }
 0x1c6   :  { %v2222_v61 = vrot.slane %v2185_v59, 6  ;;  %v2266_v51 = vrot.slane %v2185_v59, 7  ;;  %v2301_v28 = vperm.slane %v2185_v59, 1  ;;  %v4922_v6 = vunpack.i.h.bf16 %v4920_v38 }
 0x1c7   :  { %v4921_v0 = vunpack.i.l.bf16 %v4920_v38  ;;  %v2302_v29 = vperm.slane %v2220_v12, 1  ;;  %v2303_v8 = vperm.slane %v2221_v10, 1  ;;  %v2445_v58 = vperm.slane %v2185_v59, 0 }
 0x1c8   :  { %v2147_v49 = vpop.f32.mrf.mxu0  ;;  %v2304_v17 = vperm.slane %v2222_v61, 1  ;;  %v2446_v2 = vperm.slane %v2220_v12, 0  ;;  %v2447_v33 = vperm.slane %v2221_v10, 0  ;;  %v2078_v42 = vsel %vm8199_vm10, %v2061_v24, %v4922_v6 }
 0x1c9   :  { %v2077_v63 = vsel %vm8182_vm3, %v2060_v5, %v4921_v0  ;;  %v2148_v41 = vadd.f32 %v7207_v3, %v2147_v49  ;;  %v2364_v18 = vsel %vm682_vm0, %v2302_v29, %v2301_v28  ;;  %v2448_v50 = vperm.slane %v2222_v61, 0  ;;  %vm8205_vm3 = vmmov %vm8204_vm5 }
 0x1ca   :  { %v2087_v47 = vpack.c.bf16 %v2078_v42, %v2077_v63  ;;  %v2365_v22 = vsel %vm684_vm2, %v2303_v8, %v2364_v18  ;;  %v2508_v15 = vsel %vm1201_vm1, %v2446_v2, %v2445_v58  ;;  %vm8206_vm10 = vcmask 97280  }
 0x1cb   :  { %v2186_v19 = vmax.f32 %v2148_v41, 0.0  ;;  %v2366_v20 = vsel %vm8200_vm11, %v2304_v17, %v2365_v22  ;;  %v2509_v25 = vsel %vm682_vm0, %v2447_v33, %v2508_v15  ;;  %vm8207_vm11 = vmmov %vm8206_vm10 }
 0x1cc   :  { %4194 = vmatmul.msk.bf16.gmra.mxu0 %vm2107_vm13, %v2087_v47  ;;  %v2426_v36 = vsel %vm8201_vm7, %v2266_v51, %v2366_v20  ;;  %v2510_v32 = vsel %vm684_vm2, %v2448_v50, %v2509_v25 }
 0x1cd   :  { %2719 = vrot.lane.b32.xlu0 %v2426_v36, %s4980_s2  ;;  %v2743_v48 = vrot.slane %v2426_v36, 1  ;;  %v2223_v46 = vrot.slane %v2186_v19, 2  ;;  %v2224_v9 = vrot.slane %v2186_v19, 4  ;;  %v2225_v21 = vrot.slane %v2186_v19, 6 }
 0x1ce   :  { %v2305_v35 = vperm.slane %v2186_v19, 1  ;;  %v7232_v30 = vsel %vm2585_vm6, %v2510_v32, %v2221_v10  ;;  %v2449_v60 = vperm.slane %v2186_v19, 0  ;;  %v2267_v45 = vrot.slane %v2186_v19, 7 }
 0x1cf   :  { %2751 = vrot.lane.b32.xlu1 %v2743_v48, %s4977_s26  ;;  %v2306_v34 = vperm.slane %v2223_v46, 1  ;;  %v2307_v44 = vperm.slane %v2224_v9, 1  ;;  %v2450_v40 = vperm.slane %v2223_v46, 0  ;;  %v2451_v37 = vperm.slane %v2224_v9, 0  ;;  %v4930_v62 = vpop.permute.xlu0 %4929 }
 0x1d0   :  { %v4925_v57 = vpop.permute.xlu2 %4924  ;;  %v2308_v7 = vperm.slane %v2225_v21, 1  ;;  %v2452_v56 = vperm.slane %v2225_v21, 0  ;;  %v4932_v4 = vunpack.i.h.bf16 %v4930_v62  ;;  %v4931_v13 = vunpack.i.l.bf16 %v4930_v62 }
 0x1d1   :  { %v2367_v23 = vsel %vm682_vm0, %v2306_v34, %v2305_v35  ;;  %v2511_v52 = vsel %vm1201_vm1, %v2450_v40, %v2449_v60  ;;  %v4927_v31 = vunpack.i.h.bf16 %v4925_v57  ;;  %v4926_v53 = vunpack.i.l.bf16 %v4925_v57 }
 0x1d2   :  { %v2368_v14 = vsel %vm684_vm2, %v2307_v44, %v2367_v23  ;;  %v2512_v26 = vsel %vm682_vm0, %v2451_v37, %v2511_v52 }
 0x1d3   :  { %v2369_v55 = vsel %vm8202_vm8, %v2308_v7, %v2368_v14  ;;  %v2513_v43 = vsel %vm684_vm2, %v2452_v56, %v2512_v26  ;;  %v1961_v1 = vsel %vm1945_vm9, %v6921_v54, %v4927_v31  ;;  %v1960_v5 = vsel %vm1945_vm9, %v6844_v16, %v4926_v53 }
 0x1d4   :  { %v7242_v39 = vsel %vm8203_vm4, %v2267_v45, %v2369_v55  ;;  %v2588_v27 = vsel %vm2585_vm6, %v2513_v43, %v2224_v9  ;;  %v1977_v38 = vsel %vm8204_vm5, %v1960_v5, %v4931_v13  ;;  %v1978_v61 = vsel %vm8205_vm3, %v1961_v1, %v4932_v4  ;;  %vm8216_vm3 = vmmov %vm8203_vm4 }
 0x1d5   :  { %2775 = vrot.lane.b32.xlu2 %v7242_v39, %s4981_s28  ;;  %v2680_v11 = vrot.slane %v7242_v39, 1  ;;  %v4935_v59 = vpop.permute.xlu1 %4934  ;;  %vm8208_vm9 = vcmask 130048   ;;  %vm8210_vm8 = vcmask 261120  }
 0x1d6   :  { %v4937_v10 = vunpack.i.h.bf16 %v4935_v59  ;;  %v4936_v24 = vunpack.i.l.bf16 %v4935_v59  ;;  %vm8209_vm7 = vmmov %vm8208_vm9 }
 0x1d7   :  { %2909 = vst [vmem:[#allocation1 + $0x10] ss:$2 sm:$0xff] %v2680_v11  ;;  %2689 = vrot.lane.b32.xlu0 %v2680_v11, %s4981_s28  ;;  %2649 = vrot.lane.b32.xlu1 %v2588_v27, %s4977_s26 }
 0x1d8   :  { %v1994_v6 = vsel %vm8206_vm10, %v1977_v38, %v4936_v24  ;;  %v1995_v54 = vsel %vm8207_vm11, %v1978_v61, %v4937_v10  ;;  %vm8218_vm11 = vmmov %vm8216_vm3 }
 0x1da   :  { %v4940_v12 = vpop.permute.xlu2 %4939 }
 0x1db   :  { %v4942_v51 = vunpack.i.h.bf16 %v4940_v12  ;;  %v4941_v28 = vunpack.i.l.bf16 %v4940_v12 }
 0x1dd   :  { %v4945_v0 = vpop.permute.xlu0 %4944  ;;  %v4950_v8 = vpop.permute.xlu1 %4949  ;;  %v2011_v49 = vsel %vm8208_vm9, %v1994_v6, %v4941_v28  ;;  %v2012_v17 = vsel %vm8209_vm7, %v1995_v54, %v4942_v51  ;;  %vm8220_vm7 = vmmov %vm8216_vm3 }
 0x1de   :  { %v4947_v16 = vunpack.i.h.bf16 %v4945_v0  ;;  %v4946_v29 = vunpack.i.l.bf16 %v4945_v0  ;;  %v4952_v58 = vunpack.i.h.bf16 %v4950_v8  ;;  %v4951_v2 = vunpack.i.l.bf16 %v4950_v8 }
 0x1df   :  { %2799 = vrot.lane.b32.xlu1 %v2588_v27, %s4980_s2 }
 0x1e0   :  { %v2028_v63 = vsel %vm2013_vm14, %v2011_v49, %v4946_v29  ;;  %v2029_v42 = vsel %vm2013_vm14, %v2012_v17, %v4947_v16  ;;  %vm8211_vm14 = vmmov %vm8210_vm8 }
 0x1e1   :  { %v2045_v22 = vsel %vm2030_vm15, %v2028_v63, %v4951_v2  ;;  %v2046_v50 = vsel %vm2030_vm15, %v2029_v42, %v4952_v58 }
 0x1e2   :  { %v4955_v33 = vpop.permute.xlu2 %4954  ;;  %v2150_v47 = vpop.f32.mrf.mxu0 }
 0x1e3   :  { %v4957_v41 = vunpack.i.h.bf16 %v4955_v33  ;;  %v4956_v18 = vunpack.i.l.bf16 %v4955_v33  ;;  %v2151_v15 = vadd.f32 %v7207_v3, %v2150_v47 }
 0x1e5   :  { %v4960_v19 = vpop.permute.xlu0 %4959  ;;  %v2187_v36 = vmax.f32 %v2151_v15, 0.0  ;;  %v2062_v32 = vsel %vm2047_vm12, %v2045_v22, %v4956_v18  ;;  %v2063_v48 = vsel %vm2047_vm12, %v2046_v50, %v4957_v41  ;;  %vm8212_vm12 = vcmask 1044484  }
 0x1e6   :  { %v4962_v20 = vunpack.i.h.bf16 %v4960_v19  ;;  %v4961_v25 = vunpack.i.l.bf16 %v4960_v19  ;;  %vm8214_vm15 = vmmov %vm8212_vm12 }
 0x1e7   :  { %v2226_v21 = vrot.slane %v2187_v36, 2  ;;  %v2227_v35 = vrot.slane %v2187_v36, 4  ;;  %v2228_v34 = vrot.slane %v2187_v36, 6  ;;  %v2309_v44 = vperm.slane %v2187_v36, 1  ;;  %vm8215_vm5 = vmmov %vm8212_vm12 }
 0x1e8   :  { %v2079_v46 = vsel %vm8210_vm8, %v2062_v32, %v4961_v25  ;;  %v2080_v9 = vsel %vm8211_vm14, %v2063_v48, %v4962_v20  ;;  %v2453_v37 = vperm.slane %v2187_v36, 0  ;;  %v2268_v53 = vrot.slane %v2187_v36, 7  ;;  %vm8217_vm10 = vmmov %vm8215_vm5 }
 0x1e9   :  { %v2088_v57 = vpack.c.bf16 %v2080_v9, %v2079_v46  ;;  %v2310_v60 = vperm.slane %v2226_v21, 1  ;;  %v2311_v40 = vperm.slane %v2227_v35, 1  ;;  %v2454_v7 = vperm.slane %v2226_v21, 0  ;;  %vm8219_vm9 = vmmov %vm8215_vm5 }
 0x1ea   :  { %v2152_v23 = vpop.f32.mrf.mxu0  ;;  %v2312_v56 = vperm.slane %v2228_v34, 1  ;;  %v2455_v52 = vperm.slane %v2227_v35, 0  ;;  %v2456_v26 = vperm.slane %v2228_v34, 0  ;;  %vm8221_vm8 = vmmov %vm8215_vm5 }
 0x1eb   :  { %4195 = vmatmul.msk.bf16.gmra.mxu0 %vm2107_vm13, %v2088_v57  ;;  %v2153_v45 = vadd.f32 %v7207_v3, %v2152_v23  ;;  %v2370_v14 = vsel %vm682_vm0, %v2310_v60, %v2309_v44  ;;  %v2514_v31 = vsel %vm1201_vm1, %v2454_v7, %v2453_v37  ;;  %vm8213_vm13 = vmmov %vm8203_vm4 }
 0x1ec   :  { %v2371_v62 = vsel %vm684_vm2, %v2311_v40, %v2370_v14  ;;  %v2515_v55 = vsel %vm682_vm0, %v2455_v52, %v2514_v31  ;;  %vm8222_vm14 = vmmov %vm8216_vm3 }
 0x1ed   :  { %v2188_v43 = vmax.f32 %v2153_v45, 0.0  ;;  %v2372_v11 = vsel %vm8212_vm12, %v2312_v56, %v2371_v62  ;;  %v2516_v4 = vsel %vm684_vm2, %v2456_v26, %v2515_v55  ;;  %vm8223_vm12 = vmmov %vm8215_vm5 }
 0x1ee   :  { %v2428_v13 = vsel %vm8213_vm13, %v2268_v53, %v2372_v11  ;;  %v7280_v59 = vsel %vm2585_vm6, %v2516_v4, %v2227_v35  ;;  %v4563_v11 = vld [vmem:[%s8017_s3 + $0x88] sm:$0xff]  ;;  %vm8224_vm13 = vmmov %vm8216_vm3 }
 0x1ef   :  { %v2744_v27 = vrot.slane %v2428_v13, 1  ;;  %v2229_v1 = vrot.slane %v2188_v43, 2  ;;  %v2230_v5 = vrot.slane %v2188_v43, 4  ;;  %v2231_v12 = vrot.slane %v2188_v43, 6  ;;  %2721 = vrot.lane.b32.xlu1 %v2428_v13, %s4980_s2  ;;  %3119 = vmatpush.bf16.msra.mxu3 %v4563_v11 }
 0x1f0   :  { %v2313_v10 = vperm.slane %v2188_v43, 1  ;;  %v2457_v61 = vperm.slane %v2188_v43, 0  ;;  %v2269_v8 = vrot.slane %v2188_v43, 7 }
 0x1f1   :  { %2753 = vrot.lane.b32.xlu2 %v2744_v27, %s4977_s26  ;;  %v2314_v24 = vperm.slane %v2229_v1, 1  ;;  %v2315_v38 = vperm.slane %v2230_v5, 1  ;;  %v2458_v51 = vperm.slane %v2229_v1, 0  ;;  %v2459_v28 = vperm.slane %v2230_v5, 0 }
 0x1f2   :  { %v2316_v6 = vperm.slane %v2231_v12, 1  ;;  %v2460_v0 = vperm.slane %v2231_v12, 0 }
 0x1f3   :  { %v2373_v54 = vsel %vm682_vm0, %v2314_v24, %v2313_v10  ;;  %v2517_v16 = vsel %vm1201_vm1, %v2458_v51, %v2457_v61  ;;  %v4562_v51 = vld [vmem:[%s8017_s3 + $0x80] sm:$0xff] }
 0x1f4   :  { %v2374_v49 = vsel %vm684_vm2, %v2315_v38, %v2373_v54  ;;  %v2518_v17 = vsel %vm682_vm0, %v2459_v28, %v2517_v16  ;;  %3120 = vmatpush.bf16.msra.mxu3 %v4562_v51 }
 0x1f5   :  { %v2375_v2 = vsel %vm8214_vm15, %v2316_v6, %v2374_v49  ;;  %v2519_v33 = vsel %vm684_vm2, %v2460_v0, %v2518_v17  ;;  %vm8225_vm15 = vcmask 261120  }
 0x1f6   :  { %v7292_v63 = vsel %vm8203_vm4, %v2269_v8, %v2375_v2  ;;  %v2590_v18 = vsel %vm2585_vm6, %v2519_v33, %v2230_v5  ;;  %vm8226_vm4 = vmmov %vm8215_vm5 }
 0x1f7   :  { %2777 = vrot.lane.b32.xlu0 %v7292_v63, %s4981_s28  ;;  %v2681_v41 = vrot.slane %v7292_v63, 1 }
 0x1f8   :  { %v2155_v29 = vpop.f32.mrf.mxu0 }
 0x1f9   :  { %v2156_v58 = vadd.f32 %v7207_v3, %v2155_v29  ;;  %2651 = vrot.lane.b32.xlu2 %v2590_v18, %s4977_s26  ;;  %2911 = vst [vmem:[#allocation1 + $0x11] ss:$2 sm:$0xff] %v2681_v41  ;;  %2691 = vrot.lane.b32.xlu1 %v2681_v41, %s4981_s28 }
 0x1fb   :  { %v2189_v42 = vmax.f32 %v2156_v58, 0.0 }
 0x1fd   :  { %v2232_v47 = vrot.slane %v2189_v42, 2  ;;  %v2233_v22 = vrot.slane %v2189_v42, 4  ;;  %v2234_v50 = vrot.slane %v2189_v42, 6  ;;  %v2317_v15 = vperm.slane %v2189_v42, 1 }
 0x1fe   :  { %v2461_v25 = vperm.slane %v2189_v42, 0  ;;  %v2270_v34 = vrot.slane %v2189_v42, 7 }
 0x1ff   :  { %v2318_v19 = vperm.slane %v2232_v47, 1  ;;  %v2319_v20 = vperm.slane %v2233_v22, 1  ;;  %v2462_v36 = vperm.slane %v2232_v47, 0  ;;  %v2320_v48 = vperm.slane %v2234_v50, 1 }
 0x200   :  { %v2157_v32 = vpop.f32.mrf.mxu0  ;;  %v2463_v46 = vperm.slane %v2233_v22, 0  ;;  %v2464_v35 = vperm.slane %v2234_v50, 0 }
 0x201   :  { %v2158_v9 = vadd.f32 %v7207_v3, %v2157_v32  ;;  %v2376_v21 = vsel %vm682_vm0, %v2318_v19, %v2317_v15  ;;  %v2520_v57 = vsel %vm1201_vm1, %v2462_v36, %v2461_v25  ;;  %2801 = vrot.lane.b32.xlu2 %v2590_v18, %s4980_s2 }
 0x202   :  { %v2377_v44 = vsel %vm684_vm2, %v2319_v20, %v2376_v21  ;;  %v2521_v60 = vsel %vm682_vm0, %v2463_v46, %v2520_v57 }
 0x203   :  { %v2190_v40 = vmax.f32 %v2158_v9, 0.0  ;;  %v2378_v37 = vsel %vm8215_vm5, %v2320_v48, %v2377_v44  ;;  %v2522_v7 = vsel %vm684_vm2, %v2464_v35, %v2521_v60  ;;  %vm8227_vm5 = vmmov %vm8216_vm3 }
 0x204   :  { %v2430_v23 = vsel %vm8216_vm3, %v2270_v34, %v2378_v37  ;;  %v7309_v56 = vsel %vm2585_vm6, %v2522_v7, %v2233_v22  ;;  %vm8228_vm3 = vmmov %vm8226_vm4 }
 0x205   :  { %v2745_v52 = vrot.slane %v2430_v23, 1  ;;  %v2235_v45 = vrot.slane %v2190_v40, 2  ;;  %v2236_v14 = vrot.slane %v2190_v40, 4  ;;  %v2237_v26 = vrot.slane %v2190_v40, 6 }
 0x206   :  { %v2321_v31 = vperm.slane %v2190_v40, 1  ;;  %v2465_v55 = vperm.slane %v2190_v40, 0  ;;  %v2271_v24 = vrot.slane %v2190_v40, 7 }
 0x207   :  { %2755 = vrot.lane.b32.xlu0 %v2745_v52, %s4977_s26  ;;  %v2322_v53 = vperm.slane %v2235_v45, 1  ;;  %v2323_v62 = vperm.slane %v2236_v14, 1  ;;  %v2466_v43 = vperm.slane %v2235_v45, 0  ;;  %v2324_v4 = vperm.slane %v2237_v26, 1 }
 0x208   :  { %v2160_v13 = vpop.f32.mrf.mxu0  ;;  %v2467_v27 = vperm.slane %v2236_v14, 0  ;;  %v2468_v12 = vperm.slane %v2237_v26, 0 }
 0x209   :  { %v2379_v1 = vsel %vm682_vm0, %v2322_v53, %v2321_v31  ;;  %v2161_v5 = vadd.f32 %v7207_v3, %v2160_v13  ;;  %v2523_v10 = vsel %vm1201_vm1, %v2466_v43, %v2465_v55  ;;  %2723 = vrot.lane.b32.xlu2 %v2430_v23, %s4980_s2 }
 0x20a   :  { %v2380_v38 = vsel %vm684_vm2, %v2323_v62, %v2379_v1  ;;  %v2524_v61 = vsel %vm682_vm0, %v2467_v27, %v2523_v10 }
 0x20b   :  { %v2381_v28 = vsel %vm8217_vm10, %v2324_v4, %v2380_v38  ;;  %v2191_v6 = vmax.f32 %v2161_v5, 0.0  ;;  %v2525_v54 = vsel %vm684_vm2, %v2468_v12, %v2524_v61  ;;  %vm8229_vm10 = vmmov %vm8227_vm5 }
 0x20c   :  { %v7327_v0 = vsel %vm8218_vm11, %v2271_v24, %v2381_v28  ;;  %v2592_v17 = vsel %vm2585_vm6, %v2525_v54, %v2236_v14  ;;  %vm8230_vm11 = vmmov %vm8228_vm3 }
 0x20d   :  { %2779 = vrot.lane.b32.xlu1 %v7327_v0, %s4981_s28  ;;  %v2682_v16 = vrot.slane %v7327_v0, 1  ;;  %v2238_v29 = vrot.slane %v2191_v6, 2  ;;  %v2239_v8 = vrot.slane %v2191_v6, 4  ;;  %v2240_v49 = vrot.slane %v2191_v6, 6 }
 0x20e   :  { %v2325_v58 = vperm.slane %v2191_v6, 1  ;;  %v2469_v42 = vperm.slane %v2191_v6, 0  ;;  %v2272_v25 = vrot.slane %v2191_v6, 7 }
 0x20f   :  { %2653 = vrot.lane.b32.xlu0 %v2592_v17, %s4977_s26  ;;  %2917 = vst [vmem:[#allocation1 + $0x30] ss:$2 sm:$0xff] %v2682_v16  ;;  %v2326_v2 = vperm.slane %v2238_v29, 1  ;;  %v2327_v33 = vperm.slane %v2239_v8, 1  ;;  %v2470_v41 = vperm.slane %v2238_v29, 0  ;;  %v2328_v47 = vperm.slane %v2240_v49, 1 }
 0x210   :  { %v2162_v18 = vpop.f32.mrf.mxu0  ;;  %v2471_v22 = vperm.slane %v2239_v8, 0  ;;  %v2472_v19 = vperm.slane %v2240_v49, 0 }
 0x211   :  { %v2163_v50 = vadd.f32 %v7207_v3, %v2162_v18  ;;  %v2382_v15 = vsel %vm682_vm0, %v2326_v2, %v2325_v58  ;;  %v2526_v20 = vsel %vm1201_vm1, %v2470_v41, %v2469_v42  ;;  %2693 = vrot.lane.b32.xlu2 %v2682_v16, %s4981_s28 }
 0x212   :  { %v2383_v36 = vsel %vm684_vm2, %v2327_v33, %v2382_v15  ;;  %v2527_v32 = vsel %vm682_vm0, %v2471_v22, %v2526_v20 }
 0x213   :  { %v2192_v48 = vmax.f32 %v2163_v50, 0.0  ;;  %v2384_v46 = vsel %vm8219_vm9, %v2328_v47, %v2383_v36  ;;  %v2528_v9 = vsel %vm684_vm2, %v2472_v19, %v2527_v32  ;;  %vm8231_vm9 = vmmov %vm8227_vm5 }
 0x214   :  { %v2432_v21 = vsel %vm8220_vm7, %v2272_v25, %v2384_v46  ;;  %v7344_v35 = vsel %vm2585_vm6, %v2528_v9, %v2239_v8  ;;  %vm2831_vm7 = vcmask 523264  }
 0x215   :  { %v2746_v57 = vrot.slane %v2432_v21, 1  ;;  %v2217_v34 = vrot.slane %v2192_v48, 2  ;;  %v2218_v44 = vrot.slane %v2192_v48, 4  ;;  %v2219_v60 = vrot.slane %v2192_v48, 6 }
 0x216   :  { %v2297_v40 = vperm.slane %v2192_v48, 1  ;;  %v2441_v23 = vperm.slane %v2192_v48, 0  ;;  %v2265_v43 = vrot.slane %v2192_v48, 7  ;;  %v2922_v48 = vld.sshfl [vmem:[#allocation1 + $0x10] sm:$0xff pattern:$0x75316420] }
 0x217   :  { %2803 = vrot.lane.b32.xlu0 %v2592_v17, %s4980_s2  ;;  %2757 = vrot.lane.b32.xlu1 %v2746_v57, %s4977_s26  ;;  %v2298_v37 = vperm.slane %v2217_v34, 1  ;;  %v2299_v7 = vperm.slane %v2218_v44, 1  ;;  %v2442_v52 = vperm.slane %v2217_v34, 0  ;;  %v2300_v45 = vperm.slane %v2219_v60, 1 }
 0x218   :  { %v2165_v14 = vpop.f32.mrf.mxu0  ;;  %v2443_v26 = vperm.slane %v2218_v44, 0  ;;  %v2444_v62 = vperm.slane %v2219_v60, 0 }
 0x219   :  { %v2361_v31 = vsel %vm682_vm0, %v2298_v37, %v2297_v40  ;;  %v2166_v53 = vadd.f32 %v7207_v3, %v2165_v14  ;;  %v2505_v55 = vsel %vm1201_vm1, %v2442_v52, %v2441_v23 }
 0x21a   :  { %v2362_v11 = vsel %vm684_vm2, %v2299_v7, %v2361_v31  ;;  %v2506_v4 = vsel %vm682_vm0, %v2443_v26, %v2505_v55 }
 0x21b   :  { %v2363_v13 = vsel %vm8221_vm8, %v2300_v45, %v2362_v11  ;;  %v2193_v27 = vmax.f32 %v2166_v53, 0.0  ;;  %v2507_v1 = vsel %vm684_vm2, %v2444_v62, %v2506_v4  ;;  %vm8232_vm8 = vmmov %vm8225_vm15 }
 0x21c   :  { %v7357_v5 = vsel %vm8222_vm14, %v2265_v43, %v2363_v13  ;;  %v2586_v61 = vsel %vm2585_vm6, %v2507_v1, %v2218_v44  ;;  %vm8233_vm14 = vmmov %vm8228_vm3 }
 0x21d   :  { %2781 = vrot.lane.b32.xlu2 %v7357_v5, %s4981_s28  ;;  %v2679_v12 = vrot.slane %v7357_v5, 1  ;;  %v2244_v10 = vrot.slane %v2193_v27, 2  ;;  %v2245_v24 = vrot.slane %v2193_v27, 4  ;;  %v2246_v38 = vrot.slane %v2193_v27, 6 }
 0x21e   :  { %v2333_v51 = vperm.slane %v2193_v27, 1  ;;  %v2477_v54 = vperm.slane %v2193_v27, 0  ;;  %v2274_v42 = vrot.slane %v2193_v27, 7 }
 0x21f   :  { %2725 = vrot.lane.b32.xlu0 %v2432_v21, %s4980_s2  ;;  %2805 = vrot.lane.b32.xlu1 %v2586_v61, %s4980_s2  ;;  %2919 = vst [vmem:[#allocation1 + $0x31] ss:$2 sm:$0xff] %v2679_v12  ;;  %v2334_v28 = vperm.slane %v2244_v10, 1  ;;  %v2335_v6 = vperm.slane %v2245_v24, 1  ;;  %v2478_v16 = vperm.slane %v2244_v10, 0  ;;  %v2336_v8 = vperm.slane %v2246_v38, 1 }
 0x220   :  { %v2167_v29 = vpop.f32.mrf.mxu0  ;;  %v2479_v49 = vperm.slane %v2245_v24, 0  ;;  %v2480_v2 = vperm.slane %v2246_v38, 0 }
 0x221   :  { %v2168_v17 = vadd.f32 %v7207_v3, %v2167_v29  ;;  %v2388_v58 = vsel %vm682_vm0, %v2334_v28, %v2333_v51  ;;  %v2532_v33 = vsel %vm1201_vm1, %v2478_v16, %v2477_v54 }
 0x222   :  { %v2389_v41 = vsel %vm684_vm2, %v2335_v6, %v2388_v58  ;;  %v2533_v18 = vsel %vm682_vm0, %v2479_v49, %v2532_v33 }
 0x223   :  { %v2194_v47 = vmax.f32 %v2168_v17, 0.0  ;;  %v2390_v22 = vsel %vm8223_vm12, %v2336_v8, %v2389_v41  ;;  %v2534_v50 = vsel %vm684_vm2, %v2480_v2, %v2533_v18  ;;  %vm8234_vm12 = vmmov %vm8227_vm5 }
 0x224   :  { %v2434_v15 = vsel %vm8224_vm13, %v2274_v42, %v2390_v22  ;;  %v7374_v19 = vsel %vm2585_vm6, %v2534_v50, %v2245_v24  ;;  %vm8235_vm13 = vmmov %vm8228_vm3 }
 0x225   :  { %2687 = vrot.lane.b32.xlu2 %v2679_v12, %s4981_s28  ;;  %v2747_v20 = vrot.slane %v2434_v15, 1  ;;  %v2247_v25 = vrot.slane %v2194_v47, 2  ;;  %v2248_v36 = vrot.slane %v2194_v47, 4  ;;  %v2249_v32 = vrot.slane %v2194_v47, 6 }
 0x226   :  { %v2925_v46 = vld.sshfl [vmem:[#allocation1 + $0x30] sm:$0xff pattern:$0x75316420]  ;;  %v2337_v21 = vperm.slane %v2194_v47, 1  ;;  %v2481_v44 = vperm.slane %v2194_v47, 0  ;;  %v2275_v7 = vrot.slane %v2194_v47, 7 }
 0x227   :  { %2647 = vrot.lane.b32.xlu0 %v2586_v61, %s4977_s26  ;;  %v2954_v9 = vpack.c.bf16 %v2925_v46, %v2922_v48  ;;  %2759 = vrot.lane.b32.xlu1 %v2747_v20, %s4977_s26  ;;  %v2338_v57 = vperm.slane %v2247_v25, 1  ;;  %v2339_v34 = vperm.slane %v2248_v36, 1  ;;  %v2482_v60 = vperm.slane %v2247_v25, 0 }
 0x228   :  { %v2483_v40 = vperm.slane %v2248_v36, 0  ;;  %v2170_v37 = vpop.f32.mrf.mxu0  ;;  %v2340_v23 = vperm.slane %v2249_v32, 1  ;;  %v2484_v26 = vperm.slane %v2249_v32, 0 }
 0x229   :  { %4268 = vmatmul.msk.bf16.vlgmr.msra.gmra.mxu3 %vm8225_vm15, %v2954_v9  ;;  %v2391_v52 = vsel %vm682_vm0, %v2338_v57, %v2337_v21  ;;  %v2171_v45 = vadd.f32 %v7207_v3, %v2170_v37  ;;  %v2535_v31 = vsel %vm1201_vm1, %v2482_v60, %v2481_v44  ;;  %vm8236_vm15 = vmmov %vm8227_vm5 }
 0x22a   :  { %v2392_v14 = vsel %vm684_vm2, %v2339_v34, %v2391_v52  ;;  %v2536_v62 = vsel %vm682_vm0, %v2483_v40, %v2535_v31 }
 0x22b   :  { %v2393_v53 = vsel %vm8226_vm4, %v2340_v23, %v2392_v14  ;;  %v2195_v55 = vmax.f32 %v2171_v45, 0.0  ;;  %v2537_v11 = vsel %vm684_vm2, %v2484_v26, %v2536_v62  ;;  %vm8237_vm4 = vmmov %vm8232_vm8 }
 0x22c   :  { %v7387_v43 = vsel %vm8227_vm5, %v2275_v7, %v2393_v53  ;;  %v2596_v13 = vsel %vm2585_vm6, %v2537_v11, %v2248_v36  ;;  %vm8238_vm5 = vmmov %vm8237_vm4 }
 0x22d   :  { %2783 = vrot.lane.b32.xlu2 %v7387_v43, %s4981_s28  ;;  %v2684_v4 = vrot.slane %v7387_v43, 1  ;;  %v2250_v27 = vrot.slane %v2195_v55, 2  ;;  %v2251_v1 = vrot.slane %v2195_v55, 4  ;;  %v2252_v12 = vrot.slane %v2195_v55, 6 }
 0x22e   :  { %v2341_v10 = vperm.slane %v2195_v55, 1  ;;  %v2485_v61 = vperm.slane %v2195_v55, 0  ;;  %v2276_v17 = vrot.slane %v2195_v55, 7 }
 0x22f   :  { %2727 = vrot.lane.b32.xlu0 %v2434_v15, %s4980_s2  ;;  %2928 = vst [vmem:[#allocation1 + $0x10] ss:$2 sm:$0xff] %v2684_v4  ;;  %2657 = vrot.lane.b32.xlu1 %v2596_v13, %s4977_s26  ;;  %v2342_v24 = vperm.slane %v2250_v27, 1  ;;  %v2343_v38 = vperm.slane %v2251_v1, 1  ;;  %v2486_v51 = vperm.slane %v2250_v27, 0  ;;  %v2344_v6 = vperm.slane %v2252_v12, 1  ;;  %v2776_v31 = vpop.permute.xlu2 %2775 }
 0x230   :  { %v2172_v28 = vpop.f32.mrf.mxu0  ;;  %v2487_v54 = vperm.slane %v2251_v1, 0  ;;  %v2488_v8 = vperm.slane %v2252_v12, 0 }
 0x231   :  { %v2173_v16 = vadd.f32 %v7207_v3, %v2172_v28  ;;  %v2394_v29 = vsel %vm682_vm0, %v2342_v24, %v2341_v10  ;;  %v2538_v49 = vsel %vm1201_vm1, %v2486_v51, %v2485_v61 }
 0x232   :  { %v2395_v58 = vsel %vm684_vm2, %v2343_v38, %v2394_v29  ;;  %v2539_v2 = vsel %vm682_vm0, %v2487_v54, %v2538_v49 }
 0x233   :  { %v2196_v33 = vmax.f32 %v2173_v16, 0.0  ;;  %v2396_v42 = vsel %vm8228_vm3, %v2344_v6, %v2395_v58  ;;  %v2540_v41 = vsel %vm684_vm2, %v2488_v8, %v2539_v2  ;;  %vm2840_vm3 = vcmask 785408  }
 0x234   :  { %v7404_v18 = vsel %vm8229_vm10, %v2276_v17, %v2396_v42  ;;  %v7407_v47 = vsel %vm2585_vm6, %v2540_v41, %v2251_v1  ;;  %vm8239_vm10 = vmmov %vm8230_vm11 }
 0x235   :  { %v2748_v22 = vrot.slane %v7404_v18, 1  ;;  %v2253_v50 = vrot.slane %v2196_v33, 2  ;;  %v2254_v15 = vrot.slane %v2196_v33, 4  ;;  %v2255_v20 = vrot.slane %v2196_v33, 6 }
 0x236   :  { %v2345_v25 = vperm.slane %v2196_v33, 1  ;;  %v2489_v48 = vperm.slane %v2196_v33, 0  ;;  %v2277_v60 = vrot.slane %v2196_v33, 7 }
 0x237   :  { %2697 = vrot.lane.b32.xlu0 %v2684_v4, %s4981_s28  ;;  %2807 = vrot.lane.b32.xlu1 %v2596_v13, %s4980_s2  ;;  %v2346_v36 = vperm.slane %v2253_v50, 1  ;;  %v2347_v32 = vperm.slane %v2254_v15, 1  ;;  %v2490_v46 = vperm.slane %v2253_v50, 0  ;;  %v2491_v9 = vperm.slane %v2254_v15, 0 }
 0x238   :  { %2761 = vrot.lane.b32.xlu2 %v2748_v22, %s4977_s26  ;;  %v2348_v21 = vperm.slane %v2255_v20, 1  ;;  %v2492_v34 = vperm.slane %v2255_v20, 0 }
 0x239   :  { %v2397_v57 = vsel %vm682_vm0, %v2346_v36, %v2345_v25  ;;  %v2541_v44 = vsel %vm1201_vm1, %v2490_v46, %v2489_v48 }
 0x23a   :  { %v2398_v40 = vsel %vm684_vm2, %v2347_v32, %v2397_v57  ;;  %v2542_v37 = vsel %vm682_vm0, %v2491_v9, %v2541_v44 }
 0x23b   :  { %v2399_v7 = vsel %vm8230_vm11, %v2348_v21, %v2398_v40  ;;  %v2543_v23 = vsel %vm684_vm2, %v2492_v34, %v2542_v37  ;;  %vm8240_vm11 = vmmov %vm8231_vm9 }
 0x23c   :  { %v7420_v52 = vsel %vm8231_vm9, %v2277_v60, %v2399_v7  ;;  %v2598_v14 = vsel %vm2585_vm6, %v2543_v23, %v2254_v15  ;;  %vm8241_vm9 = vmmov %vm8239_vm10 }
 0x23d   :  { %v2685_v45 = vrot.slane %v7420_v52, 1 }
 0x23f   :  { %2785 = vrot.lane.b32.xlu0 %v7420_v52, %s4981_s28  ;;  %2929 = vst [vmem:[#allocation1 + $0x11] ss:$2 sm:$0xff] %v2685_v45  ;;  %2699 = vrot.lane.b32.xlu1 %v2685_v45, %s4981_s28  ;;  %v7450_v34 = vpop.permute.xlu0 %2719 }
 0x240   :  { %2659 = vrot.lane.b32.xlu2 %v2598_v14, %s4977_s26 }
 0x241   :  { %v2752_v26 = vpop.permute.xlu1 %2751 }
 0x242   :  { %v2849_v53 = vsel %vm8232_vm8, %v7232_v30, %v2752_v26  ;;  %vm8242_vm8 = vmmov %vm8240_vm11 }
 0x243   :  { %v7431_v62 = vsel %vm2831_vm7, %v2849_v53, %v2776_v31 }
 0x248   :  { %2809 = vrot.lane.b32.xlu2 %v2598_v14, %s4980_s2 }
 0x249   :  { %v2175_v55 = vpop.f32.mrf.mxu0  ;;  %v2650_v36 = vpop.permute.xlu1 %2649 }
 0x24a   :  { %v2176_v11 = vadd.f32 %v7207_v3, %v2175_v55 }
 0x24b   :  { %v2754_v42 = vpop.permute.xlu2 %2753 }
 0x24c   :  { %v2197_v4 = vmax.f32 %v2176_v11, 0.0 }
 0x24e   :  { %v2256_v13 = vrot.slane %v2197_v4, 2  ;;  %v2257_v27 = vrot.slane %v2197_v4, 4  ;;  %v2258_v1 = vrot.slane %v2197_v4, 6  ;;  %v2349_v12 = vperm.slane %v2197_v4, 1 }
 0x24f   :  { %v2493_v38 = vperm.slane %v2197_v4, 0  ;;  %v2278_v8 = vrot.slane %v2197_v4, 7 }
 0x250   :  { %v2350_v10 = vperm.slane %v2256_v13, 1  ;;  %v2351_v24 = vperm.slane %v2257_v27, 1  ;;  %v2494_v61 = vperm.slane %v2256_v13, 0  ;;  %v2352_v28 = vperm.slane %v2258_v1, 1  ;;  %v2690_v13 = vpop.permute.xlu0 %2689 }
 0x251   :  { %v2177_v51 = vpop.f32.mrf.mxu0  ;;  %v2495_v30 = vperm.slane %v2257_v27, 0  ;;  %v2496_v16 = vperm.slane %v2258_v1, 0  ;;  %v7469_v4 = vpop.permute.xlu1 %2799  ;;  %v2824_v1 = vsel %vm8237_vm4, %v7242_v39, %v2650_v36 }
 0x252   :  { %v2178_v6 = vadd.f32 %v7207_v3, %v2177_v51  ;;  %v2400_v54 = vsel %vm682_vm0, %v2350_v10, %v2349_v12  ;;  %v2544_v29 = vsel %vm1201_vm1, %v2494_v61, %v2493_v38  ;;  %v4561_v38 = vld [vmem:[%s8017_s3 + $0x78] sm:$0xff]  ;;  %v2850_v61 = vsel %vm8238_vm5, %v7280_v59, %v2754_v42  ;;  %v4552_v59 = vld [vmem:[%s8017_s3 + $0x30] sm:$0xff] }
 0x253   :  { %v2401_v49 = vsel %vm684_vm2, %v2351_v24, %v2400_v54  ;;  %v2545_v17 = vsel %vm682_vm0, %v2495_v30, %v2544_v29  ;;  %v7464_v55 = vpop.permute.xlu2 %2651  ;;  %v4553_v24 = vld [vmem:[%s8017_s3 + $0x38] sm:$0xff]  ;;  %3094 = vmatpush.bf16.msra.mxu2 %v4561_v38  ;;  %v2833_v54 = vsel %vm2831_vm7, %v2824_v1, %v2690_v13 }
 0x254   :  { %v2198_v58 = vmax.f32 %v2178_v6, 0.0  ;;  %v2402_v2 = vsel %vm8233_vm14, %v2352_v28, %v2401_v49  ;;  %v2546_v33 = vsel %vm684_vm2, %v2496_v16, %v2545_v17  ;;  %3075 = vmatpush.bf16.msra.mxu1 %v4553_v24  ;;  %v4560_v17 = vld [vmem:[%s8017_s3 + $0x70] sm:$0xff] }
 0x255   :  { %v7443_v41 = vsel %vm8234_vm12, %v2278_v8, %v2402_v2  ;;  %v7446_v22 = vsel %vm2585_vm6, %v2546_v33, %v2257_v27 }
 0x256   :  { %v2749_v50 = vrot.slane %v7443_v41, 1  ;;  %v2259_v15 = vrot.slane %v2198_v58, 2  ;;  %v2260_v20 = vrot.slane %v2198_v58, 4  ;;  %v2261_v25 = vrot.slane %v2198_v58, 6 }
 0x257   :  { %v2353_v32 = vperm.slane %v2198_v58, 1  ;;  %v2497_v9 = vperm.slane %v2198_v58, 0  ;;  %v2279_v7 = vrot.slane %v2198_v58, 7  ;;  %3095 = vmatpush.bf16.msra.mxu2 %v4560_v17 }
 0x258   :  { %2763 = vrot.lane.b32.xlu0 %v2749_v50, %s4977_s26  ;;  %v2354_v48 = vperm.slane %v2259_v15, 1  ;;  %v2355_v46 = vperm.slane %v2260_v20, 1  ;;  %v2498_v21 = vperm.slane %v2259_v15, 0  ;;  %v2499_v57 = vperm.slane %v2260_v20, 0  ;;  %3076 = vmatpush.bf16.msra.mxu1 %v4552_v59  ;;  %v4551_v15 = vld [vmem:[%s8017_s3 + $0x28] sm:$0xff] }
 0x259   :  { %v2356_v44 = vperm.slane %v2261_v25, 1  ;;  %v2500_v40 = vperm.slane %v2261_v25, 0 }
 0x25a   :  { %v2403_v60 = vsel %vm682_vm0, %v2354_v48, %v2353_v32  ;;  %v2547_v37 = vsel %vm1201_vm1, %v2498_v21, %v2497_v9 }
 0x25b   :  { %v2404_v23 = vsel %vm684_vm2, %v2355_v46, %v2403_v60  ;;  %v2548_v45 = vsel %vm682_vm0, %v2499_v57, %v2547_v37  ;;  %v2802_v12 = vpop.permute.xlu2 %2801 }
 0x25c   :  { %v2405_v14 = vsel %vm8235_vm13, %v2356_v44, %v2404_v23  ;;  %v2549_v26 = vsel %vm684_vm2, %v2500_v40, %v2548_v45  ;;  %3077 = vmatpush.bf16.msra.mxu1 %v4551_v15  ;;  %v4556_v15 = vld [vmem:[%s8017_s3 + $0x50] sm:$0xff] }
 0x25d   :  { %v7459_v31 = vsel %vm8236_vm15, %v2279_v7, %v2405_v14  ;;  %v2600_v11 = vsel %vm2585_vm6, %v2549_v26, %v2260_v20  ;;  %v4559_v20 = vld [vmem:[%s8017_s3 + $0x68] sm:$0xff]  ;;  %v4558_v26 = vld [vmem:[%s8017_s3 + $0x60] sm:$0xff] }
 0x25e   :  { %2787 = vrot.lane.b32.xlu1 %v7459_v31, %s4981_s28  ;;  %v2686_v53 = vrot.slane %v7459_v31, 1  ;;  %3096 = vmatpush.bf16.msra.mxu2 %v4559_v20 }
 0x260   :  { %2932 = vst [vmem:[#allocation1 + $0x30] ss:$2 sm:$0xff] %v2686_v53  ;;  %2701 = vrot.lane.b32.xlu2 %v2686_v53, %s4981_s28  ;;  %2661 = vrot.lane.b32.xlu0 %v2600_v11, %s4977_s26 }
 0x261   :  { %v2722_v39 = vpop.permute.xlu1 %2721 }
 0x262   :  { %v2842_v58 = vsel %vm2840_vm3, %v2833_v54, %v2722_v39  ;;  %3097 = vmatpush.bf16.msra.mxu2 %v4558_v26  ;;  %v4557_v54 = vld [vmem:[%s8017_s3 + $0x58] sm:$0xff] }
 0x263   :  { %v7504_v37 = vpop.permute.xlu2 %2723 }
 0x266   :  { %3098 = vmatpush.bf16.msra.mxu2 %v4557_v54 }
 0x268   :  { %v2180_v27 = vpop.f32.mrf.mxu0  ;;  %2811 = vrot.lane.b32.xlu0 %v2600_v11, %s4980_s2 }
 0x269   :  { %v2181_v10 = vadd.f32 %v7207_v3, %v2180_v27  ;;  %v2778_v51 = vpop.permute.xlu0 %2777 }
 0x26a   :  { %v2858_v30 = vsel %vm2831_vm7, %v2850_v61, %v2778_v51  ;;  %3099 = vmatpush.bf16.msra.mxu2 %v4556_v15 }
 0x26b   :  { %v2199_v28 = vmax.f32 %v2181_v10, 0.0  ;;  %v2866_v6 = vsel %vm2840_vm3, %v2858_v30, %v2802_v12  ;;  %v2692_v12 = vpop.permute.xlu1 %2691  ;;  %v2694_v20 = vpop.permute.xlu2 %2693 }
 0x26c   :  { %v2890_v16 = vrot.slane %v2866_v6, 4 }
 0x26d   :  { %v2262_v29 = vrot.slane %v2199_v28, 2  ;;  %v2263_v8 = vrot.slane %v2199_v28, 4  ;;  %v2264_v49 = vrot.slane %v2199_v28, 6  ;;  %v2357_v33 = vperm.slane %v2199_v28, 1 }
 0x26e   :  { %v2898_v2 = vsel %vm2585_vm6, %v2842_v58, %v2890_v16  ;;  %v2501_v36 = vperm.slane %v2199_v28, 0  ;;  %v2280_v57 = vrot.slane %v2199_v28, 7  ;;  %v4549_v28 = vld [vmem:[%s8017_s3 + $0x18] sm:$0xff] }
 0x26f   :  { %v2358_v42 = vperm.slane %v2262_v29, 1  ;;  %v2359_v50 = vperm.slane %v2263_v8, 1  ;;  %2907 = vst [vmem:[#allocation1 + $0x1] ss:$2 sm:$0xff] %v2898_v2  ;;  %v2502_v32 = vperm.slane %v2262_v29, 0  ;;  %v2503_v48 = vperm.slane %v2263_v8, 0 }
 0x270   :  { %v2182_v25 = vpop.f32.mrf.mxu0  ;;  %v2360_v9 = vperm.slane %v2264_v49, 1  ;;  %v2504_v60 = vperm.slane %v2264_v49, 0 }
 0x271   :  { %v2183_v46 = vadd.f32 %v7207_v3, %v2182_v25  ;;  %v2406_v21 = vsel %vm682_vm0, %v2358_v42, %v2357_v33  ;;  %v2550_v40 = vsel %vm1201_vm1, %v2502_v32, %v2501_v36  ;;  %v4550_v3 = vld [vmem:[%s8017_s3 + $0x20] sm:$0xff]  ;;  %v4548_v33 = vld [vmem:[%s8017_s3 + $0x10] sm:$0xff] }
 0x272   :  { %v2407_v44 = vsel %vm684_vm2, %v2359_v50, %v2406_v21  ;;  %v2551_v45 = vsel %vm682_vm0, %v2503_v48, %v2550_v40  ;;  %3078 = vmatpush.bf16.msra.mxu1 %v4550_v3  ;;  %v4546_v21 = vld [vmem:[%s8017_s3] sm:$0xff]  ;;  %v2936_v3 = vld.sshfl [vmem:[#allocation1 + $0x10] sm:$0xff pattern:$0x75316420] }
 0x273   :  { %v2200_v7 = vmax.f32 %v2183_v46, 0.0  ;;  %v2408_v23 = vsel %vm8239_vm10, %v2360_v9, %v2407_v44  ;;  %v2552_v53 = vsel %vm684_vm2, %v2504_v60, %v2551_v45  ;;  %v4547_v46 = vld [vmem:[%s8017_s3 + $0x8] sm:$0xff] }
 0x274   :  { %v2440_v14 = vsel %vm8240_vm11, %v2280_v57, %v2408_v23  ;;  %v7517_v24 = vsel %vm2585_vm6, %v2552_v53, %v2263_v8  ;;  %v4555_v9 = vld [vmem:[%s8017_s3 + $0x48] sm:$0xff]  ;;  %v4554_v57 = vld [vmem:[%s8017_s3 + $0x40] sm:$0xff] }
 0x275   :  { %v2750_v11 = vrot.slane %v2440_v14, 1  ;;  %v2241_v13 = vrot.slane %v2200_v7, 2  ;;  %v2242_v27 = vrot.slane %v2200_v7, 4  ;;  %v2243_v1 = vrot.slane %v2200_v7, 6  ;;  %3100 = vmatpush.bf16.msra.mxu2 %v4555_v9 }
 0x276   :  { %v2329_v38 = vperm.slane %v2200_v7, 1  ;;  %v2473_v30 = vperm.slane %v2200_v7, 0  ;;  %v2273_v8 = vrot.slane %v2200_v7, 7  ;;  %3079 = vmatpush.bf16.msra.mxu1 %v4549_v28 }
 0x277   :  { %2765 = vrot.lane.b32.xlu1 %v2750_v11, %s4977_s26  ;;  %v2330_v61 = vperm.slane %v2241_v13, 1  ;;  %v2331_v51 = vperm.slane %v2242_v27, 1  ;;  %v2474_v39 = vperm.slane %v2241_v13, 0  ;;  %v2475_v6 = vperm.slane %v2242_v27, 0  ;;  %v2782_v40 = vpop.permute.xlu2 %2781 }
 0x278   :  { %v2332_v16 = vperm.slane %v2243_v1, 1  ;;  %v2476_v59 = vperm.slane %v2243_v1, 0 }
 0x279   :  { %v2756_v10 = vpop.permute.xlu0 %2755  ;;  %v2385_v29 = vsel %vm682_vm0, %v2330_v61, %v2329_v38  ;;  %v2529_v17 = vsel %vm1201_vm1, %v2474_v39, %v2473_v30  ;;  %3101 = vmatpush.bf16.msra.mxu2 %v4554_v57 }
 0x27a   :  { %v2386_v49 = vsel %vm684_vm2, %v2331_v51, %v2385_v29  ;;  %v2530_v2 = vsel %vm682_vm0, %v2475_v6, %v2529_v17  ;;  %3080 = vmatpush.bf16.msra.mxu1 %v4548_v33 }
 0x27b   :  { %v2387_v58 = vsel %vm8241_vm9, %v2332_v16, %v2386_v49  ;;  %v2531_v50 = vsel %vm684_vm2, %v2476_v59, %v2530_v2  ;;  %vm8243_vm2 = vmmov %vm8237_vm4 }
 0x27c   :  { %v7535_v42 = vsel %vm8242_vm8, %v2273_v8, %v2387_v58  ;;  %v2594_v25 = vsel %vm2585_vm6, %v2531_v50, %v2242_v27  ;;  %v2825_v44 = vsel %vm8243_vm2, %v7292_v63, %v7464_v55  ;;  %vm8244_vm14 = vmmov %vm8243_vm2 }
 0x27d   :  { %2789 = vrot.lane.b32.xlu2 %v7535_v42, %s4981_s28  ;;  %v2683_v36 = vrot.slane %v7535_v42, 1  ;;  %2655 = vrot.lane.b32.xlu0 %v2594_v25, %s4977_s26  ;;  %v2851_v60 = vsel %vm8244_vm14, %v7309_v56, %v2756_v10  ;;  %v2834_v7 = vsel %vm2831_vm7, %v2825_v44, %v2692_v12  ;;  %vm8245_vm12 = vmmov %vm8243_vm2 }
 0x27e   :  { %3081 = vmatpush.bf16.msra.mxu1 %v4547_v46  ;;  %v2843_v11 = vsel %vm2840_vm3, %v2834_v7, %v7504_v37  ;;  %vm8246_vm13 = vmmov %vm8243_vm2 }
 0x27f   :  { %v2780_v32 = vpop.permute.xlu1 %2779  ;;  %2813 = vrot.lane.b32.xlu1 %v2594_v25, %s4980_s2  ;;  %2933 = vst [vmem:[#allocation1 + $0x31] ss:$2 sm:$0xff] %v2683_v36  ;;  %vm8247_vm15 = vmmov %vm8243_vm2  ;;  %v2688_v10 = vpop.permute.xlu2 %2687 }
 0x280   :  { %v2859_v23 = vsel %vm2831_vm7, %v2851_v60, %v2780_v32  ;;  %vm8248_vm4 = vmmov %vm8243_vm2 }
 0x281   :  { %v2654_v48 = vpop.permute.xlu0 %2653  ;;  %vm8249_vm5 = vmmov %vm8243_vm2 }
 0x282   :  { %3082 = vmatpush.bf16.msra.mxu1 %v4546_v21  ;;  %vm8250_vm10 = vmmov %vm8243_vm2 }
 0x283   :  { %vm8251_vm11 = vmmov %vm8243_vm2 }
 0x284   :  { %vm8252_vm9 = vmmov %vm8243_vm2 }
 0x285   :  { %2695 = vrot.lane.b32.xlu2 %v2683_v36, %s4981_s28  ;;  %2733 = vrot.lane.b32.xlu0 %v2440_v14, %s4980_s2  ;;  %vm8253_vm8 = vmmov %vm8243_vm2 }
 0x286   :  { %v2939_v45 = vld.sshfl [vmem:[#allocation1 + $0x30] sm:$0xff pattern:$0x75316420]  ;;  %vm8254_vm14 = vmmov %vm8243_vm2 }
 0x287   :  { %2729 = vrot.lane.b32.xlu1 %v7404_v18, %s4980_s2  ;;  %v2957_v63 = vpack.c.bf16 %v2939_v45, %v2936_v3  ;;  %v2826_v18 = vsel %vm8247_vm15, %v7327_v0, %v2654_v48  ;;  %v2865_v0 = vsel %vm2840_vm3, %v7431_v62, %v7469_v4  ;;  %v2784_v30 = vpop.permute.xlu2 %2783 }
 0x288   :  { %v2835_v38 = vsel %vm2831_vm7, %v2826_v18, %v2694_v20  ;;  %v2889_v54 = vrot.slane %v2865_v0, 4 }
 0x289   :  { %v2804_v26 = vpop.permute.xlu0 %2803  ;;  %v2758_v53 = vpop.permute.xlu1 %2757  ;;  %4269 = vmatmul.msk.bf16.gmra.mxu3 %vm8245_vm12, %v2957_v63  ;;  %vm8255_vm12 = vmmov %vm8243_vm2 }
 0x28a   :  { %v2867_v55 = vsel %vm2840_vm3, %v2859_v23, %v2804_v26  ;;  %v2852_v13 = vsel %vm8246_vm13, %v7344_v35, %v2758_v53  ;;  %vm8256_vm13 = vcmask 1041408  }
 0x28b   :  { %v2891_v56 = vrot.slane %v2867_v55, 4  ;;  %v2860_v1 = vsel %vm2831_vm7, %v2852_v13, %v2782_v40  ;;  %vm8257_vm15 = vmmov %vm8256_vm13 }
 0x28d   :  { %v2899_v14 = vsel %vm2585_vm6, %v2843_v11, %v2891_v56  ;;  %2731 = vrot.lane.b32.xlu2 %v7443_v41, %s4980_s2 }
 0x28e   :  { %2913 = vst [vmem:[#allocation1 + $0x20] ss:$2 sm:$0xff] %v2899_v14 }
 0x291   :  { %v2726_v27 = vpop.permute.xlu0 %2725  ;;  %v2806_v12 = vpop.permute.xlu1 %2805 }
 0x292   :  { %v2868_v37 = vsel %vm2840_vm3, %v2860_v1, %v2806_v12  ;;  %v2844_v51 = vsel %vm2840_vm3, %v2835_v38, %v2726_v27 }
 0x293   :  { %v2892_v61 = vrot.slane %v2868_v37, 4 }
 0x295   :  { %v2900_v35 = vsel %vm2585_vm6, %v2844_v51, %v2892_v61 }
 0x296   :  { %2915 = vst [vmem:[#allocation1 + $0x21] ss:$2 sm:$0xff] %v2900_v35 }
 0x299   :  { %v2648_v41 = vpop.permute.xlu0 %2647  ;;  %v2760_v28 = vpop.permute.xlu1 %2759 }
 0x29a   :  { %v2823_v39 = vsel %vm8248_vm4, %v7357_v5, %v2648_v41  ;;  %v2853_v6 = vsel %vm8249_vm5, %v7374_v19, %v2760_v28  ;;  %v2762_v19 = vpop.permute.xlu2 %2761  ;;  %vm8258_vm4 = vcmask 1040384   ;;  %vm8259_vm5 = vmmov %vm8256_vm13 }
 0x29b   :  { %v2832_v16 = vsel %vm2831_vm7, %v2823_v39, %v2688_v10  ;;  %v2861_v29 = vsel %vm2831_vm7, %v2853_v6, %v2784_v30  ;;  %v2854_v13 = vsel %vm8243_vm2, %v7407_v47, %v2762_v19  ;;  %vm8264_vm2 = vmmov %vm8259_vm5 }
 0x29c   :  { %v2841_v8 = vsel %vm2840_vm3, %v2832_v16, %v7450_v34 }
 0x29d   :  { %v2897_v49 = vsel %vm2585_vm6, %v2841_v8, %v2889_v54  ;;  %v2923_v62 = vld.sshfl [vmem:[#allocation1 + $0x20] sm:$0xff pattern:$0x75316420]  ;;  %v2924_v4 = vld.sshfl [vmem:[#allocation1 + $0x28] sm:$0xff pattern:$0x75316420] }
 0x29e   :  { %2905 = vst [vmem:[#allocation1] ss:$2 sm:$0xff] %v2897_v49 }
 0x2a1   :  { %v2728_v2 = vpop.permute.xlu0 %2727  ;;  %v2658_v20 = vpop.permute.xlu1 %2657 }
 0x2a2   :  { %v2660_v33 = vpop.permute.xlu2 %2659  ;;  %v2828_v47 = vsel %vm8255_vm12, %v7387_v43, %v2658_v20  ;;  %vm8266_vm12 = vmmov %vm8258_vm4 }
 0x2a3   :  { %v2829_v23 = vsel %vm8251_vm11, %v7420_v52, %v2660_v33  ;;  %vm8261_vm11 = vmmov %vm8259_vm5 }
 0x2a5   :  { %v2920_v59 = vld.sshfl [vmem:[#allocation1] sm:$0xff pattern:$0x75316420]  ;;  %v2921_v17 = vld.sshfl [vmem:[#allocation1 + $0x8] sm:$0xff pattern:$0x75316420] }
 0x2a6   :  { %v2952_v58 = vpack.c.bf16 %v2923_v62, %v2920_v59  ;;  %v2953_v5 = vpack.c.bf16 %v2924_v4, %v2921_v17  ;;  %v7634_v4 = vld [vmem:[%s8018_s4] ss:$0 sm:$0xff] }
 0x2a8   :  { %3083 = vmatmul.bf16.vlgmr.msra.gmra.mxu1 %v2952_v58  ;;  %3102 = vmatmul.bf16.vlgmr.msra.gmra.mxu2 %v2953_v5 }
 0x2a9   :  { %v2698_v50 = vpop.permute.xlu0 %2697  ;;  %v2808_v32 = vpop.permute.xlu1 %2807 }
 0x2aa   :  { %v2810_v25 = vpop.permute.xlu2 %2809  ;;  %v2869_v56 = vsel %vm2840_vm3, %v2861_v29, %v2808_v32  ;;  %v2837_v28 = vsel %vm2831_vm7, %v2828_v47, %v2698_v50 }
 0x2ab   :  { %v2893_v18 = vrot.slane %v2869_v56, 4 }
 0x2ac   :  { %v3122_v17 = vpop.f32.mrf.mxu3 }
 0x2b1   :  { %v2786_v15 = vpop.permute.xlu0 %2785  ;;  %v2700_v9 = vpop.permute.xlu1 %2699 }
 0x2b2   :  { %v2838_v3 = vsel %vm2831_vm7, %v2829_v23, %v2700_v9  ;;  %v2862_v1 = vsel %vm2831_vm7, %v2854_v13, %v2786_v15 }
 0x2b3   :  { %v2870_v38 = vsel %vm2840_vm3, %v2862_v1, %v2810_v25 }
 0x2b4   :  { %v2894_v0 = vrot.slane %v2870_v38, 4 }
 0x2ba   :  { %v2702_v34 = vpop.permute.xlu2 %2701 }
 0x2ca   :  { %v2764_v36 = vpop.permute.xlu0 %2763 }
 0x2cb   :  { %v2855_v60 = vsel %vm8250_vm10, %v7446_v22, %v2764_v36  ;;  %vm8260_vm10 = vmmov %vm8259_vm5 }
 0x2d0   :  { %v2788_v57 = vpop.permute.xlu1 %2787 }
 0x2d1   :  { %v2863_v40 = vsel %vm2831_vm7, %v2855_v60, %v2788_v57 }
 0x2d2   :  { %v2662_v46 = vpop.permute.xlu0 %2661 }
 0x2d7   :  { %v2790_v48 = vpop.permute.xlu2 %2789 }
 0x2da   :  { %v2812_v44 = vpop.permute.xlu0 %2811 }
 0x2db   :  { %v2871_v7 = vsel %vm2840_vm3, %v2863_v40, %v2812_v44 }
 0x2dc   :  { %v2895_v45 = vrot.slane %v2871_v7, 4 }
 0x2df   :  { %v2696_v21 = vpop.permute.xlu2 %2695 }
 0x2e7   :  { %v2732_v26 = vpop.permute.xlu2 %2731 }
 0x2e8   :  { %v2847_v53 = vsel %vm2840_vm3, %v2838_v3, %v2732_v26 }
 0x2e9   :  { %v2903_v63 = vsel %vm2585_vm6, %v2847_v53, %v2895_v45  ;;  %v2766_v55 = vpop.permute.xlu1 %2765 }
 0x2ea   :  { %2930 = vst [vmem:[#allocation1 + $0x20] ss:$2 sm:$0xff] %v2903_v63  ;;  %v2856_v11 = vsel %vm8252_vm9, %v7517_v24, %v2766_v55  ;;  %v2830_v24 = vsel %vm8254_vm14, %v7459_v31, %v2662_v46  ;;  %v3124_v46 = vpop.f32.mrf.mxu3  ;;  %vm8262_vm9 = vmmov %vm8258_vm4 }
 0x2eb   :  { %v2864_v37 = vsel %vm2831_vm7, %v2856_v11, %v2790_v48  ;;  %v2839_v51 = vsel %vm2831_vm7, %v2830_v24, %v2702_v34  ;;  %vm8265_vm14 = vmmov %vm8264_vm2 }
 0x2ef   :  { %v2656_v22 = vpop.permute.xlu0 %2655 }
 0x2f0   :  { %v2827_v14 = vsel %vm8253_vm8, %v7535_v42, %v2656_v22  ;;  %vm8263_vm8 = vmmov %vm8259_vm5 }
 0x2f1   :  { %v2814_v52 = vpop.permute.xlu1 %2813  ;;  %v2836_v27 = vsel %vm2831_vm7, %v2827_v14, %v2696_v21 }
 0x2f2   :  { %v2845_v12 = vsel %vm2840_vm3, %v2836_v27, %v2728_v2  ;;  %v2872_v42 = vsel %vm2840_vm3, %v2864_v37, %v2814_v52 }
 0x2f3   :  { %v2901_v10 = vsel %vm2585_vm6, %v2845_v12, %v2893_v18  ;;  %v2896_v61 = vrot.slane %v2872_v42, 4 }
 0x2f4   :  { %2926 = vst [vmem:[#allocation1] ss:$2 sm:$0xff] %v2901_v10 }
 0x2f7   :  { %v2734_v35 = vpop.permute.xlu0 %2733 }
 0x2f8   :  { %v2848_v41 = vsel %vm2840_vm3, %v2839_v51, %v2734_v35 }
 0x2f9   :  { %v2730_v30 = vpop.permute.xlu1 %2729  ;;  %v2904_v31 = vsel %vm2585_vm6, %v2848_v41, %v2896_v61 }
 0x2fa   :  { %v2846_v39 = vsel %vm2840_vm3, %v2837_v28, %v2730_v30  ;;  %2931 = vst [vmem:[#allocation1 + $0x21] ss:$2 sm:$0xff] %v2904_v31  ;;  %vm3153_vm3 = vcmask 1043458  }
 0x2fb   :  { %v2902_v6 = vsel %vm2585_vm6, %v2846_v39, %v2894_v0 }
 0x2fc   :  { %2927 = vst [vmem:[#allocation1 + $0x1] ss:$2 sm:$0xff] %v2902_v6 }
 0x301   :  { %v2937_v43 = vld.sshfl [vmem:[#allocation1 + $0x20] sm:$0xff pattern:$0x75316420]  ;;  %v2938_v54 = vld.sshfl [vmem:[#allocation1 + $0x28] sm:$0xff pattern:$0x75316420] }
 0x303   :  { %v2934_v16 = vld.sshfl [vmem:[#allocation1] sm:$0xff pattern:$0x75316420]  ;;  %v2935_v29 = vld.sshfl [vmem:[#allocation1 + $0x8] sm:$0xff pattern:$0x75316420] }
 0x304   :  { %v2955_v8 = vpack.c.bf16 %v2937_v43, %v2934_v16  ;;  %v2956_v49 = vpack.c.bf16 %v2938_v54, %v2935_v29 }
 0x306   :  { %3088 = vmatmul.bf16.gmra.mxu1 %v2955_v8  ;;  %3107 = vmatmul.bf16.gmra.mxu2 %v2956_v49 }
 0x325   :  { %v3084_v62 = vpop.f32.mrf.mxu1 }
 0x326   :  { %v3085_v59 = vadd.f32 %v7634_v4, %v3084_v62 }
 0x32b   :  { %v3103_v58 = vpop.f32.mrf.mxu2 }
 0x32c   :  { %v3104_v5 = vadd.f32 %v3103_v58, %v3085_v59 }
 0x32d   :  { %v3086_v2 = vpop.f32.mrf.mxu1 }
 0x32e   :  { %v3123_v19 = vadd.f32 %v3122_v17, %v3104_v5  ;;  %v3087_v50 = vadd.f32 %v7634_v4, %v3086_v2 }
 0x330   :  { %v3132_v33 = vmax.f32 %v3123_v19, 0.0 }
 0x332   :  { %v3145_v15 = vrot.slane %v3132_v33, 2  ;;  %v3140_v20 = vrot.slane %v3132_v33, 4  ;;  %v3178_v60 = vperm.slane %v3132_v33, 3  ;;  %v3266_v61 = vperm.slane %v3132_v33, 0 }
 0x333   :  { %v3105_v25 = vpop.f32.mrf.mxu2 }
 0x334   :  { %v3106_v36 = vadd.f32 %v3105_v25, %v3087_v50  ;;  %v3156_v34 = vsel %vm8256_vm13, %v3132_v33, %v3145_v15  ;;  %v3157_v32 = vsel %vm3153_vm3, %v3132_v33, %v3145_v15  ;;  %v3146_v48 = vrot.slane %v3140_v20, 2  ;;  %vm8267_vm13 = vmmov %vm8258_vm4 }
 0x335   :  { %v3158_v9 = vrot.slane %v3157_v32, 2  ;;  %v3195_v40 = vperm.slane %v3156_v34, 1  ;;  %v3235_v45 = vperm.slane %v3156_v34, 0  ;;  %v3267_v14 = vperm.slane %v3140_v20, 0  ;;  %v3127_v32 = vpop.f32.mrf.mxu3 }
 0x336   :  { %v3125_v21 = vadd.f32 %v3124_v46, %v3106_v36  ;;  %v3159_v57 = vsel %vm8257_vm15, %v3140_v20, %v3146_v48  ;;  %v3160_v44 = vsel %vm3153_vm3, %v3140_v20, %v3146_v48  ;;  %v3179_v24 = vperm.slane %v3140_v20, 3  ;;  %vm8268_vm15 = vmmov %vm8264_vm2 }
 0x337   :  { %v3196_v7 = vperm.slane %v3158_v9, 1  ;;  %v3161_v23 = vrot.slane %v3160_v44, 2  ;;  %v3237_v26 = vperm.slane %v3159_v57, 0  ;;  %v3236_v53 = vperm.slane %v3158_v9, 0 }
 0x338   :  { %v3133_v3 = vmax.f32 %v3125_v21, 0.0  ;;  %v3197_v56 = vperm.slane %v3159_v57, 1 }
 0x339   :  { %v3210_v63 = vsel %vm682_vm0, %v3196_v7, %v3195_v40  ;;  %v3238_v55 = vperm.slane %v3161_v23, 0  ;;  %v3198_v22 = vperm.slane %v3161_v23, 1  ;;  %v3250_v12 = vsel %vm1201_vm1, %v3236_v53, %v3235_v45 }
 0x33a   :  { %v3226_v11 = vsel %vm8258_vm4, %v3178_v60, %v3210_v63  ;;  %v3141_v52 = vrot.slane %v3133_v3, 4  ;;  %v3147_v13 = vrot.slane %v3133_v3, 2  ;;  %v3180_v38 = vperm.slane %v3133_v3, 3  ;;  %vm8269_vm4 = vmmov %vm8264_vm2 }
 0x33b   :  { %3394 = vrot.lane.b32.xlu2 %v3226_v11, %s4981_s28  ;;  %v3406_v18 = vrot.slane %v3226_v11, 1  ;;  %v3251_v27 = vsel %vm1201_vm1, %v3238_v55, %v3237_v26  ;;  %v3211_v1 = vsel %vm682_vm0, %v3198_v22, %v3197_v56  ;;  %v7659_v54 = vsel %vm8263_vm8, %v3250_v12, %v3266_v61 }
 0x33c   :  { %v3144_v10 = vrot.slane %v3141_v52, 2  ;;  %v3162_v37 = vsel %vm8259_vm5, %v3133_v3, %v3147_v13  ;;  %v3283_v42 = vsel %vm8260_vm10, %v3251_v27, %v3267_v14  ;;  %v3163_v47 = vsel %vm3153_vm3, %v3133_v3, %v3147_v13  ;;  %vm8270_vm5 = vmmov %vm8262_vm9 }
 0x33d   :  { %3410 = vrot.lane.b32.xlu0 %v3406_v18, %s4981_s28  ;;  %v3164_v0 = vrot.slane %v3163_v47, 2  ;;  %v7655_v41 = vsel %vm8262_vm9, %v3179_v24, %v3211_v1  ;;  %v3199_v30 = vperm.slane %v3162_v37, 1  ;;  %v3239_v31 = vperm.slane %v3162_v37, 0  ;;  %v3129_v53 = vpop.f32.mrf.mxu3  ;;  %vm8271_vm10 = vmmov %vm8264_vm2 }
 0x33e   :  { %v3152_v51 = vsel %vm8261_vm11, %v3141_v52, %v3144_v10  ;;  %v3154_v35 = vsel %vm3153_vm3, %v3141_v52, %v3144_v10  ;;  %v3383_v39 = vrot.slane %v7655_v41, 1  ;;  %v3268_v62 = vperm.slane %v3133_v3, 0  ;;  %vm8272_vm11 = vmmov %vm8264_vm2 }
 0x33f   :  { %v3155_v28 = vrot.slane %v3154_v35, 2  ;;  %v3233_v6 = vperm.slane %v3152_v51, 0  ;;  %v3200_v43 = vperm.slane %v3164_v0, 1  ;;  %v3240_v16 = vperm.slane %v3164_v0, 0  ;;  %vm8273_vm9 = vmmov %vm8264_vm2 }
 0x340   :  { %v3193_v49 = vperm.slane %v3152_v51, 1  ;;  %3479 = vst [vmem:[#allocation1 + $0x20] ss:$4 sm:$0xff] %v3383_v39  ;;  %v3265_v59 = vperm.slane %v3141_v52, 0  ;;  %v3177_v58 = vperm.slane %v3141_v52, 3  ;;  %vm8274_vm8 = vmmov %vm8270_vm5 }
 0x341   :  { %v3194_v29 = vperm.slane %v3155_v28, 1  ;;  %v3234_v8 = vperm.slane %v3155_v28, 0  ;;  %v3212_v17 = vsel %vm682_vm0, %v3200_v43, %v3199_v30  ;;  %v3252_v5 = vsel %vm1201_vm1, %v3240_v16, %v3239_v31 }
 0x342   :  { %v7669_v33 = vsel %vm8264_vm2, %v3252_v5, %v3268_v62  ;;  %v7673_v15 = vsel %vm8266_vm12, %v3180_v38, %v3212_v17  ;;  %vm8277_vm12 = vmmov %vm8270_vm5 }
 0x343   :  { %3368 = vrot.lane.b32.xlu2 %v3283_v42, %s4981_s28  ;;  %v3249_v19 = vsel %vm1201_vm1, %v3234_v8, %v3233_v6  ;;  %v3209_v2 = vsel %vm682_vm0, %v3194_v29, %v3193_v49 }
 0x344   :  { %v3281_v50 = vsel %vm8265_vm14, %v3249_v19, %v3265_v59  ;;  %v7676_v20 = vsel %vm8267_vm13, %v3177_v58, %v3209_v2  ;;  %vm8275_vm14 = vmmov %vm8270_vm5 }
 0x345   :  { %3366 = vrot.lane.b32.xlu1 %v3281_v50, %s4981_s28  ;;  %3396 = vrot.lane.b32.xlu0 %v7673_v15, %s4981_s28  ;;  %v3382_v25 = vrot.slane %v7676_v20, 1  ;;  %vm8278_vm13 = vmmov %vm8264_vm2 }
 0x347   :  { %3481 = vst [vmem:[#allocation1 + $0x21] ss:$4 sm:$0xff] %v3382_v25 }
 0x383   :  { %v3089_v36 = vpop.f32.mrf.mxu1 }
 0x384   :  { %v3090_v34 = vadd.f32 %v7634_v4, %v3089_v36 }
 0x389   :  { %v3108_v48 = vpop.f32.mrf.mxu2 }
 0x38a   :  { %v3109_v46 = vadd.f32 %v3108_v48, %v3090_v34 }
 0x38b   :  { %v3091_v21 = vpop.f32.mrf.mxu1 }
 0x38c   :  { %v3128_v9 = vadd.f32 %v3127_v32, %v3109_v46  ;;  %v3092_v44 = vadd.f32 %v7634_v4, %v3091_v21 }
 0x38e   :  { %v3134_v57 = vmax.f32 %v3128_v9, 0.0 }
 0x390   :  { %v3149_v60 = vrot.slane %v3134_v57, 2  ;;  %v3142_v40 = vrot.slane %v3134_v57, 4  ;;  %v3182_v13 = vperm.slane %v3134_v57, 3  ;;  %v3270_v38 = vperm.slane %v3134_v57, 0 }
 0x391   :  { %v3110_v7 = vpop.f32.mrf.mxu2 }
 0x392   :  { %v3111_v23 = vadd.f32 %v3110_v7, %v3092_v44  ;;  %v3168_v3 = vsel %vm8268_vm15, %v3134_v57, %v3149_v60  ;;  %v3169_v45 = vsel %vm3153_vm3, %v3134_v57, %v3149_v60  ;;  %v3150_v26 = vrot.slane %v3142_v40, 2  ;;  %vm8279_vm15 = vmmov %vm8264_vm2 }
 0x393   :  { %v3170_v63 = vrot.slane %v3169_v45, 2  ;;  %v3203_v11 = vperm.slane %v3168_v3, 1  ;;  %v3243_v18 = vperm.slane %v3168_v3, 0  ;;  %v3271_v51 = vperm.slane %v3142_v40, 0 }
 0x394   :  { %v3130_v55 = vadd.f32 %v3129_v53, %v3111_v23  ;;  %v3171_v56 = vsel %vm8269_vm4, %v3142_v40, %v3150_v26  ;;  %v3172_v22 = vsel %vm3153_vm3, %v3142_v40, %v3150_v26  ;;  %v3183_v6 = vperm.slane %v3142_v40, 3  ;;  %vm8280_vm4 = vmmov %vm8264_vm2 }
 0x395   :  { %v3204_v14 = vperm.slane %v3170_v63, 1  ;;  %v3173_v52 = vrot.slane %v3172_v22, 2  ;;  %v3244_v27 = vperm.slane %v3170_v63, 0  ;;  %v3245_v10 = vperm.slane %v3171_v56, 0  ;;  %v3395_v63 = vpop.permute.xlu2 %3394 }
 0x396   :  { %v3135_v4 = vmax.f32 %v3130_v55, 0.0  ;;  %v3205_v35 = vperm.slane %v3171_v56, 1  ;;  %v3407_v55 = vrot.slane %v7673_v15, 1 }
 0x397   :  { %v3214_v1 = vsel %vm682_vm0, %v3204_v14, %v3203_v11  ;;  %v3206_v12 = vperm.slane %v3173_v52, 1  ;;  %v3246_v37 = vperm.slane %v3173_v52, 0  ;;  %v3254_v0 = vsel %vm1201_vm1, %v3244_v27, %v3243_v18 }
 0x398   :  { %v3230_v24 = vsel %vm8270_vm5, %v3182_v13, %v3214_v1  ;;  %v3151_v42 = vrot.slane %v3135_v4, 2  ;;  %v3143_v47 = vrot.slane %v3135_v4, 4  ;;  %v3184_v16 = vperm.slane %v3135_v4, 3  ;;  %vm8281_vm5 = vmmov %vm8264_vm2 }
 0x399   :  { %3398 = vrot.lane.b32.xlu1 %v3230_v24, %s4981_s28  ;;  %v3255_v61 = vsel %vm1201_vm1, %v3246_v37, %v3245_v10  ;;  %v3215_v8 = vsel %vm682_vm0, %v3206_v12, %v3205_v35  ;;  %v7705_v34 = vsel %vm8264_vm2, %v3254_v0, %v3270_v38  ;;  %v3272_v40 = vperm.slane %v3135_v4, 0  ;;  %v4571_v37 = vld [vmem:[%s8019_s5 + $0x38] sm:$0xff]  ;;  %v4586_v35 = vld [vmem:[%s8019_s5 + $0xb0] sm:$0xff] }
 0x39a   :  { %v3174_v28 = vsel %vm8271_vm10, %v3135_v4, %v3151_v42  ;;  %v3175_v30 = vsel %vm3153_vm3, %v3135_v4, %v3151_v42  ;;  %v3148_v31 = vrot.slane %v3143_v47, 2  ;;  %v3287_v29 = vsel %vm8272_vm11, %v3255_v61, %v3271_v51  ;;  %3723 = vmatpush.bf16.msrb.mxu3 %v4571_v37  ;;  %v4568_v42 = vld [vmem:[%s8019_s5 + $0x20] sm:$0xff]  ;;  %v4587_v38 = vld [vmem:[%s8019_s5 + $0xb8] sm:$0xff]  ;;  %v4578_v51 = vld [vmem:[%s8019_s5 + $0x70] sm:$0xff] }
 0x39b   :  { %v3176_v43 = vrot.slane %v3175_v30, 2  ;;  %v3207_v49 = vperm.slane %v3174_v28, 1  ;;  %v3247_v62 = vperm.slane %v3174_v28, 0  ;;  %v3269_v2 = vperm.slane %v3143_v47, 0  ;;  %v4567_v61 = vld [vmem:[%s8019_s5 + $0x18] sm:$0xff]  ;;  %3749 = vmatpush.bf16.msrb.mxu2 %v4587_v38  ;;  %v4566_v0 = vld [vmem:[%s8019_s5 + $0x10] sm:$0xff]  ;;  %vm8282_vm10 = vmmov %vm8264_vm2 }
 0x39c   :  { %v3165_v59 = vsel %vm8273_vm9, %v3143_v47, %v3148_v31  ;;  %v3166_v17 = vsel %vm3153_vm3, %v3143_v47, %v3148_v31  ;;  %v7702_v36 = vsel %vm8274_vm8, %v3183_v6, %v3215_v8  ;;  %v3181_v44 = vperm.slane %v3143_v47, 3  ;;  %vm8276_vm3 = vmmov %vm8264_vm2  ;;  %v4579_v47 = vld [vmem:[%s8019_s5 + $0x78] sm:$0xff]  ;;  %v4577_v28 = vld [vmem:[%s8019_s5 + $0x68] sm:$0xff] }
 0x39d   :  { %v3208_v58 = vperm.slane %v3176_v43, 1  ;;  %v3167_v5 = vrot.slane %v3166_v17, 2  ;;  %v3241_v19 = vperm.slane %v3165_v59, 0  ;;  %v3201_v50 = vperm.slane %v3165_v59, 1  ;;  %v3369_v14 = vpop.permute.xlu2 %3368  ;;  %3736 = vmatpush.bf16.msrb.mxu1 %v4579_v47  ;;  %v4585_v30 = vld [vmem:[%s8019_s5 + $0xa8] sm:$0xff]  ;;  %v4576_v6 = vld [vmem:[%s8019_s5 + $0x60] sm:$0xff] }
 0x39e   :  { %v3248_v32 = vperm.slane %v3176_v43, 0  ;;  %v3385_v21 = vrot.slane %v7702_v36, 1  ;;  %v3408_v56 = vrot.slane %v3230_v24, 1  ;;  %v3426_v4 = vsel %vm2831_vm7, %v3382_v25, %v3395_v63  ;;  %v4570_v24 = vld [vmem:[%s8019_s5 + $0x30] sm:$0xff]  ;;  %v4565_v31 = vld [vmem:[%s8019_s5 + $0x8] sm:$0xff]  ;;  %v4584_v43 = vld [vmem:[%s8019_s5 + $0xa0] sm:$0xff] }
 0x39f   :  { %v3216_v48 = vsel %vm682_vm0, %v3208_v58, %v3207_v49  ;;  %v3202_v46 = vperm.slane %v3167_v5, 1  ;;  %v3242_v9 = vperm.slane %v3167_v5, 0  ;;  %v7739_v15 = vsel %vm2831_vm7, %v7655_v41, %v3369_v14  ;;  %3724 = vmatpush.bf16.msrb.mxu3 %v4570_v24  ;;  %3750 = vmatpush.bf16.msrb.mxu2 %v4586_v35  ;;  %v4583_v8 = vld [vmem:[%s8019_s5 + $0x98] sm:$0xff]  ;;  %v4574_v59 = vld [vmem:[%s8019_s5 + $0x50] sm:$0xff]  ;;  %v4573_v5 = vld [vmem:[%s8019_s5 + $0x48] sm:$0xff] }
 0x3a0   :  { %v3232_v57 = vsel %vm8275_vm14, %v3184_v16, %v3216_v48  ;;  %v3256_v60 = vsel %vm1201_vm1, %v3248_v32, %v3247_v62  ;;  %3483 = vst [vmem:[#allocation1 + $0x22] ss:$4 sm:$0xff] %v3385_v21  ;;  %v3446_v18 = vrot.slane %v3426_v4, 6  ;;  %v3448_v27 = vrot.slane %v7739_v15, 2  ;;  %v4564_v16 = vld [vmem:[%s8019_s5] sm:$0xff]  ;;  %v4595_v49 = vld [vmem:[%s8019_s5 + $0xf8] sm:$0xff] }
 0x3a1   :  { %3400 = vrot.lane.b32.xlu2 %v3232_v57, %s4981_s28  ;;  %3372 = vrot.lane.b32.xlu1 %v3287_v29, %s4981_s28  ;;  %v3253_v7 = vsel %vm1201_vm1, %v3242_v9, %v3241_v19  ;;  %v3213_v23 = vsel %vm682_vm0, %v3202_v46, %v3201_v50  ;;  %v7722_v26 = vsel %vm8278_vm13, %v3256_v60, %v3272_v40  ;;  %v3409_v22 = vrot.slane %v3232_v57, 1  ;;  %v4575_v29 = vld [vmem:[%s8019_s5 + $0x58] sm:$0xff]  ;;  %v4582_v17 = vld [vmem:[%s8019_s5 + $0x90] sm:$0xff] }
 0x3a2   :  { %v3285_v3 = vsel %vm8276_vm3, %v3253_v7, %v3269_v2  ;;  %v7719_v45 = vsel %vm8277_vm12, %v3181_v44, %v3213_v23  ;;  %vm3459_vm0 = vcmask 1045508   ;;  %3737 = vmatpush.bf16.msrb.mxu1 %v4578_v51  ;;  %v4594_v58 = vld [vmem:[%s8019_s5 + $0xf0] sm:$0xff]  ;;  %v4581_v19 = vld [vmem:[%s8019_s5 + $0x88] sm:$0xff]  ;;  %v4572_v48 = vld [vmem:[%s8019_s5 + $0x40] sm:$0xff] }
 0x3a3   :  { %3370 = vrot.lane.b32.xlu0 %v3285_v3, %s4981_s28  ;;  %v3384_v53 = vrot.slane %v7719_v45, 1  ;;  %3751 = vmatpush.bf16.msrb.mxu2 %v4585_v30  ;;  %v4593_v2 = vld [vmem:[%s8019_s5 + $0xe8] sm:$0xff]  ;;  %v4580_v46 = vld [vmem:[%s8019_s5 + $0x80] sm:$0xff]  ;;  %v4599_v57 = vld [vmem:[%s8019_s5 + $0x118] sm:$0xff] }
 0x3a4   :  { %v4592_v9 = vld [vmem:[%s8019_s5 + $0xe0] sm:$0xff]  ;;  %v4591_v7 = vld [vmem:[%s8019_s5 + $0xd8] sm:$0xff]  ;;  %v4598_v23 = vld [vmem:[%s8019_s5 + $0x110] sm:$0xff] }
 0x3a5   :  { %3485 = vst [vmem:[#allocation1 + $0x23] ss:$4 sm:$0xff] %v3384_v53  ;;  %v4597_v14 = vld [vmem:[%s8019_s5 + $0x108] sm:$0xff]  ;;  %v4596_v41 = vld [vmem:[%s8019_s5 + $0x100] sm:$0xff]  ;;  %v4607_v24 = vld [vmem:[%s8020_s7 + $0x38] sm:$0xff] }
 0x3a6   :  { %3738 = vmatpush.bf16.msrb.mxu1 %v4577_v28  ;;  %v4606_v38 = vld [vmem:[%s8020_s7 + $0x30] sm:$0xff] }
 0x3a7   :  { %3752 = vmatpush.bf16.msrb.mxu2 %v4584_v43 }
 0x3a9   :  { %3414 = vrot.lane.b32.xlu2 %v3408_v56, %s4981_s28  ;;  %3412 = vrot.lane.b32.xlu1 %v3407_v55, %s4981_s28 }
 0x3aa   :  { %3739 = vmatpush.bf16.msrb.mxu1 %v4576_v6 }
 0x3ab   :  { %3416 = vrot.lane.b32.xlu0 %v3409_v22, %s4981_s28  ;;  %3753 = vmatpush.bf16.msrb.mxu2 %v4583_v8 }
 0x3ae   :  { %3740 = vmatpush.bf16.msrb.mxu1 %v4575_v29 }
 0x3af   :  { %v3411_v11 = vpop.permute.xlu0 %3410  ;;  %3754 = vmatpush.bf16.msrb.mxu2 %v4582_v17  ;;  %v4604_v17 = vld [vmem:[%s8020_s7 + $0x20] sm:$0xff] }
 0x3b0   :  { %v3430_v52 = vsel %vm2831_vm7, %v7659_v54, %v3411_v11  ;;  %v4590_v11 = vld [vmem:[%s8019_s5 + $0xd0] sm:$0xff] }
 0x3b1   :  { %v3447_v13 = vrot.slane %v3430_v52, 4 }
 0x3b2   :  { %3741 = vmatpush.bf16.msrb.mxu1 %v4574_v59  ;;  %v4623_v59 = vld [vmem:[%s8020_s7 + $0xb8] sm:$0xff] }
 0x3b3   :  { %v3460_v54 = vsel %vm3459_vm0, %v3447_v13, %v3448_v27  ;;  %3755 = vmatpush.bf16.msrb.mxu2 %v4581_v19  ;;  %v4589_v27 = vld [vmem:[%s8019_s5 + $0xc8] sm:$0xff]  ;;  %v4622_v19 = vld [vmem:[%s8020_s7 + $0xb0] sm:$0xff] }
 0x3b6   :  { %3742 = vmatpush.bf16.msrb.mxu1 %v4573_v5  ;;  %v4614_v5 = vld [vmem:[%s8020_s7 + $0x70] sm:$0xff] }
 0x3b7   :  { %v3367_v1 = vpop.permute.xlu1 %3366  ;;  %v3397_v32 = vpop.permute.xlu0 %3396  ;;  %3756 = vmatpush.bf16.msrb.mxu2 %v4580_v46  ;;  %v4612_v46 = vld [vmem:[%s8020_s7 + $0x60] sm:$0xff] }
 0x3b8   :  { %v7744_v12 = vsel %vm2831_vm7, %v7676_v20, %v3367_v1  ;;  %v4569_v20 = vld [vmem:[%s8019_s5 + $0x28] sm:$0xff]  ;;  %v3427_v52 = vsel %vm2831_vm7, %v3383_v39, %v3397_v32 }
 0x3b9   :  { %v3458_v10 = vsel %vm8279_vm15, %v7744_v12, %v3446_v18  ;;  %3725 = vmatpush.bf16.msrb.mxu3 %v4569_v20  ;;  %v3449_v18 = vrot.slane %v3427_v52, 6  ;;  %v4621_v32 = vld [vmem:[%s8020_s7 + $0xa8] sm:$0xff]  ;;  %v4627_v52 = vld [vmem:[%s8020_s7 + $0xd8] sm:$0xff] }
 0x3ba   :  { %v3461_v25 = vsel %vm2585_vm6, %v3458_v10, %v3460_v54  ;;  %3743 = vmatpush.bf16.msrb.mxu1 %v4572_v48  ;;  %v3451_v10 = vrot.slane %v7744_v12, 2  ;;  %v4601_v48 = vld [vmem:[%s8020_s7 + $0x8] sm:$0xff] }
 0x3bb   :  { %3471 = vst [vmem:[#allocation1] ss:$4 sm:$0xff] %v3461_v25  ;;  %v3462_v20 = vsel %vm8281_vm5, %v7739_v15, %v3449_v18  ;;  %4073 = vmatpush.bf16.msra.mxu2 %v4607_v24  ;;  %v4626_v18 = vld [vmem:[%s8020_s7 + $0xd0] sm:$0xff] }
 0x3bd   :  { %3726 = vmatpush.bf16.msrb.mxu3 %v4568_v42 }
 0x3be   :  { %3779 = vmatpush.bf16.msra.mxu1 %v4599_v57  ;;  %v4600_v57 = vld [vmem:[%s8020_s7] sm:$0xff] }
 0x3bf   :  { %4074 = vmatpush.bf16.msra.mxu2 %v4606_v38 }
 0x3c1   :  { %3727 = vmatpush.bf16.msrb.mxu3 %v4567_v61 }
 0x3c2   :  { %3780 = vmatpush.bf16.msra.mxu1 %v4598_v23  ;;  %v4618_v23 = vld [vmem:[%s8020_s7 + $0x90] sm:$0xff] }
 0x3c5   :  { %3728 = vmatpush.bf16.msrb.mxu3 %v4566_v0 }
 0x3c6   :  { %3781 = vmatpush.bf16.msra.mxu1 %v4597_v14 }
 0x3c9   :  { %3729 = vmatpush.bf16.msrb.mxu3 %v4565_v31 }
 0x3ca   :  { %3782 = vmatpush.bf16.msra.mxu1 %v4596_v41 }
 0x3cd   :  { %3730 = vmatpush.bf16.msrb.mxu3 %v4564_v16  ;;  %v3490_v16 = vld.sshfl [vmem:[#allocation1 + $0x20] sm:$0xff pattern:$0x73625140] }
 0x3ce   :  { %v3500_v8 = vpack.c.bf16 %v3490_v16, %v3490_v16 }
 0x3d1   :  { %3762 = vmatpush.bf16.msra.mxu3 %v4595_v49  ;;  %v4605_v49 = vld [vmem:[%s8020_s7 + $0x28] sm:$0xff] }
 0x3d2   :  { %4075 = vmatpush.bf16.msra.mxu2 %v4605_v49 }
 0x3d5   :  { %3763 = vmatpush.bf16.msra.mxu3 %v4594_v58  ;;  %v4603_v58 = vld [vmem:[%s8020_s7 + $0x18] sm:$0xff] }
 0x3d6   :  { %4076 = vmatpush.bf16.msra.mxu2 %v4604_v17  ;;  %v4126_v17 = vld [vmem:[%s8024_s9] sm:$0xff] }
 0x3d9   :  { %3764 = vmatpush.bf16.msra.mxu3 %v4593_v2  ;;  %v4602_v2 = vld [vmem:[%s8020_s7 + $0x10] sm:$0xff] }
 0x3da   :  { %4077 = vmatpush.bf16.msra.mxu2 %v4603_v58  ;;  %v4158_v58 = vld [vmem:[%s8025_s11] sm:$0x3] }
 0x3db   :  { %4160 = vrot.lane.b32.xlu1 %v4158_v58, %s4976_s21 }
 0x3dd   :  { %3765 = vmatpush.bf16.msra.mxu3 %v4592_v9  ;;  %v4620_v9 = vld [vmem:[%s8020_s7 + $0xa0] sm:$0xff] }
 0x3de   :  { %4078 = vmatpush.bf16.msra.mxu2 %v4602_v2 }
 0x3e1   :  { %3766 = vmatpush.bf16.msra.mxu3 %v4591_v7  ;;  %v4610_v7 = vld [vmem:[%s8020_s7 + $0x50] sm:$0xff] }
 0x3e2   :  { %4079 = vmatpush.bf16.msra.mxu2 %v4601_v48 }
 0x3e5   :  { %3767 = vmatpush.bf16.msra.mxu3 %v4590_v11  ;;  %v4628_v11 = vld [vmem:[%s8020_s7 + $0xe0] sm:$0xff] }
 0x3e6   :  { %4080 = vmatpush.bf16.msra.mxu2 %v4600_v57 }
 0x3e9   :  { %3768 = vmatpush.bf16.msra.mxu3 %v4589_v27 }
 0x3fb   :  { %v3401_v62 = vpop.permute.xlu2 %3400 }
 0x3fc   :  { %v3429_v39 = vsel %vm2831_vm7, %v3385_v21, %v3401_v62  ;;  %v4615_v62 = vld [vmem:[%s8020_s7 + $0x78] sm:$0xff] }
 0x403   :  { %v3415_v44 = vpop.permute.xlu2 %3414 }
 0x404   :  { %v3432_v60 = vsel %vm2831_vm7, %v7705_v34, %v3415_v44  ;;  %v4611_v44 = vld [vmem:[%s8020_s7 + $0x58] sm:$0xff] }
 0x405   :  { %v3453_v55 = vrot.slane %v3432_v60, 4  ;;  %v4619_v60 = vld [vmem:[%s8020_s7 + $0x98] sm:$0xff] }
 0x40b   :  { %v3399_v50 = vpop.permute.xlu1 %3398 }
 0x40c   :  { %v3428_v40 = vsel %vm2831_vm7, %v3384_v53, %v3399_v50  ;;  %v4613_v50 = vld [vmem:[%s8020_s7 + $0x68] sm:$0xff] }
 0x40d   :  { %v3452_v34 = vrot.slane %v3428_v40, 6  ;;  %v4631_v40 = vld [vmem:[%s8020_s7 + $0xf8] sm:$0xff] }
 0x413   :  { %v3373_v3 = vpop.permute.xlu1 %3372 }
 0x414   :  { %v3425_v63 = vsel %vm2831_vm7, %v7702_v36, %v3373_v3  ;;  %v4588_v36 = vld [vmem:[%s8019_s5 + $0xc0] sm:$0xff]  ;;  %v4630_v3 = vld [vmem:[%s8020_s7 + $0xf0] sm:$0xff] }
 0x415   :  { %v3454_v56 = vrot.slane %v3425_v63, 2  ;;  %v3371_v22 = vpop.permute.xlu0 %3370  ;;  %3769 = vmatpush.bf16.msra.mxu3 %v4588_v36 }
 0x416   :  { %v3424_v53 = vsel %vm2831_vm7, %v7719_v45, %v3371_v22  ;;  %v4608_v22 = vld [vmem:[%s8020_s7 + $0x40] sm:$0xff] }
 0x417   :  { %v3466_v4 = vsel %vm3459_vm0, %v3453_v55, %v3454_v56  ;;  %v3465_v13 = vsel %vm8280_vm4, %v3424_v53, %v3452_v34  ;;  %v3457_v21 = vrot.slane %v3424_v53, 2  ;;  %v4617_v55 = vld [vmem:[%s8020_s7 + $0x88] sm:$0xff]  ;;  %v4616_v53 = vld [vmem:[%s8020_s7 + $0x80] sm:$0xff] }
 0x418   :  { %v3467_v45 = vsel %vm2585_vm6, %v3465_v13, %v3466_v4  ;;  %v4629_v34 = vld [vmem:[%s8020_s7 + $0xe8] sm:$0xff] }
 0x419   :  { %3475 = vst [vmem:[#allocation1 + $0x2] ss:$4 sm:$0xff] %v3467_v45  ;;  %v4965_v45 = vld [vmem:[%s8021_s6] ss:$0 sm:$0xff] }
 0x41b   :  { %v3413_v1 = vpop.permute.xlu1 %3412 }
 0x41c   :  { %v3431_v54 = vsel %vm2831_vm7, %v7669_v33, %v3413_v1  ;;  %v3455_v33 = vrot.slane %v3429_v39, 6  ;;  %v4625_v1 = vld [vmem:[%s8020_s7 + $0xc8] sm:$0xff] }
 0x41d   :  { %v3450_v25 = vrot.slane %v3431_v54, 4  ;;  %v3417_v37 = vpop.permute.xlu0 %3416 }
 0x41e   :  { %v3433_v42 = vsel %vm2831_vm7, %v7722_v26, %v3417_v37  ;;  %v3468_v26 = vsel %vm8282_vm10, %v3425_v63, %v3455_v33  ;;  %v4609_v63 = vld [vmem:[%s8020_s7 + $0x48] sm:$0xff] }
 0x41f   :  { %v3463_v12 = vsel %vm3459_vm0, %v3450_v25, %v3451_v10  ;;  %v3456_v47 = vrot.slane %v3433_v42, 4  ;;  %v4624_v25 = vld [vmem:[%s8020_s7 + $0xc0] sm:$0xff] }
 0x420   :  { %v3464_v15 = vsel %vm2585_vm6, %v3462_v20, %v3463_v12 }
 0x421   :  { %3473 = vst [vmem:[#allocation1 + $0x1] ss:$4 sm:$0xff] %v3464_v15  ;;  %v3469_v61 = vsel %vm3459_vm0, %v3456_v47, %v3457_v21 }
 0x422   :  { %v3470_v51 = vsel %vm2585_vm6, %v3468_v26, %v3469_v61  ;;  %vm4174_vm6 = vcmask 189440  }
 0x423   :  { %3477 = vst [vmem:[#allocation1 + $0x3] ss:$4 sm:$0xff] %v3470_v51 }
 0x42a   :  { %v3486_v35 = vld.sshfl [vmem:[#allocation1] sm:$0xff pattern:$0x73625140]  ;;  %v3487_v0 = vld.sshfl [vmem:[#allocation1 + $0x8] sm:$0xff pattern:$0x73625140] }
 0x42b   :  { %v3496_v28 = vpack.c.bf16 %v3486_v35, %v3486_v35  ;;  %v3497_v30 = vpack.c.bf16 %v3487_v0, %v3487_v0  ;;  %v3488_v31 = vld.sshfl [vmem:[#allocation1 + $0x10] sm:$0xff pattern:$0x73625140]  ;;  %v3489_v43 = vld.sshfl [vmem:[#allocation1 + $0x18] sm:$0xff pattern:$0x73625140] }
 0x42c   :  { %v3498_v6 = vpack.c.bf16 %v3488_v31, %v3488_v31  ;;  %v3499_v29 = vpack.c.bf16 %v3489_v43, %v3489_v43 }
 0x42d   :  { %3731 = vmatmul.bf16.vlgmr.msrb.gmra.mxu3 %v3496_v28  ;;  %3744 = vmatmul.bf16.vlgmr.msrb.gmra.mxu1 %v3497_v30 }
 0x42e   :  { %3757 = vmatmul.bf16.vlgmr.msrb.gmra.mxu2 %v3498_v6  ;;  %4086 = vmatpush.bf16.msrb.mxu3 %v4615_v62 }
 0x42f   :  { %4099 = vmatpush.bf16.msrb.mxu1 %v4623_v59  ;;  %4112 = vmatpush.bf16.msrb.mxu2 %v4631_v40  ;;  %v4127_v59 = vld [vmem:[%s8024_s9 + $0x8] sm:$0xff] }
 0x432   :  { %4087 = vmatpush.bf16.msrb.mxu3 %v4614_v5 }
 0x433   :  { %4100 = vmatpush.bf16.msrb.mxu1 %v4622_v19  ;;  %4113 = vmatpush.bf16.msrb.mxu2 %v4630_v3  ;;  %v4967_v3 = vld [vmem:[%s8023_s10] ss:$0 sm:$0xff] }
 0x436   :  { %4088 = vmatpush.bf16.msrb.mxu3 %v4613_v50  ;;  %v4966_v50 = vld [vmem:[%s8022_s8] ss:$0 sm:$0xff]  ;;  %s4982_s8 = smov 120  }
 0x437   :  { %4101 = vmatpush.bf16.msrb.mxu1 %v4621_v32  ;;  %4114 = vmatpush.bf16.msrb.mxu2 %v4629_v34 }
 0x43a   :  { %4089 = vmatpush.bf16.msrb.mxu3 %v4612_v46 }
 0x43b   :  { %4102 = vmatpush.bf16.msrb.mxu1 %v4620_v9  ;;  %4115 = vmatpush.bf16.msrb.mxu2 %v4628_v11 }
 0x43d   :  { %3770 = vmatmul.bf16.vlgmr.msra.gmra.mxu3 %v3499_v29  ;;  %4414 = vmatmul.msk.bf16.vlgmr.msra.gmra.mxu1 %vm2831_vm7, %v3500_v8 }
 0x43e   :  { %4090 = vmatpush.bf16.msrb.mxu3 %v4611_v44 }
 0x43f   :  { %4103 = vmatpush.bf16.msrb.mxu1 %v4619_v60  ;;  %4116 = vmatpush.bf16.msrb.mxu2 %v4627_v52 }
 0x442   :  { %4091 = vmatpush.bf16.msrb.mxu3 %v4610_v7 }
 0x443   :  { %4104 = vmatpush.bf16.msrb.mxu1 %v4618_v23  ;;  %4117 = vmatpush.bf16.msrb.mxu2 %v4626_v18 }
 0x446   :  { %4092 = vmatpush.bf16.msrb.mxu3 %v4609_v63 }
 0x447   :  { %4105 = vmatpush.bf16.msrb.mxu1 %v4617_v55  ;;  %4118 = vmatpush.bf16.msrb.mxu2 %v4625_v1 }
 0x44a   :  { %4093 = vmatpush.bf16.msrb.mxu3 %v4608_v22 }
 0x44b   :  { %4106 = vmatpush.bf16.msrb.mxu1 %v4616_v53  ;;  %4119 = vmatpush.bf16.msrb.mxu2 %v4624_v25 }
 0x44d   :  { %v4161_v22 = vpop.permute.xlu1 %4160 }
 0x44e   :  { %4149 = vmatpush.msra.mxu3 %v4127_v59 }
 0x450   :  { %4150 = vmatpush.msra.mxu3 %v4126_v17 }
 0x4aa   :  { %v3745_v56 = vpop.f32.mrf.mxu1 }
 0x4b0   :  { %v3732_v14 = vpop.f32.mrf.mxu3 }
 0x4b1   :  { %v3758_v4 = vpop.f32.mrf.mxu2  ;;  %v3733_v27 = vadd.f32 %v4965_v45, %v3732_v14 }
 0x4b2   :  { %v3747_v13 = vpop.f32.mrf.mxu1 }
 0x4b3   :  { %v3746_v10 = vadd.f32 %v3745_v56, %v3733_v27 }
 0x4b5   :  { %v3759_v37 = vadd.f32 %v3758_v4, %v3746_v10 }
 0x4b8   :  { %v3734_v41 = vpop.f32.mrf.mxu3 }
 0x4b9   :  { %v3760_v39 = vpop.f32.mrf.mxu2 }
 0x4ba   :  { %v3784_v54 = vpop.f32.mrf.mxu1 }
 0x4c0   :  { %v3771_v24 = vpop.f32.mrf.mxu3 }
 0x4c1   :  { %v3772_v20 = vadd.f32 %v3771_v24, %v3759_v37 }
 0x4c2   :  { %v3786_v42 = vpop.f32.mrf.mxu1 }
 0x4c3   :  { %v3785_v36 = vadd.f32 %v3784_v54, %v3772_v20 }
 0x4c5   :  { %v3788_v33 = vmax.f32 %v3785_v36, 0.0 }
 0x4c7   :  { %v3791_v21 = vrot.slane %v3788_v33, 4  ;;  %v3790_v12 = vrot.slane %v3788_v33, 2  ;;  %v3793_v38 = vperm.slane %v3788_v33, 0  ;;  %v3792_v15 = vrot.slane %v3788_v33, 6 }
 0x4c8   :  { %v3773_v47 = vpop.f32.mrf.mxu3  ;;  %v3797_v61 = vperm.slane %v3788_v33, 1 }
 0x4c9   :  { %v3794_v26 = vperm.slane %v3791_v21, 0  ;;  %v3798_v51 = vperm.slane %v3791_v21, 1  ;;  %v3801_v35 = vperm.slane %v3790_v12, 0  ;;  %v3802_v0 = vperm.slane %v3792_v15, 0 }
 0x4ca   :  { %v3805_v29 = vperm.slane %v3790_v12, 1  ;;  %v3806_v8 = vperm.slane %v3792_v15, 1 }
 0x4cb   :  { %v3795_v28 = vsel %vm1201_vm1, %v3794_v26, %v3793_v38  ;;  %v3799_v30 = vsel %vm1201_vm1, %v3798_v51, %v3797_v61  ;;  %v3803_v43 = vsel %vm1201_vm1, %v3802_v0, %v3801_v35 }
 0x4cc   :  { %v3873_v31 = vpack.c.bf16 %v3795_v28, %v3795_v28  ;;  %v3874_v6 = vpack.c.bf16 %v3799_v30, %v3799_v30  ;;  %v3875_v16 = vpack.c.bf16 %v3803_v43, %v3803_v43  ;;  %v3807_v49 = vsel %vm1201_vm1, %v3806_v8, %v3805_v29 }
 0x4cd   :  { %v3876_v62 = vpack.c.bf16 %v3807_v49, %v3807_v49  ;;  %vm8283_vm1 = vcmask 130048  }
 0x4ce   :  { %4081 = vmatmul.bf16.vlgmr.msra.gmra.mxu2 %v3873_v31  ;;  %4094 = vmatmul.bf16.vlgmr.msrb.gmra.mxu3 %v3874_v6  ;;  %vm8284_vm7 = vmmov %vm8283_vm1 }
 0x4cf   :  { %4107 = vmatmul.bf16.vlgmr.msrb.gmra.mxu1 %v3875_v16 }
 0x4de   :  { %4120 = vmatmul.bf16.vlgmr.msrb.gmra.mxu2 %v3876_v62 }
 0x54c   :  { %v4108_v5 = vpop.f32.mrf.mxu1 }
 0x551   :  { %v4082_v19 = vpop.f32.mrf.mxu2  ;;  %v4095_v2 = vpop.f32.mrf.mxu3 }
 0x552   :  { %v4083_v48 = vadd.f32 %v4966_v50, %v4082_v19 }
 0x554   :  { %v4110_v32 = vpop.f32.mrf.mxu1  ;;  %v4096_v57 = vadd.f32 %v4095_v2, %v4083_v48 }
 0x556   :  { %v4109_v44 = vadd.f32 %v4108_v5, %v4096_v57 }
 0x559   :  { %v4084_v46 = vpop.f32.mrf.mxu2  ;;  %v4097_v9 = vpop.f32.mrf.mxu3 }
 0x561   :  { %v4121_v60 = vpop.f32.mrf.mxu2 }
 0x562   :  { %v4122_v40 = vadd.f32 %v4121_v60, %v4109_v44 }
 0x564   :  { %v4125_v7 = vmax.f32 %v4122_v40, 0.0 }
 0x566   :  { %4543 = vmatmul.msk.f32.vlgmr.msra.gmra.mxu3 %vm8283_vm1, %v4125_v7 }
 0x569   :  { %v4123_v23 = vpop.f32.mrf.mxu2 }
 0x5e9   :  { %v4152_v63 = vpop.f32.mrf.mxu3 }
 0x5ea   :  { %v4153_v55 = vadd.f32 %v4967_v3, %v4152_v63 }
 0x5ec   :  { %v4155_v34 = vmul.f32 0.5, %v4153_v55 }
 0x5ee   :  { %v4156_v56 = vmul.f32 1.442695, %v4155_v34 }
 0x5f0   :  { %4968 = vpow2.f32 %v4156_v56 }
 0x5f6   :  { %v4969_v53 = vpop.eup %4968 }
 0x5f7   :  { %v4163_v11 = vmul.f32 %v4969_v53, %v4161_v22 }
 0x5f9   :  { %4165 = vrot.lane.b32.xlu2 %v4163_v11, %s4982_s8 }
 0x653   :  { %v4166_v14 = vpop.permute.xlu2 %4165 }
 0x654   :  { %v4168_v52 = vadd.f32 %v4166_v14, %v4153_v55 }
 0x656   :  { %4170 = vrot.lane.b32.xlu0 %v4168_v52, %s4975_s14 }
 0x6c8   :  { %v4171_v4 = vpop.permute.xlu0 %4170 }
 0x6c9   :  { %v4173_v13 = vsel %vm8284_vm7, %v4153_v55, %v4171_v4 }
 0x6ca   :  { %4175 = vst.msk [vmem:[%s8026_s12] sm:$0x3] %vm4174_vm6, %v4173_v13 }

</bundles_post_ra>
